<compile_context>
chip_gen: v5e
topology: v5e:2x2
jax: 0.10.0
libtpu: 0.0.40
codegen_flags: <defaults>
</compile_context>

<pallas_src>
import functools

import jax
import jax.numpy as jnp
from jax.experimental import pallas as pl
from jax.experimental.pallas import tpu as pltpu


# ---------------------------------------------------------------------------
# Fused kernel: conv1+pool, conv2+pool, conv3+pool, conv4+avgpool+both heads.
# One batch element per grid step; everything stays in VMEM.
#
# Inter-layer layout ("padded flat"): act[(r)*(Wl+2) + c] = zero-padded image
# row r, col c (1 top / 2 bottom / 1 left / 1 right zero border), so conv tap
# (kh,kw) is a contiguous sublane slice of length Hl*(Wl+2) — no reshapes.
# Columns j >= Wl of each flat row are junk and are dropped by the pooling.
# ---------------------------------------------------------------------------
def _fused_kernel(H, W,
                  p1_ref, w1_ref, b1_ref, w2_ref, b2_ref, w3_ref, b3_ref,
                  w4_ref, b4_ref, hw1_ref, hb1_ref, hw2_ref, hb2_ref,
                  o_ref,
                  y1_ref, act1_ref, patch2_ref, y2_ref, act2_ref,
                  patch3_ref, y3_ref, act3_ref, patch4_ref):
    H2, W2 = H // 2, W // 2
    H3, W3 = H2 // 2, W2 // 2
    H4, W4 = H3 // 2, W3 // 2

    # One dense zero store per activation scratch per step (padding rows/cols
    # must be zero before the tap slices read them).  VMEM-only, <20 KB total.
    act1_ref[...] = jnp.zeros_like(act1_ref)
    act2_ref[...] = jnp.zeros_like(act2_ref)
    act3_ref[...] = jnp.zeros_like(act3_ref)

    def conv(patch, w_ref, b_ref):
        # single MXU dot with K = 9*Cin (bf16 operands, f32 accumulate),
        # bias + ReLU epilogue in f32
        acc = jnp.dot(patch, w_ref[...], preferred_element_type=jnp.float32)
        return jnp.maximum(acc + b_ref[...], 0.0)

    def pool_w(y_ref, rows):
        # 2x max-pool along W: adjacent flat rows pair up (row width is even,
        # so pairs never straddle an image row boundary)
        half = rows // 2
        return jnp.maximum(y_ref[pl.ds(0, half, stride=2), :],
                           y_ref[pl.ds(1, half, stride=2), :])

    def pool_h_store(pw, act_ref, Ho, Wo, Wrow):
        # 2x max-pool along H; pooled row a lands at padded row a+1, cols
        # 1..Wo of the next layer's padded-flat scratch (padding stays zero).
        Wop = Wo + 2
        for a in range(Ho):
            top = pw[2 * a * Wrow: 2 * a * Wrow + Wo, :]
            bot = pw[(2 * a + 1) * Wrow: (2 * a + 1) * Wrow + Wo, :]
            act_ref[pl.ds((a + 1) * Wop + 1, Wo), :] = (
                jnp.maximum(top, bot).astype(act_ref.dtype))

    def build_patch(act_ref, patch_ref, Hl, Wl, Cin):
        # im2col: 9 contiguous shifted sublane slices of the padded-flat
        # activation, stored at static lane offsets t*Cin of (rows, 9*Cin).
        Wp = Wl + 2
        rows = Hl * Wp
        for kh in range(3):
            for kw in range(3):
                t = kh * 3 + kw
                patch_ref[:, pl.ds(t * Cin, Cin)] = (
                    act_ref[pl.ds(kh * Wp + kw, rows), :])

    # ---- layer 1: Conv2d(3,32,3,pad=1) + ReLU + MaxPool2d(2); K = 27 ------
    # patch comes prebuilt from the wrapper, so y1 has no junk columns.
    y1_ref[...] = conv(p1_ref[0], w1_ref, b1_ref)          # (H*W, 32) f32
    pw1 = pool_w(y1_ref, H * W)                            # (H*W/2, 32)
    pool_h_store(pw1, act1_ref, H2, W2, W2)

    # ---- layer 2: Conv2d(32,64) + ReLU + MaxPool2d(2); K = 288 ------------
    build_patch(act1_ref, patch2_ref, H2, W2, 32)
    y2_ref[...] = conv(patch2_ref[...], w2_ref, b2_ref)    # (H2*(W2+2), 64)
    pw2 = pool_w(y2_ref, H2 * (W2 + 2))                    # row width W3+1 (last col junk)
    pool_h_store(pw2, act2_ref, H3, W3, W3 + 1)

    # ---- layer 3: Conv2d(64,128) + ReLU + MaxPool2d(2); K = 576 -----------
    build_patch(act2_ref, patch3_ref, H3, W3, 64)
    y3_ref[...] = conv(patch3_ref[...], w3_ref, b3_ref)    # (H3*(W3+2), 128)
    pw3 = pool_w(y3_ref, H3 * (W3 + 2))
    pool_h_store(pw3, act3_ref, H4, W4, W4 + 1)

    # ---- layer 4: Conv2d(128,256) + ReLU + AdaptiveAvgPool2d((1,1)); K=1152
    build_patch(act3_ref, patch4_ref, H4, W4, 128)
    y4 = conv(patch4_ref[...], w4_ref, b4_ref)             # (H4*(W4+2), 256) f32
    Wp4 = W4 + 2
    feat = jnp.zeros((1, 256), jnp.float32)
    for i in range(H4):                                    # sum the H4*W4 valid pixels only
        feat = feat + jnp.sum(y4[i * Wp4: i * Wp4 + W4, :], axis=0, keepdims=True)
    feat = feat * (1.0 / (H4 * W4))

    # ---- packed heads: hidden = [det_hidden | cls_hidden] (1,256); block-
    # diagonal second matmul writes one lane-dense (1,128) slab -------------
    h = jnp.maximum(
        jnp.dot(feat.astype(jnp.bfloat16), hw1_ref[...],
                preferred_element_type=jnp.float32) + hb1_ref[...], 0.0)
    out = jnp.dot(h.astype(jnp.bfloat16), hw2_ref[...],
                  preferred_element_type=jnp.float32) + hb2_ref[...]
    o_ref[0] = out.astype(o_ref.dtype)                     # (1, 128)


def _fused_forward(p1, cw1, cb1, cw2, cb2, cw3, cb3, cw4, cb4,
                   hw1, hb1, hw2, hb2, *, H, W):
    B, R, K1 = p1.shape
    H2, W2 = H // 2, W // 2
    H3, W3 = H2 // 2, W2 // 2
    H4, W4 = H3 // 2, W3 // 2
    Nh = hw2.shape[1]

    def full(arr):
        nd = arr.ndim
        return pl.BlockSpec(arr.shape, lambda i: (0,) * nd)

    return pl.pallas_call(
        functools.partial(_fused_kernel, H, W),
        out_shape=jax.ShapeDtypeStruct((B, 1, Nh), jnp.float32),
        grid=(B,),
        in_specs=[
            pl.BlockSpec((1, R, K1), lambda i: (i, 0, 0)),   # layer-1 patch
            full(cw1), full(cb1), full(cw2), full(cb2),      # weights: constant
            full(cw3), full(cb3), full(cw4), full(cb4),      # block index -> DMA'd once
            full(hw1), full(hb1), full(hw2), full(hb2),
        ],
        out_specs=pl.BlockSpec((1, 1, Nh), lambda i: (i, 0, 0)),
        scratch_shapes=[
            pltpu.VMEM((H * W, 32), jnp.float32),                  # y1 pooling staging
            pltpu.VMEM(((H2 + 3) * (W2 + 2), 32), jnp.bfloat16),   # act1 padded-flat
            pltpu.VMEM((H2 * (W2 + 2), 9 * 32), jnp.bfloat16),     # patch2 (K=288)
            pltpu.VMEM((H2 * (W2 + 2), 64), jnp.float32),          # y2 pooling staging
            pltpu.VMEM(((H3 + 3) * (W3 + 2), 64), jnp.bfloat16),   # act2 padded-flat
            pltpu.VMEM((H3 * (W3 + 2), 9 * 64), jnp.bfloat16),     # patch3 (K=576)
            pltpu.VMEM((H3 * (W3 + 2), 128), jnp.float32),         # y3 pooling staging
            pltpu.VMEM(((H4 + 3) * (W4 + 2), 128), jnp.bfloat16),  # act3 padded-flat
            pltpu.VMEM((H4 * (W4 + 2), 9 * 128), jnp.bfloat16),    # patch4 (K=1152)
        ],
        compiler_params=pltpu.CompilerParams(
            dimension_semantics=("parallel",)),
    )(p1, cw1, cb1, cw2, cb2, cw3, cb3, cw4, cb4, hw1, hb1, hw2, hb2)


# ---------------------------------------------------------------------------
# Parameters (PyTorch layouts) + one-time preparation (layout/packing/bf16)
# ---------------------------------------------------------------------------
def init_params(key, num_classes=4):
    ks = jax.random.split(key, 16)

    def conv_w(k, cout, cin):
        return 0.05 * jax.random.normal(k, (cout, cin, 3, 3), jnp.float32)

    def lin_w(k, cout, cin):
        return 0.05 * jax.random.normal(k, (cout, cin), jnp.float32)

    def bias(k, n):
        return 0.01 * jax.random.normal(k, (n,), jnp.float32)

    return {
        "c1_w": conv_w(ks[0], 32, 3), "c1_b": bias(ks[1], 32),
        "c2_w": conv_w(ks[2], 64, 32), "c2_b": bias(ks[3], 64),
        "c3_w": conv_w(ks[4], 128, 64), "c3_b": bias(ks[5], 128),
        "c4_w": conv_w(ks[6], 256, 128), "c4_b": bias(ks[7], 256),
        "d1_w": lin_w(ks[8], 128, 256), "d1_b": bias(ks[9], 128),
        "d2_w": lin_w(ks[10], 4, 128), "d2_b": bias(ks[11], 4),
        "cl1_w": lin_w(ks[12], 128, 256), "cl1_b": bias(ks[13], 128),
        "cl2_w": lin_w(ks[14], num_classes, 128), "cl2_b": bias(ks[15], num_classes),
    }


def prepare_params(params, num_classes):
    """One-time (outside jit) layout prep: conv weights as (9*Cin, Cout) bf16
    (row index = (kh*3+kw)*Cin + cin, matching the in-kernel patch layout),
    biases as (1, Cout) f32, and both heads packed into two matrices."""
    def conv_prep(w):  # (Cout, Cin, 3, 3) -> (9*Cin, Cout)
        co, ci = w.shape[0], w.shape[1]
        return jnp.transpose(w, (2, 3, 1, 0)).reshape(9 * ci, co).astype(jnp.bfloat16)

    def bias_prep(b):
        return b.reshape(1, -1).astype(jnp.float32)

    hid = params["d1_w"].shape[0]                    # 128
    nc = num_classes
    assert 4 + nc <= 128, "packed head slab is 128 lanes wide"

    w1 = jnp.concatenate([params["d1_w"].T, params["cl1_w"].T], axis=1)   # (256, 2*hid)
    b1 = jnp.concatenate([params["d1_b"], params["cl1_b"]], axis=0)       # (2*hid,)
    w2 = jnp.zeros((2 * hid, 128), jnp.float32)
    w2 = w2.at[:hid, 0:4].set(params["d2_w"].T)
    w2 = w2.at[hid:, 4:4 + nc].set(params["cl2_w"].T)
    b2 = jnp.zeros((128,), jnp.float32)
    b2 = b2.at[0:4].set(params["d2_b"])
    b2 = b2.at[4:4 + nc].set(params["cl2_b"])

    return {
        "c1_w": conv_prep(params["c1_w"]), "c1_b": bias_prep(params["c1_b"]),
        "c2_w": conv_prep(params["c2_w"]), "c2_b": bias_prep(params["c2_b"]),
        "c3_w": conv_prep(params["c3_w"]), "c3_b": bias_prep(params["c3_b"]),
        "c4_w": conv_prep(params["c4_w"]), "c4_b": bias_prep(params["c4_b"]),
        "h_w1": w1.astype(jnp.bfloat16), "h_b1": bias_prep(b1),
        "h_w2": w2.astype(jnp.bfloat16), "h_b2": bias_prep(b2),
    }


# ---------------------------------------------------------------------------
# Forward pass (matches SimpleJointModel.forward semantics)
# ---------------------------------------------------------------------------
def simple_joint_model_forward(prep, x_nchw, *, num_classes=4):
    x = jnp.transpose(x_nchw, (0, 2, 3, 1)).astype(jnp.bfloat16)   # NCHW -> NHWC
    B, H, W, C = x.shape
    assert C == 3 and H % 8 == 0 and W % 8 == 0

    # One-time layer-1 im2col in XLA on the tiny network input (B,H,W,3):
    # produces the K=27 patch so the kernel's first conv is a single MXU dot.
    xp = jnp.pad(x, ((0, 0), (1, 1), (1, 1), (0, 0)))
    taps = [xp[:, kh:kh + H, kw:kw + W, :] for kh in range(3) for kw in range(3)]
    p1 = jnp.concatenate(taps, axis=-1).reshape(B, H * W, 9 * C)

    out = _fused_forward(
        p1,
        prep["c1_w"], prep["c1_b"], prep["c2_w"], prep["c2_b"],
        prep["c3_w"], prep["c3_b"], prep["c4_w"], prep["c4_b"],
        prep["h_w1"], prep["h_b1"], prep["h_w2"], prep["h_b2"],
        H=H, W=W)

    out = out[:, 0, :]                               # (B, 128) lane-dense slab
    detection_output = out[:, 0:4]                   # float32
    classification_output = out[:, 4:4 + num_classes]
    return detection_output, classification_output


# ---------------------------------------------------------------------------
# Pure-JAX f32 reference (loose numerical sanity check vs bf16-MXU kernel)
# ---------------------------------------------------------------------------
def _reference_forward(params, x_nchw, num_classes):
    x = jnp.transpose(x_nchw, (0, 2, 3, 1)).astype(jnp.float32)

    def conv3x3_relu(x, w, b):
        B, H, W, Cin = x.shape
        xp = jnp.pad(x, ((0, 0), (1, 1), (1, 1), (0, 0)))
        cols = [xp[:, i:i + H, j:j + W, :] for i in range(3) for j in range(3)]
        p = jnp.concatenate(cols, axis=-1).reshape(B * H * W, 9 * Cin)
        w2 = jnp.transpose(w, (2, 3, 1, 0)).reshape(9 * Cin, w.shape[0])
        return jnp.maximum(p @ w2 + b, 0.0).reshape(B, H, W, w.shape[0])

    def pool(x):
        return jnp.max(jnp.stack([x[:, 0::2, 0::2, :], x[:, 0::2, 1::2, :],
                                  x[:, 1::2, 0::2, :], x[:, 1::2, 1::2, :]]), axis=0)

    x = pool(conv3x3_relu(x, params["c1_w"], params["c1_b"]))
    x = pool(conv3x3_relu(x, params["c2_w"], params["c2_b"]))
    x = pool(conv3x3_relu(x, params["c3_w"], params["c3_b"]))
    x = conv3x3_relu(x, params["c4_w"], params["c4_b"])
    feat = jnp.mean(x, axis=(1, 2))
    h_det = jnp.maximum(feat @ params["d1_w"].T + params["d1_b"], 0.0)
    det = h_det @ params["d2_w"].T + params["d2_b"]
    h_cls = jnp.maximum(feat @ params["cl1_w"].T + params["cl1_b"], 0.0)
    cls = h_cls @ params["cl2_w"].T + params["cl2_b"]
    return det, cls


if __name__ == "__main__":
    num_classes = 4
    key = jax.random.PRNGKey(0)
    pkey, xkey = jax.random.split(key)
    params = init_params(pkey, num_classes=num_classes)
    prep = prepare_params(params, num_classes)       # one-time layout prep

    # PyTorch-convention NCHW input: batch=2, channels=3, 16x16 spatial
    x = jax.random.normal(xkey, (2, 3, 16, 16), jnp.float32)

    fwd = jax.jit(functools.partial(simple_joint_model_forward,
                                    num_classes=num_classes))
    det, cls = fwd(prep, x)
    jax.block_until_ready((det, cls))

    assert det.shape == (2, 4), det.shape
    assert cls.shape == (2, num_classes), cls.shape
    assert det.dtype == jnp.float32 and cls.dtype == jnp.float32

    # loose tolerance: MXU operands are bf16 (accumulation is f32)
    ref_det, ref_cls = _reference_forward(params, x, num_classes)
    assert bool(jnp.allclose(det, ref_det, atol=5e-2, rtol=1e-1))
    assert bool(jnp.allclose(cls, ref_cls, atol=5e-2, rtol=1e-1))

    print("KERNEL_OK")
</pallas_src>

<mosaic_0001>
module attributes {stable_mosaic.version = 11 : i64} {
  func.func @_fused_kernel(%arg0: i32, %arg1: memref<1x256x27xbf16, #tpu.memory_space<vmem>>, %arg2: memref<27x32xbf16, #tpu.memory_space<vmem>>, %arg3: memref<1x32xf32, #tpu.memory_space<vmem>>, %arg4: memref<288x64xbf16, #tpu.memory_space<vmem>>, %arg5: memref<1x64xf32, #tpu.memory_space<vmem>>, %arg6: memref<576x128xbf16, #tpu.memory_space<vmem>>, %arg7: memref<1x128xf32, #tpu.memory_space<vmem>>, %arg8: memref<1152x256xbf16, #tpu.memory_space<vmem>>, %arg9: memref<1x256xf32, #tpu.memory_space<vmem>>, %arg10: memref<256x256xbf16, #tpu.memory_space<vmem>>, %arg11: memref<1x256xf32, #tpu.memory_space<vmem>>, %arg12: memref<256x128xbf16, #tpu.memory_space<vmem>>, %arg13: memref<1x128xf32, #tpu.memory_space<vmem>>, %arg14: memref<1x1x128xf32, #tpu.memory_space<vmem>>, %arg15: memref<256x32xf32, #tpu.memory_space<vmem>>, %arg16: memref<110x32xbf16, #tpu.memory_space<vmem>>, %arg17: memref<80x288xbf16, #tpu.memory_space<vmem>>, %arg18: memref<80x64xf32, #tpu.memory_space<vmem>>, %arg19: memref<42x64xbf16, #tpu.memory_space<vmem>>, %arg20: memref<24x576xbf16, #tpu.memory_space<vmem>>, %arg21: memref<24x128xf32, #tpu.memory_space<vmem>>, %arg22: memref<20x128xbf16, #tpu.memory_space<vmem>>, %arg23: memref<8x1152xbf16, #tpu.memory_space<vmem>>) attributes {dimension_semantics = [#tpu.dimension_semantics<parallel>], iteration_bounds = array<i64: 2>, scalar_prefetch = 0 : i64, scratch_operands = 9 : i64, tpu.core_type = #tpu.core_type<tc>, window_params = [{transform_indices = @transform_0, window_bounds = array<i64: 1, 256, 27>}, {pipeline_mode = #tpu.pipeline_mode<synchronous>, transform_indices = @transform_1, window_bounds = array<i64: 27, 32>}, {pipeline_mode = #tpu.pipeline_mode<synchronous>, transform_indices = @transform_2, window_bounds = array<i64: 1, 32>}, {pipeline_mode = #tpu.pipeline_mode<synchronous>, transform_indices = @transform_3, window_bounds = array<i64: 288, 64>}, {pipeline_mode = #tpu.pipeline_mode<synchronous>, transform_indices = @transform_4, window_bounds = array<i64: 1, 64>}, {pipeline_mode = #tpu.pipeline_mode<synchronous>, transform_indices = @transform_5, window_bounds = array<i64: 576, 128>}, {pipeline_mode = #tpu.pipeline_mode<synchronous>, transform_indices = @transform_6, window_bounds = array<i64: 1, 128>}, {pipeline_mode = #tpu.pipeline_mode<synchronous>, transform_indices = @transform_7, window_bounds = array<i64: 1152, 256>}, {pipeline_mode = #tpu.pipeline_mode<synchronous>, transform_indices = @transform_8, window_bounds = array<i64: 1, 256>}, {pipeline_mode = #tpu.pipeline_mode<synchronous>, transform_indices = @transform_9, window_bounds = array<i64: 256, 256>}, {pipeline_mode = #tpu.pipeline_mode<synchronous>, transform_indices = @transform_10, window_bounds = array<i64: 1, 256>}, {pipeline_mode = #tpu.pipeline_mode<synchronous>, transform_indices = @transform_11, window_bounds = array<i64: 256, 128>}, {pipeline_mode = #tpu.pipeline_mode<synchronous>, transform_indices = @transform_12, window_bounds = array<i64: 1, 128>}, {transform_indices = @transform_13, window_bounds = array<i64: 1, 1, 128>}]} {
    %cst = arith.constant 0.000000e+00 : bf16
    %0 = vector.broadcast %cst : bf16 to vector<110x32xbf16>
    %c0 = arith.constant 0 : index
    %c0_0 = arith.constant 0 : index
    %1 = vector.load %arg16[%c0, %c0_0] : memref<110x32xbf16, #tpu.memory_space<vmem>>, vector<110x32xbf16>
    tpu.vector_store %arg16[%c0, %c0_0], %0 {strides = array<i32>} : memref<110x32xbf16, #tpu.memory_space<vmem>>, vector<110x32xbf16>,
    %cst_1 = arith.constant 0.000000e+00 : bf16
    %2 = vector.broadcast %cst_1 : bf16 to vector<42x64xbf16>
    %c0_2 = arith.constant 0 : index
    %c0_3 = arith.constant 0 : index
    %3 = vector.load %arg19[%c0_2, %c0_3] : memref<42x64xbf16, #tpu.memory_space<vmem>>, vector<42x64xbf16>
    tpu.vector_store %arg19[%c0_2, %c0_3], %2 {strides = array<i32>} : memref<42x64xbf16, #tpu.memory_space<vmem>>, vector<42x64xbf16>,
    %cst_4 = arith.constant 0.000000e+00 : bf16
    %4 = vector.broadcast %cst_4 : bf16 to vector<20x128xbf16>
    %c0_5 = arith.constant 0 : index
    %c0_6 = arith.constant 0 : index
    %5 = vector.load %arg22[%c0_5, %c0_6] : memref<20x128xbf16, #tpu.memory_space<vmem>>, vector<20x128xbf16>
    tpu.vector_store %arg22[%c0_5, %c0_6], %4 {strides = array<i32>} : memref<20x128xbf16, #tpu.memory_space<vmem>>, vector<20x128xbf16>,
    %c0_7 = arith.constant 0 : index
    %c0_8 = arith.constant 0 : index
    %c0_9 = arith.constant 0 : index
    %6 = vector.load %arg1[%c0_7, %c0_8, %c0_9] : memref<1x256x27xbf16, #tpu.memory_space<vmem>>, vector<1x256x27xbf16>
    %7 = vector.shape_cast %6 : vector<1x256x27xbf16> to vector<256x27xbf16>
    %c0_10 = arith.constant 0 : index
    %c0_11 = arith.constant 0 : index
    %8 = vector.load %arg2[%c0_10, %c0_11] : memref<27x32xbf16, #tpu.memory_space<vmem>>, vector<27x32xbf16>
    %cst_12 = arith.constant dense<0.000000e+00> : vector<256x32xf32>
    %9 = tpu.matmul %7, %8, %cst_12 {dimension_numbers = #tpu.dot_dimension_numbers<[1], [0], [0], [1], [0, 0, 1, 1], [], []>} : vector<256x27xbf16>, vector<27x32xbf16>, vector<256x32xf32> -> vector<256x32xf32>
    %c0_13 = arith.constant 0 : index
    %c0_14 = arith.constant 0 : index
    %10 = vector.load %arg3[%c0_13, %c0_14] : memref<1x32xf32, #tpu.memory_space<vmem>>, vector<1x32xf32>
    %11 = vector.broadcast %10 : vector<1x32xf32> to vector<256x32xf32>
    %12 = arith.addf %9, %11 : vector<256x32xf32>
    %cst_15 = arith.constant 0.000000e+00 : f32
    %13 = vector.broadcast %cst_15 : f32 to vector<256x32xf32>
    %14 = arith.maximumf %12, %13 : vector<256x32xf32>
    %c0_16 = arith.constant 0 : index
    %c0_17 = arith.constant 0 : index
    %15 = vector.load %arg15[%c0_16, %c0_17] : memref<256x32xf32, #tpu.memory_space<vmem>>, vector<256x32xf32>
    tpu.vector_store %arg15[%c0_16, %c0_17], %14 {strides = array<i32>} : memref<256x32xf32, #tpu.memory_space<vmem>>, vector<256x32xf32>,
    %c0_18 = arith.constant 0 : index
    %c0_19 = arith.constant 0 : index
    %16 = tpu.strided_load %arg15[%c0_18, %c0_19] {strides = array<i32: 2, 1>} : memref<256x32xf32, #tpu.memory_space<vmem>>, vector<128x32xf32>
    %c1 = arith.constant 1 : index
    %c0_20 = arith.constant 0 : index
    %17 = tpu.strided_load %arg15[%c1, %c0_20] {strides = array<i32: 2, 1>} : memref<256x32xf32, #tpu.memory_space<vmem>>, vector<128x32xf32>
    %18 = arith.maximumf %16, %17 : vector<128x32xf32>
    %19 = vector.extract_strided_slice %18 {offsets = [0, 0], sizes = [8, 32], strides = [1, 1]} : vector<128x32xf32> to vector<8x32xf32>
    %20 = vector.extract_strided_slice %18 {offsets = [8, 0], sizes = [8, 32], strides = [1, 1]} : vector<128x32xf32> to vector<8x32xf32>
    %21 = arith.maximumf %19, %20 : vector<8x32xf32>
    %22 = arith.truncf %21 : vector<8x32xf32> to vector<8x32xbf16>
    %c11 = arith.constant 11 : index
    %c0_21 = arith.constant 0 : index
    %23 = vector.load %arg16[%c11, %c0_21] : memref<110x32xbf16, #tpu.memory_space<vmem>>, vector<8x32xbf16>
    tpu.vector_store %arg16[%c11, %c0_21], %22 {strides = array<i32>} : memref<110x32xbf16, #tpu.memory_space<vmem>>, vector<8x32xbf16>,
    %24 = vector.extract_strided_slice %18 {offsets = [16, 0], sizes = [8, 32], strides = [1, 1]} : vector<128x32xf32> to vector<8x32xf32>
    %25 = vector.extract_strided_slice %18 {offsets = [24, 0], sizes = [8, 32], strides = [1, 1]} : vector<128x32xf32> to vector<8x32xf32>
    %26 = arith.maximumf %24, %25 : vector<8x32xf32>
    %27 = arith.truncf %26 : vector<8x32xf32> to vector<8x32xbf16>
    %c21 = arith.constant 21 : index
    %c0_22 = arith.constant 0 : index
    %28 = vector.load %arg16[%c21, %c0_22] : memref<110x32xbf16, #tpu.memory_space<vmem>>, vector<8x32xbf16>
    tpu.vector_store %arg16[%c21, %c0_22], %27 {strides = array<i32>} : memref<110x32xbf16, #tpu.memory_space<vmem>>, vector<8x32xbf16>,
    %29 = vector.extract_strided_slice %18 {offsets = [32, 0], sizes = [8, 32], strides = [1, 1]} : vector<128x32xf32> to vector<8x32xf32>
    %30 = vector.extract_strided_slice %18 {offsets = [40, 0], sizes = [8, 32], strides = [1, 1]} : vector<128x32xf32> to vector<8x32xf32>
    %31 = arith.maximumf %29, %30 : vector<8x32xf32>
    %32 = arith.truncf %31 : vector<8x32xf32> to vector<8x32xbf16>
    %c31 = arith.constant 31 : index
    %c0_23 = arith.constant 0 : index
    %33 = vector.load %arg16[%c31, %c0_23] : memref<110x32xbf16, #tpu.memory_space<vmem>>, vector<8x32xbf16>
    tpu.vector_store %arg16[%c31, %c0_23], %32 {strides = array<i32>} : memref<110x32xbf16, #tpu.memory_space<vmem>>, vector<8x32xbf16>,
    %34 = vector.extract_strided_slice %18 {offsets = [48, 0], sizes = [8, 32], strides = [1, 1]} : vector<128x32xf32> to vector<8x32xf32>
    %35 = vector.extract_strided_slice %18 {offsets = [56, 0], sizes = [8, 32], strides = [1, 1]} : vector<128x32xf32> to vector<8x32xf32>
    %36 = arith.maximumf %34, %35 : vector<8x32xf32>
    %37 = arith.truncf %36 : vector<8x32xf32> to vector<8x32xbf16>
    %c41 = arith.constant 41 : index
    %c0_24 = arith.constant 0 : index
    %38 = vector.load %arg16[%c41, %c0_24] : memref<110x32xbf16, #tpu.memory_space<vmem>>, vector<8x32xbf16>
    tpu.vector_store %arg16[%c41, %c0_24], %37 {strides = array<i32>} : memref<110x32xbf16, #tpu.memory_space<vmem>>, vector<8x32xbf16>,
    %39 = vector.extract_strided_slice %18 {offsets = [64, 0], sizes = [8, 32], strides = [1, 1]} : vector<128x32xf32> to vector<8x32xf32>
    %40 = vector.extract_strided_slice %18 {offsets = [72, 0], sizes = [8, 32], strides = [1, 1]} : vector<128x32xf32> to vector<8x32xf32>
    %41 = arith.maximumf %39, %40 : vector<8x32xf32>
    %42 = arith.truncf %41 : vector<8x32xf32> to vector<8x32xbf16>
    %c51 = arith.constant 51 : index
    %c0_25 = arith.constant 0 : index
    %43 = vector.load %arg16[%c51, %c0_25] : memref<110x32xbf16, #tpu.memory_space<vmem>>, vector<8x32xbf16>
    tpu.vector_store %arg16[%c51, %c0_25], %42 {strides = array<i32>} : memref<110x32xbf16, #tpu.memory_space<vmem>>, vector<8x32xbf16>,
    %44 = vector.extract_strided_slice %18 {offsets = [80, 0], sizes = [8, 32], strides = [1, 1]} : vector<128x32xf32> to vector<8x32xf32>
    %45 = vector.extract_strided_slice %18 {offsets = [88, 0], sizes = [8, 32], strides = [1, 1]} : vector<128x32xf32> to vector<8x32xf32>
    %46 = arith.maximumf %44, %45 : vector<8x32xf32>
    %47 = arith.truncf %46 : vector<8x32xf32> to vector<8x32xbf16>
    %c61 = arith.constant 61 : index
    %c0_26 = arith.constant 0 : index
    %48 = vector.load %arg16[%c61, %c0_26] : memref<110x32xbf16, #tpu.memory_space<vmem>>, vector<8x32xbf16>
    tpu.vector_store %arg16[%c61, %c0_26], %47 {strides = array<i32>} : memref<110x32xbf16, #tpu.memory_space<vmem>>, vector<8x32xbf16>,
    %49 = vector.extract_strided_slice %18 {offsets = [96, 0], sizes = [8, 32], strides = [1, 1]} : vector<128x32xf32> to vector<8x32xf32>
    %50 = vector.extract_strided_slice %18 {offsets = [104, 0], sizes = [8, 32], strides = [1, 1]} : vector<128x32xf32> to vector<8x32xf32>
    %51 = arith.maximumf %49, %50 : vector<8x32xf32>
    %52 = arith.truncf %51 : vector<8x32xf32> to vector<8x32xbf16>
    %c71 = arith.constant 71 : index
    %c0_27 = arith.constant 0 : index
    %53 = vector.load %arg16[%c71, %c0_27] : memref<110x32xbf16, #tpu.memory_space<vmem>>, vector<8x32xbf16>
    tpu.vector_store %arg16[%c71, %c0_27], %52 {strides = array<i32>} : memref<110x32xbf16, #tpu.memory_space<vmem>>, vector<8x32xbf16>,
    %54 = vector.extract_strided_slice %18 {offsets = [112, 0], sizes = [8, 32], strides = [1, 1]} : vector<128x32xf32> to vector<8x32xf32>
    %55 = vector.extract_strided_slice %18 {offsets = [120, 0], sizes = [8, 32], strides = [1, 1]} : vector<128x32xf32> to vector<8x32xf32>
    %56 = arith.maximumf %54, %55 : vector<8x32xf32>
    %57 = arith.truncf %56 : vector<8x32xf32> to vector<8x32xbf16>
    %c81 = arith.constant 81 : index
    %c0_28 = arith.constant 0 : index
    %58 = vector.load %arg16[%c81, %c0_28] : memref<110x32xbf16, #tpu.memory_space<vmem>>, vector<8x32xbf16>
    tpu.vector_store %arg16[%c81, %c0_28], %57 {strides = array<i32>} : memref<110x32xbf16, #tpu.memory_space<vmem>>, vector<8x32xbf16>,
    %c0_29 = arith.constant 0 : index
    %c0_30 = arith.constant 0 : index
    %59 = vector.load %arg16[%c0_29, %c0_30] : memref<110x32xbf16, #tpu.memory_space<vmem>>, vector<80x32xbf16>
    %c0_31 = arith.constant 0 : index
    %c0_32 = arith.constant 0 : index
    %60 = vector.load %arg17[%c0_31, %c0_32] : memref<80x288xbf16, #tpu.memory_space<vmem>>, vector<80x32xbf16>
    tpu.vector_store %arg17[%c0_31, %c0_32], %59 {strides = array<i32>} : memref<80x288xbf16, #tpu.memory_space<vmem>>, vector<80x32xbf16>,
    %c1_33 = arith.constant 1 : index
    %c0_34 = arith.constant 0 : index
    %61 = vector.load %arg16[%c1_33, %c0_34] : memref<110x32xbf16, #tpu.memory_space<vmem>>, vector<80x32xbf16>
    %c0_35 = arith.constant 0 : index
    %c32 = arith.constant 32 : index
    %62 = vector.load %arg17[%c0_35, %c32] : memref<80x288xbf16, #tpu.memory_space<vmem>>, vector<80x32xbf16>
    tpu.vector_store %arg17[%c0_35, %c32], %61 {strides = array<i32>} : memref<80x288xbf16, #tpu.memory_space<vmem>>, vector<80x32xbf16>,
    %c2 = arith.constant 2 : index
    %c0_36 = arith.constant 0 : index
    %63 = vector.load %arg16[%c2, %c0_36] : memref<110x32xbf16, #tpu.memory_space<vmem>>, vector<80x32xbf16>
    %c0_37 = arith.constant 0 : index
    %c64 = arith.constant 64 : index
    %64 = vector.load %arg17[%c0_37, %c64] : memref<80x288xbf16, #tpu.memory_space<vmem>>, vector<80x32xbf16>
    tpu.vector_store %arg17[%c0_37, %c64], %63 {strides = array<i32>} : memref<80x288xbf16, #tpu.memory_space<vmem>>, vector<80x32xbf16>,
    %c10 = arith.constant 10 : index
    %c0_38 = arith.constant 0 : index
    %65 = vector.load %arg16[%c10, %c0_38] : memref<110x32xbf16, #tpu.memory_space<vmem>>, vector<80x32xbf16>
    %c0_39 = arith.constant 0 : index
    %c96 = arith.constant 96 : index
    %66 = vector.load %arg17[%c0_39, %c96] : memref<80x288xbf16, #tpu.memory_space<vmem>>, vector<80x32xbf16>
    tpu.vector_store %arg17[%c0_39, %c96], %65 {strides = array<i32>} : memref<80x288xbf16, #tpu.memory_space<vmem>>, vector<80x32xbf16>,
    %c11_40 = arith.constant 11 : index
    %c0_41 = arith.constant 0 : index
    %67 = vector.load %arg16[%c11_40, %c0_41] : memref<110x32xbf16, #tpu.memory_space<vmem>>, vector<80x32xbf16>
    %c0_42 = arith.constant 0 : index
    %c128 = arith.constant 128 : index
    %68 = vector.load %arg17[%c0_42, %c128] : memref<80x288xbf16, #tpu.memory_space<vmem>>, vector<80x32xbf16>
    tpu.vector_store %arg17[%c0_42, %c128], %67 {strides = array<i32>} : memref<80x288xbf16, #tpu.memory_space<vmem>>, vector<80x32xbf16>,
    %c12 = arith.constant 12 : index
    %c0_43 = arith.constant 0 : index
    %69 = vector.load %arg16[%c12, %c0_43] : memref<110x32xbf16, #tpu.memory_space<vmem>>, vector<80x32xbf16>
    %c0_44 = arith.constant 0 : index
    %c160 = arith.constant 160 : index
    %70 = vector.load %arg17[%c0_44, %c160] : memref<80x288xbf16, #tpu.memory_space<vmem>>, vector<80x32xbf16>
    tpu.vector_store %arg17[%c0_44, %c160], %69 {strides = array<i32>} : memref<80x288xbf16, #tpu.memory_space<vmem>>, vector<80x32xbf16>,
    %c20 = arith.constant 20 : index
    %c0_45 = arith.constant 0 : index
    %71 = vector.load %arg16[%c20, %c0_45] : memref<110x32xbf16, #tpu.memory_space<vmem>>, vector<80x32xbf16>
    %c0_46 = arith.constant 0 : index
    %c192 = arith.constant 192 : index
    %72 = vector.load %arg17[%c0_46, %c192] : memref<80x288xbf16, #tpu.memory_space<vmem>>, vector<80x32xbf16>
    tpu.vector_store %arg17[%c0_46, %c192], %71 {strides = array<i32>} : memref<80x288xbf16, #tpu.memory_space<vmem>>, vector<80x32xbf16>,
    %c21_47 = arith.constant 21 : index
    %c0_48 = arith.constant 0 : index
    %73 = vector.load %arg16[%c21_47, %c0_48] : memref<110x32xbf16, #tpu.memory_space<vmem>>, vector<80x32xbf16>
    %c0_49 = arith.constant 0 : index
    %c224 = arith.constant 224 : index
    %74 = vector.load %arg17[%c0_49, %c224] : memref<80x288xbf16, #tpu.memory_space<vmem>>, vector<80x32xbf16>
    tpu.vector_store %arg17[%c0_49, %c224], %73 {strides = array<i32>} : memref<80x288xbf16, #tpu.memory_space<vmem>>, vector<80x32xbf16>,
    %c22 = arith.constant 22 : index
    %c0_50 = arith.constant 0 : index
    %75 = vector.load %arg16[%c22, %c0_50] : memref<110x32xbf16, #tpu.memory_space<vmem>>, vector<80x32xbf16>
    %c0_51 = arith.constant 0 : index
    %c256 = arith.constant 256 : index
    %76 = vector.load %arg17[%c0_51, %c256] : memref<80x288xbf16, #tpu.memory_space<vmem>>, vector<80x32xbf16>
    tpu.vector_store %arg17[%c0_51, %c256], %75 {strides = array<i32>} : memref<80x288xbf16, #tpu.memory_space<vmem>>, vector<80x32xbf16>,
    %c0_52 = arith.constant 0 : index
    %c0_53 = arith.constant 0 : index
    %77 = vector.load %arg17[%c0_52, %c0_53] : memref<80x288xbf16, #tpu.memory_space<vmem>>, vector<80x288xbf16>
    %c0_54 = arith.constant 0 : index
    %c0_55 = arith.constant 0 : index
    %78 = vector.load %arg4[%c0_54, %c0_55] : memref<288x64xbf16, #tpu.memory_space<vmem>>, vector<288x64xbf16>
    %cst_56 = arith.constant dense<0.000000e+00> : vector<80x64xf32>
    %79 = tpu.matmul %77, %78, %cst_56 {dimension_numbers = #tpu.dot_dimension_numbers<[1], [0], [0], [1], [0, 0, 1, 1], [], []>} : vector<80x288xbf16>, vector<288x64xbf16>, vector<80x64xf32> -> vector<80x64xf32>
    %c0_57 = arith.constant 0 : index
    %c0_58 = arith.constant 0 : index
    %80 = vector.load %arg5[%c0_57, %c0_58] : memref<1x64xf32, #tpu.memory_space<vmem>>, vector<1x64xf32>
    %81 = vector.broadcast %80 : vector<1x64xf32> to vector<80x64xf32>
    %82 = arith.addf %79, %81 : vector<80x64xf32>
    %cst_59 = arith.constant 0.000000e+00 : f32
    %83 = vector.broadcast %cst_59 : f32 to vector<80x64xf32>
    %84 = arith.maximumf %82, %83 : vector<80x64xf32>
    %c0_60 = arith.constant 0 : index
    %c0_61 = arith.constant 0 : index
    %85 = vector.load %arg18[%c0_60, %c0_61] : memref<80x64xf32, #tpu.memory_space<vmem>>, vector<80x64xf32>
    tpu.vector_store %arg18[%c0_60, %c0_61], %84 {strides = array<i32>} : memref<80x64xf32, #tpu.memory_space<vmem>>, vector<80x64xf32>,
    %c0_62 = arith.constant 0 : index
    %c0_63 = arith.constant 0 : index
    %86 = tpu.strided_load %arg18[%c0_62, %c0_63] {strides = array<i32: 2, 1>} : memref<80x64xf32, #tpu.memory_space<vmem>>, vector<40x64xf32>
    %c1_64 = arith.constant 1 : index
    %c0_65 = arith.constant 0 : index
    %87 = tpu.strided_load %arg18[%c1_64, %c0_65] {strides = array<i32: 2, 1>} : memref<80x64xf32, #tpu.memory_space<vmem>>, vector<40x64xf32>
    %88 = arith.maximumf %86, %87 : vector<40x64xf32>
    %89 = vector.extract_strided_slice %88 {offsets = [0, 0], sizes = [4, 64], strides = [1, 1]} : vector<40x64xf32> to vector<4x64xf32>
    %90 = vector.extract_strided_slice %88 {offsets = [5, 0], sizes = [4, 64], strides = [1, 1]} : vector<40x64xf32> to vector<4x64xf32>
    %91 = arith.maximumf %89, %90 : vector<4x64xf32>
    %92 = arith.truncf %91 : vector<4x64xf32> to vector<4x64xbf16>
    %c7 = arith.constant 7 : index
    %c0_66 = arith.constant 0 : index
    %93 = vector.load %arg19[%c7, %c0_66] : memref<42x64xbf16, #tpu.memory_space<vmem>>, vector<4x64xbf16>
    tpu.vector_store %arg19[%c7, %c0_66], %92 {strides = array<i32>} : memref<42x64xbf16, #tpu.memory_space<vmem>>, vector<4x64xbf16>,
    %94 = vector.extract_strided_slice %88 {offsets = [10, 0], sizes = [4, 64], strides = [1, 1]} : vector<40x64xf32> to vector<4x64xf32>
    %95 = vector.extract_strided_slice %88 {offsets = [15, 0], sizes = [4, 64], strides = [1, 1]} : vector<40x64xf32> to vector<4x64xf32>
    %96 = arith.maximumf %94, %95 : vector<4x64xf32>
    %97 = arith.truncf %96 : vector<4x64xf32> to vector<4x64xbf16>
    %c13 = arith.constant 13 : index
    %c0_67 = arith.constant 0 : index
    %98 = vector.load %arg19[%c13, %c0_67] : memref<42x64xbf16, #tpu.memory_space<vmem>>, vector<4x64xbf16>
    tpu.vector_store %arg19[%c13, %c0_67], %97 {strides = array<i32>} : memref<42x64xbf16, #tpu.memory_space<vmem>>, vector<4x64xbf16>,
    %99 = vector.extract_strided_slice %88 {offsets = [20, 0], sizes = [4, 64], strides = [1, 1]} : vector<40x64xf32> to vector<4x64xf32>
    %100 = vector.extract_strided_slice %88 {offsets = [25, 0], sizes = [4, 64], strides = [1, 1]} : vector<40x64xf32> to vector<4x64xf32>
    %101 = arith.maximumf %99, %100 : vector<4x64xf32>
    %102 = arith.truncf %101 : vector<4x64xf32> to vector<4x64xbf16>
    %c19 = arith.constant 19 : index
    %c0_68 = arith.constant 0 : index
    %103 = vector.load %arg19[%c19, %c0_68] : memref<42x64xbf16, #tpu.memory_space<vmem>>, vector<4x64xbf16>
    tpu.vector_store %arg19[%c19, %c0_68], %102 {strides = array<i32>} : memref<42x64xbf16, #tpu.memory_space<vmem>>, vector<4x64xbf16>,
    %104 = vector.extract_strided_slice %88 {offsets = [30, 0], sizes = [4, 64], strides = [1, 1]} : vector<40x64xf32> to vector<4x64xf32>
    %105 = vector.extract_strided_slice %88 {offsets = [35, 0], sizes = [4, 64], strides = [1, 1]} : vector<40x64xf32> to vector<4x64xf32>
    %106 = arith.maximumf %104, %105 : vector<4x64xf32>
    %107 = arith.truncf %106 : vector<4x64xf32> to vector<4x64xbf16>
    %c25 = arith.constant 25 : index
    %c0_69 = arith.constant 0 : index
    %108 = vector.load %arg19[%c25, %c0_69] : memref<42x64xbf16, #tpu.memory_space<vmem>>, vector<4x64xbf16>
    tpu.vector_store %arg19[%c25, %c0_69], %107 {strides = array<i32>} : memref<42x64xbf16, #tpu.memory_space<vmem>>, vector<4x64xbf16>,
    %c0_70 = arith.constant 0 : index
    %c0_71 = arith.constant 0 : index
    %109 = vector.load %arg19[%c0_70, %c0_71] : memref<42x64xbf16, #tpu.memory_space<vmem>>, vector<24x64xbf16>
    %c0_72 = arith.constant 0 : index
    %c0_73 = arith.constant 0 : index
    %110 = vector.load %arg20[%c0_72, %c0_73] : memref<24x576xbf16, #tpu.memory_space<vmem>>, vector<24x64xbf16>
    tpu.vector_store %arg20[%c0_72, %c0_73], %109 {strides = array<i32>} : memref<24x576xbf16, #tpu.memory_space<vmem>>, vector<24x64xbf16>,
    %c1_74 = arith.constant 1 : index
    %c0_75 = arith.constant 0 : index
    %111 = vector.load %arg19[%c1_74, %c0_75] : memref<42x64xbf16, #tpu.memory_space<vmem>>, vector<24x64xbf16>
    %c0_76 = arith.constant 0 : index
    %c64_77 = arith.constant 64 : index
    %112 = vector.load %arg20[%c0_76, %c64_77] : memref<24x576xbf16, #tpu.memory_space<vmem>>, vector<24x64xbf16>
    tpu.vector_store %arg20[%c0_76, %c64_77], %111 {strides = array<i32>} : memref<24x576xbf16, #tpu.memory_space<vmem>>, vector<24x64xbf16>,
    %c2_78 = arith.constant 2 : index
    %c0_79 = arith.constant 0 : index
    %113 = vector.load %arg19[%c2_78, %c0_79] : memref<42x64xbf16, #tpu.memory_space<vmem>>, vector<24x64xbf16>
    %c0_80 = arith.constant 0 : index
    %c128_81 = arith.constant 128 : index
    %114 = vector.load %arg20[%c0_80, %c128_81] : memref<24x576xbf16, #tpu.memory_space<vmem>>, vector<24x64xbf16>
    tpu.vector_store %arg20[%c0_80, %c128_81], %113 {strides = array<i32>} : memref<24x576xbf16, #tpu.memory_space<vmem>>, vector<24x64xbf16>,
    %c6 = arith.constant 6 : index
    %c0_82 = arith.constant 0 : index
    %115 = vector.load %arg19[%c6, %c0_82] : memref<42x64xbf16, #tpu.memory_space<vmem>>, vector<24x64xbf16>
    %c0_83 = arith.constant 0 : index
    %c192_84 = arith.constant 192 : index
    %116 = vector.load %arg20[%c0_83, %c192_84] : memref<24x576xbf16, #tpu.memory_space<vmem>>, vector<24x64xbf16>
    tpu.vector_store %arg20[%c0_83, %c192_84], %115 {strides = array<i32>} : memref<24x576xbf16, #tpu.memory_space<vmem>>, vector<24x64xbf16>,
    %c7_85 = arith.constant 7 : index
    %c0_86 = arith.constant 0 : index
    %117 = vector.load %arg19[%c7_85, %c0_86] : memref<42x64xbf16, #tpu.memory_space<vmem>>, vector<24x64xbf16>
    %c0_87 = arith.constant 0 : index
    %c256_88 = arith.constant 256 : index
    %118 = vector.load %arg20[%c0_87, %c256_88] : memref<24x576xbf16, #tpu.memory_space<vmem>>, vector<24x64xbf16>
    tpu.vector_store %arg20[%c0_87, %c256_88], %117 {strides = array<i32>} : memref<24x576xbf16, #tpu.memory_space<vmem>>, vector<24x64xbf16>,
    %c8 = arith.constant 8 : index
    %c0_89 = arith.constant 0 : index
    %119 = vector.load %arg19[%c8, %c0_89] : memref<42x64xbf16, #tpu.memory_space<vmem>>, vector<24x64xbf16>
    %c0_90 = arith.constant 0 : index
    %c320 = arith.constant 320 : index
    %120 = vector.load %arg20[%c0_90, %c320] : memref<24x576xbf16, #tpu.memory_space<vmem>>, vector<24x64xbf16>
    tpu.vector_store %arg20[%c0_90, %c320], %119 {strides = array<i32>} : memref<24x576xbf16, #tpu.memory_space<vmem>>, vector<24x64xbf16>,
    %c12_91 = arith.constant 12 : index
    %c0_92 = arith.constant 0 : index
    %121 = vector.load %arg19[%c12_91, %c0_92] : memref<42x64xbf16, #tpu.memory_space<vmem>>, vector<24x64xbf16>
    %c0_93 = arith.constant 0 : index
    %c384 = arith.constant 384 : index
    %122 = vector.load %arg20[%c0_93, %c384] : memref<24x576xbf16, #tpu.memory_space<vmem>>, vector<24x64xbf16>
    tpu.vector_store %arg20[%c0_93, %c384], %121 {strides = array<i32>} : memref<24x576xbf16, #tpu.memory_space<vmem>>, vector<24x64xbf16>,
    %c13_94 = arith.constant 13 : index
    %c0_95 = arith.constant 0 : index
    %123 = vector.load %arg19[%c13_94, %c0_95] : memref<42x64xbf16, #tpu.memory_space<vmem>>, vector<24x64xbf16>
    %c0_96 = arith.constant 0 : index
    %c448 = arith.constant 448 : index
    %124 = vector.load %arg20[%c0_96, %c448] : memref<24x576xbf16, #tpu.memory_space<vmem>>, vector<24x64xbf16>
    tpu.vector_store %arg20[%c0_96, %c448], %123 {strides = array<i32>} : memref<24x576xbf16, #tpu.memory_space<vmem>>, vector<24x64xbf16>,
    %c14 = arith.constant 14 : index
    %c0_97 = arith.constant 0 : index
    %125 = vector.load %arg19[%c14, %c0_97] : memref<42x64xbf16, #tpu.memory_space<vmem>>, vector<24x64xbf16>
    %c0_98 = arith.constant 0 : index
    %c512 = arith.constant 512 : index
    %126 = vector.load %arg20[%c0_98, %c512] : memref<24x576xbf16, #tpu.memory_space<vmem>>, vector<24x64xbf16>
    tpu.vector_store %arg20[%c0_98, %c512], %125 {strides = array<i32>} : memref<24x576xbf16, #tpu.memory_space<vmem>>, vector<24x64xbf16>,
    %c0_99 = arith.constant 0 : index
    %c0_100 = arith.constant 0 : index
    %127 = vector.load %arg20[%c0_99, %c0_100] : memref<24x576xbf16, #tpu.memory_space<vmem>>, vector<24x576xbf16>
    %c0_101 = arith.constant 0 : index
    %c0_102 = arith.constant 0 : index
    %128 = vector.load %arg6[%c0_101, %c0_102] : memref<576x128xbf16, #tpu.memory_space<vmem>>, vector<576x128xbf16>
    %cst_103 = arith.constant dense<0.000000e+00> : vector<24x128xf32>
    %129 = tpu.matmul %127, %128, %cst_103 {dimension_numbers = #tpu.dot_dimension_numbers<[1], [0], [0], [1], [0, 0, 1, 1], [], []>} : vector<24x576xbf16>, vector<576x128xbf16>, vector<24x128xf32> -> vector<24x128xf32>
    %c0_104 = arith.constant 0 : index
    %c0_105 = arith.constant 0 : index
    %130 = vector.load %arg7[%c0_104, %c0_105] : memref<1x128xf32, #tpu.memory_space<vmem>>, vector<1x128xf32>
    %131 = vector.broadcast %130 : vector<1x128xf32> to vector<24x128xf32>
    %132 = arith.addf %129, %131 : vector<24x128xf32>
    %cst_106 = arith.constant 0.000000e+00 : f32
    %133 = vector.broadcast %cst_106 : f32 to vector<24x128xf32>
    %134 = arith.maximumf %132, %133 : vector<24x128xf32>
    %c0_107 = arith.constant 0 : index
    %c0_108 = arith.constant 0 : index
    %135 = vector.load %arg21[%c0_107, %c0_108] : memref<24x128xf32, #tpu.memory_space<vmem>>, vector<24x128xf32>
    tpu.vector_store %arg21[%c0_107, %c0_108], %134 {strides = array<i32>} : memref<24x128xf32, #tpu.memory_space<vmem>>, vector<24x128xf32>,
    %c0_109 = arith.constant 0 : index
    %c0_110 = arith.constant 0 : index
    %136 = tpu.strided_load %arg21[%c0_109, %c0_110] {strides = array<i32: 2, 1>} : memref<24x128xf32, #tpu.memory_space<vmem>>, vector<12x128xf32>
    %c1_111 = arith.constant 1 : index
    %c0_112 = arith.constant 0 : index
    %137 = tpu.strided_load %arg21[%c1_111, %c0_112] {strides = array<i32: 2, 1>} : memref<24x128xf32, #tpu.memory_space<vmem>>, vector<12x128xf32>
    %138 = arith.maximumf %136, %137 : vector<12x128xf32>
    %139 = vector.extract_strided_slice %138 {offsets = [0, 0], sizes = [2, 128], strides = [1, 1]} : vector<12x128xf32> to vector<2x128xf32>
    %140 = vector.extract_strided_slice %138 {offsets = [3, 0], sizes = [2, 128], strides = [1, 1]} : vector<12x128xf32> to vector<2x128xf32>
    %141 = arith.maximumf %139, %140 : vector<2x128xf32>
    %142 = arith.truncf %141 : vector<2x128xf32> to vector<2x128xbf16>
    %c5 = arith.constant 5 : index
    %c0_113 = arith.constant 0 : index
    %143 = vector.load %arg22[%c5, %c0_113] : memref<20x128xbf16, #tpu.memory_space<vmem>>, vector<2x128xbf16>
    tpu.vector_store %arg22[%c5, %c0_113], %142 {strides = array<i32>} : memref<20x128xbf16, #tpu.memory_space<vmem>>, vector<2x128xbf16>,
    %144 = vector.extract_strided_slice %138 {offsets = [6, 0], sizes = [2, 128], strides = [1, 1]} : vector<12x128xf32> to vector<2x128xf32>
    %145 = vector.extract_strided_slice %138 {offsets = [9, 0], sizes = [2, 128], strides = [1, 1]} : vector<12x128xf32> to vector<2x128xf32>
    %146 = arith.maximumf %144, %145 : vector<2x128xf32>
    %147 = arith.truncf %146 : vector<2x128xf32> to vector<2x128xbf16>
    %c9 = arith.constant 9 : index
    %c0_114 = arith.constant 0 : index
    %148 = vector.load %arg22[%c9, %c0_114] : memref<20x128xbf16, #tpu.memory_space<vmem>>, vector<2x128xbf16>
    tpu.vector_store %arg22[%c9, %c0_114], %147 {strides = array<i32>} : memref<20x128xbf16, #tpu.memory_space<vmem>>, vector<2x128xbf16>,
    %c0_115 = arith.constant 0 : index
    %c0_116 = arith.constant 0 : index
    %149 = vector.load %arg22[%c0_115, %c0_116] : memref<20x128xbf16, #tpu.memory_space<vmem>>, vector<8x128xbf16>
    %c0_117 = arith.constant 0 : index
    %c0_118 = arith.constant 0 : index
    %150 = vector.load %arg23[%c0_117, %c0_118] : memref<8x1152xbf16, #tpu.memory_space<vmem>>, vector<8x128xbf16>
    tpu.vector_store %arg23[%c0_117, %c0_118], %149 {strides = array<i32>} : memref<8x1152xbf16, #tpu.memory_space<vmem>>, vector<8x128xbf16>,
    %c1_119 = arith.constant 1 : index
    %c0_120 = arith.constant 0 : index
    %151 = vector.load %arg22[%c1_119, %c0_120] : memref<20x128xbf16, #tpu.memory_space<vmem>>, vector<8x128xbf16>
    %c0_121 = arith.constant 0 : index
    %c128_122 = arith.constant 128 : index
    %152 = vector.load %arg23[%c0_121, %c128_122] : memref<8x1152xbf16, #tpu.memory_space<vmem>>, vector<8x128xbf16>
    tpu.vector_store %arg23[%c0_121, %c128_122], %151 {strides = array<i32>} : memref<8x1152xbf16, #tpu.memory_space<vmem>>, vector<8x128xbf16>,
    %c2_123 = arith.constant 2 : index
    %c0_124 = arith.constant 0 : index
    %153 = vector.load %arg22[%c2_123, %c0_124] : memref<20x128xbf16, #tpu.memory_space<vmem>>, vector<8x128xbf16>
    %c0_125 = arith.constant 0 : index
    %c256_126 = arith.constant 256 : index
    %154 = vector.load %arg23[%c0_125, %c256_126] : memref<8x1152xbf16, #tpu.memory_space<vmem>>, vector<8x128xbf16>
    tpu.vector_store %arg23[%c0_125, %c256_126], %153 {strides = array<i32>} : memref<8x1152xbf16, #tpu.memory_space<vmem>>, vector<8x128xbf16>,
    %c4 = arith.constant 4 : index
    %c0_127 = arith.constant 0 : index
    %155 = vector.load %arg22[%c4, %c0_127] : memref<20x128xbf16, #tpu.memory_space<vmem>>, vector<8x128xbf16>
    %c0_128 = arith.constant 0 : index
    %c384_129 = arith.constant 384 : index
    %156 = vector.load %arg23[%c0_128, %c384_129] : memref<8x1152xbf16, #tpu.memory_space<vmem>>, vector<8x128xbf16>
    tpu.vector_store %arg23[%c0_128, %c384_129], %155 {strides = array<i32>} : memref<8x1152xbf16, #tpu.memory_space<vmem>>, vector<8x128xbf16>,
    %c5_130 = arith.constant 5 : index
    %c0_131 = arith.constant 0 : index
    %157 = vector.load %arg22[%c5_130, %c0_131] : memref<20x128xbf16, #tpu.memory_space<vmem>>, vector<8x128xbf16>
    %c0_132 = arith.constant 0 : index
    %c512_133 = arith.constant 512 : index
    %158 = vector.load %arg23[%c0_132, %c512_133] : memref<8x1152xbf16, #tpu.memory_space<vmem>>, vector<8x128xbf16>
    tpu.vector_store %arg23[%c0_132, %c512_133], %157 {strides = array<i32>} : memref<8x1152xbf16, #tpu.memory_space<vmem>>, vector<8x128xbf16>,
    %c6_134 = arith.constant 6 : index
    %c0_135 = arith.constant 0 : index
    %159 = vector.load %arg22[%c6_134, %c0_135] : memref<20x128xbf16, #tpu.memory_space<vmem>>, vector<8x128xbf16>
    %c0_136 = arith.constant 0 : index
    %c640 = arith.constant 640 : index
    %160 = vector.load %arg23[%c0_136, %c640] : memref<8x1152xbf16, #tpu.memory_space<vmem>>, vector<8x128xbf16>
    tpu.vector_store %arg23[%c0_136, %c640], %159 {strides = array<i32>} : memref<8x1152xbf16, #tpu.memory_space<vmem>>, vector<8x128xbf16>,
    %c8_137 = arith.constant 8 : index
    %c0_138 = arith.constant 0 : index
    %161 = vector.load %arg22[%c8_137, %c0_138] : memref<20x128xbf16, #tpu.memory_space<vmem>>, vector<8x128xbf16>
    %c0_139 = arith.constant 0 : index
    %c768 = arith.constant 768 : index
    %162 = vector.load %arg23[%c0_139, %c768] : memref<8x1152xbf16, #tpu.memory_space<vmem>>, vector<8x128xbf16>
    tpu.vector_store %arg23[%c0_139, %c768], %161 {strides = array<i32>} : memref<8x1152xbf16, #tpu.memory_space<vmem>>, vector<8x128xbf16>,
    %c9_140 = arith.constant 9 : index
    %c0_141 = arith.constant 0 : index
    %163 = vector.load %arg22[%c9_140, %c0_141] : memref<20x128xbf16, #tpu.memory_space<vmem>>, vector<8x128xbf16>
    %c0_142 = arith.constant 0 : index
    %c896 = arith.constant 896 : index
    %164 = vector.load %arg23[%c0_142, %c896] : memref<8x1152xbf16, #tpu.memory_space<vmem>>, vector<8x128xbf16>
    tpu.vector_store %arg23[%c0_142, %c896], %163 {strides = array<i32>} : memref<8x1152xbf16, #tpu.memory_space<vmem>>, vector<8x128xbf16>,
    %c10_143 = arith.constant 10 : index
    %c0_144 = arith.constant 0 : index
    %165 = vector.load %arg22[%c10_143, %c0_144] : memref<20x128xbf16, #tpu.memory_space<vmem>>, vector<8x128xbf16>
    %c0_145 = arith.constant 0 : index
    %c1024 = arith.constant 1024 : index
    %166 = vector.load %arg23[%c0_145, %c1024] : memref<8x1152xbf16, #tpu.memory_space<vmem>>, vector<8x128xbf16>
    tpu.vector_store %arg23[%c0_145, %c1024], %165 {strides = array<i32>} : memref<8x1152xbf16, #tpu.memory_space<vmem>>, vector<8x128xbf16>,
    %c0_146 = arith.constant 0 : index
    %c0_147 = arith.constant 0 : index
    %167 = vector.load %arg23[%c0_146, %c0_147] : memref<8x1152xbf16, #tpu.memory_space<vmem>>, vector<8x1152xbf16>
    %c0_148 = arith.constant 0 : index
    %c0_149 = arith.constant 0 : index
    %168 = vector.load %arg8[%c0_148, %c0_149] : memref<1152x256xbf16, #tpu.memory_space<vmem>>, vector<1152x256xbf16>
    %cst_150 = arith.constant dense<0.000000e+00> : vector<8x256xf32>
    %169 = tpu.matmul %167, %168, %cst_150 {dimension_numbers = #tpu.dot_dimension_numbers<[1], [0], [0], [1], [0, 0, 1, 1], [], []>} : vector<8x1152xbf16>, vector<1152x256xbf16>, vector<8x256xf32> -> vector<8x256xf32>
    %c0_151 = arith.constant 0 : index
    %c0_152 = arith.constant 0 : index
    %170 = vector.load %arg9[%c0_151, %c0_152] : memref<1x256xf32, #tpu.memory_space<vmem>>, vector<1x256xf32>
    %171 = vector.broadcast %170 : vector<1x256xf32> to vector<8x256xf32>
    %172 = arith.addf %169, %171 : vector<8x256xf32>
    %cst_153 = arith.constant 0.000000e+00 : f32
    %173 = vector.broadcast %cst_153 : f32 to vector<8x256xf32>
    %174 = arith.maximumf %172, %173 : vector<8x256xf32>
    %cst_154 = arith.constant 0.000000e+00 : f32
    %175 = vector.broadcast %cst_154 : f32 to vector<1x256xf32>
    %176 = vector.extract_strided_slice %174 {offsets = [0, 0], sizes = [2, 256], strides = [1, 1]} : vector<8x256xf32> to vector<2x256xf32>
    %cst_155 = arith.constant dense<0.000000e+00> : vector<256xf32>
    %177 = vector.multi_reduction <add>, %176, %cst_155 [0] : vector<2x256xf32> to vector<256xf32>
    %178 = vector.shape_cast %177 : vector<256xf32> to vector<1x256xf32>
    %179 = arith.addf %175, %178 : vector<1x256xf32>
    %180 = vector.extract_strided_slice %174 {offsets = [4, 0], sizes = [2, 256], strides = [1, 1]} : vector<8x256xf32> to vector<2x256xf32>
    %cst_156 = arith.constant dense<0.000000e+00> : vector<256xf32>
    %181 = vector.multi_reduction <add>, %180, %cst_156 [0] : vector<2x256xf32> to vector<256xf32>
    %182 = vector.shape_cast %181 : vector<256xf32> to vector<1x256xf32>
    %183 = arith.addf %179, %182 : vector<1x256xf32>
    %cst_157 = arith.constant 2.500000e-01 : f32
    %184 = vector.broadcast %cst_157 : f32 to vector<1x256xf32>
    %185 = arith.mulf %183, %184 : vector<1x256xf32>
    %186 = arith.truncf %185 : vector<1x256xf32> to vector<1x256xbf16>
    %c0_158 = arith.constant 0 : index
    %c0_159 = arith.constant 0 : index
    %187 = vector.load %arg10[%c0_158, %c0_159] : memref<256x256xbf16, #tpu.memory_space<vmem>>, vector<256x256xbf16>
    %cst_160 = arith.constant dense<0.000000e+00> : vector<1x256xf32>
    %188 = tpu.matmul %186, %187, %cst_160 {dimension_numbers = #tpu.dot_dimension_numbers<[1], [0], [0], [1], [0, 0, 1, 1], [], []>} : vector<1x256xbf16>, vector<256x256xbf16>, vector<1x256xf32> -> vector<1x256xf32>
    %c0_161 = arith.constant 0 : index
    %c0_162 = arith.constant 0 : index
    %189 = vector.load %arg11[%c0_161, %c0_162] : memref<1x256xf32, #tpu.memory_space<vmem>>, vector<1x256xf32>
    %190 = arith.addf %188, %189 : vector<1x256xf32>
    %cst_163 = arith.constant 0.000000e+00 : f32
    %191 = vector.broadcast %cst_163 : f32 to vector<1x256xf32>
    %192 = arith.maximumf %190, %191 : vector<1x256xf32>
    %193 = arith.truncf %192 : vector<1x256xf32> to vector<1x256xbf16>
    %c0_164 = arith.constant 0 : index
    %c0_165 = arith.constant 0 : index
    %194 = vector.load %arg12[%c0_164, %c0_165] : memref<256x128xbf16, #tpu.memory_space<vmem>>, vector<256x128xbf16>
    %cst_166 = arith.constant dense<0.000000e+00> : vector<1x128xf32>
    %195 = tpu.matmul %193, %194, %cst_166 {dimension_numbers = #tpu.dot_dimension_numbers<[1], [0], [0], [1], [0, 0, 1, 1], [], []>} : vector<1x256xbf16>, vector<256x128xbf16>, vector<1x128xf32> -> vector<1x128xf32>
    %c0_167 = arith.constant 0 : index
    %c0_168 = arith.constant 0 : index
    %196 = vector.load %arg13[%c0_167, %c0_168] : memref<1x128xf32, #tpu.memory_space<vmem>>, vector<1x128xf32>
    %197 = arith.addf %195, %196 : vector<1x128xf32>
    %c0_169 = arith.constant 0 : index
    %c0_170 = arith.constant 0 : index
    %c0_171 = arith.constant 0 : index
    %198 = vector.load %arg14[%c0_169, %c0_170, %c0_171] : memref<1x1x128xf32, #tpu.memory_space<vmem>>, vector<1x1x128xf32>
    %199 = vector.shape_cast %198 : vector<1x1x128xf32> to vector<1x128xf32>
    %200 = vector.shape_cast %197 : vector<1x128xf32> to vector<1x1x128xf32>
    tpu.vector_store %arg14[%c0_169, %c0_170, %c0_171], %200 {strides = array<i32>} : memref<1x1x128xf32, #tpu.memory_space<vmem>>, vector<1x1x128xf32>,
    return
  }
  func.func @transform_0(%arg0: i32) -> (i32, i32, i32) {
    %c0_i32 = arith.constant 0 : i32
    %c0_i32_0 = arith.constant 0 : i32
    %c0_i32_1 = arith.constant 0 : i32
    return %arg0, %c0_i32, %c0_i32_0 : i32, i32, i32
  }
  func.func @transform_1(%arg0: i32) -> (i32, i32) {
    %c0_i32 = arith.constant 0 : i32
    %c0_i32_0 = arith.constant 0 : i32
    %c0_i32_1 = arith.constant 0 : i32
    return %c0_i32, %c0_i32_0 : i32, i32
  }
  func.func @transform_2(%arg0: i32) -> (i32, i32) {
    %c0_i32 = arith.constant 0 : i32
    %c0_i32_0 = arith.constant 0 : i32
    %c0_i32_1 = arith.constant 0 : i32
    return %c0_i32, %c0_i32_0 : i32, i32
  }
  func.func @transform_3(%arg0: i32) -> (i32, i32) {
    %c0_i32 = arith.constant 0 : i32
    %c0_i32_0 = arith.constant 0 : i32
    %c0_i32_1 = arith.constant 0 : i32
    return %c0_i32, %c0_i32_0 : i32, i32
  }
  func.func @transform_4(%arg0: i32) -> (i32, i32) {
    %c0_i32 = arith.constant 0 : i32
    %c0_i32_0 = arith.constant 0 : i32
    %c0_i32_1 = arith.constant 0 : i32
    return %c0_i32, %c0_i32_0 : i32, i32
  }
  func.func @transform_5(%arg0: i32) -> (i32, i32) {
    %c0_i32 = arith.constant 0 : i32
    %c0_i32_0 = arith.constant 0 : i32
    %c0_i32_1 = arith.constant 0 : i32
    return %c0_i32, %c0_i32_0 : i32, i32
  }
  func.func @transform_6(%arg0: i32) -> (i32, i32) {
    %c0_i32 = arith.constant 0 : i32
    %c0_i32_0 = arith.constant 0 : i32
    %c0_i32_1 = arith.constant 0 : i32
    return %c0_i32, %c0_i32_0 : i32, i32
  }
  func.func @transform_7(%arg0: i32) -> (i32, i32) {
    %c0_i32 = arith.constant 0 : i32
    %c0_i32_0 = arith.constant 0 : i32
    %c0_i32_1 = arith.constant 0 : i32
    return %c0_i32, %c0_i32_0 : i32, i32
  }
  func.func @transform_8(%arg0: i32) -> (i32, i32) {
    %c0_i32 = arith.constant 0 : i32
    %c0_i32_0 = arith.constant 0 : i32
    %c0_i32_1 = arith.constant 0 : i32
    return %c0_i32, %c0_i32_0 : i32, i32
  }
  func.func @transform_9(%arg0: i32) -> (i32, i32) {
    %c0_i32 = arith.constant 0 : i32
    %c0_i32_0 = arith.constant 0 : i32
    %c0_i32_1 = arith.constant 0 : i32
    return %c0_i32, %c0_i32_0 : i32, i32
  }
  func.func @transform_10(%arg0: i32) -> (i32, i32) {
    %c0_i32 = arith.constant 0 : i32
    %c0_i32_0 = arith.constant 0 : i32
    %c0_i32_1 = arith.constant 0 : i32
    return %c0_i32, %c0_i32_0 : i32, i32
  }
  func.func @transform_11(%arg0: i32) -> (i32, i32) {
    %c0_i32 = arith.constant 0 : i32
    %c0_i32_0 = arith.constant 0 : i32
    %c0_i32_1 = arith.constant 0 : i32
    return %c0_i32, %c0_i32_0 : i32, i32
  }
  func.func @transform_12(%arg0: i32) -> (i32, i32) {
    %c0_i32 = arith.constant 0 : i32
    %c0_i32_0 = arith.constant 0 : i32
    %c0_i32_1 = arith.constant 0 : i32
    return %c0_i32, %c0_i32_0 : i32, i32
  }
  func.func @transform_13(%arg0: i32) -> (i32, i32, i32) {
    %c0_i32 = arith.constant 0 : i32
    %c0_i32_0 = arith.constant 0 : i32
    %c0_i32_1 = arith.constant 0 : i32
    return %arg0, %c0_i32, %c0_i32_0 : i32, i32, i32
  }
}

</mosaic_0001>

<bundles_post_ra>
// kernel: simple_joint_model_forward.1
= control target key start
LH: loop header
LB: loop body
LE: loop exit
PB: predicated region body
PF: predicated region fallthrough
CT: control target
= control target key end

     0   :  { %18 = vsyncpa [#allocation12], 0  ;;  %s6670_s25 = smov 0   ;;  %s9140_s0 = inlined_call_operand.vmem [shape: bf16[2,256,27], index: 0, kind: input, shape index: {}]   ;;  %s9141_s1 = inlined_call_operand.vmem [shape: bf16[27,32], index: 1, kind: input, shape index: {}]   ;;  %s9142_s2 = inlined_call_operand.vmem [shape: f32[1,32], index: 2, kind: input, shape index: {}]   ;;  %s9143_s3 = inlined_call_operand.vmem [shape: bf16[288,64], index: 3, kind: input, shape index: {}]   ;;  %s9144_s4 = inlined_call_operand.vmem [shape: f32[1,64], index: 4, kind: input, shape index: {}]   ;;  %s9145_s5 = inlined_call_operand.vmem [shape: bf16[576,128], index: 5, kind: input, shape index: {}]   ;;  %s9146_s6 = inlined_call_operand.vmem [shape: f32[1,128], index: 6, kind: input, shape index: {}]   ;;  %s9147_s7 = inlined_call_operand.vmem [shape: bf16[1152,256], index: 7, kind: input, shape index: {}]   ;;  %s9148_s8 = inlined_call_operand.vmem [shape: f32[1,256], index: 8, kind: input, shape index: {}]   ;;  %s9149_s9 = inlined_call_operand.vmem [shape: bf16[256,256], index: 9, kind: input, shape index: {}]   ;;  %s9150_s10 = inlined_call_operand.vmem [shape: f32[1,256], index: 10, kind: input, shape index: {}]   ;;  %s9151_s11 = inlined_call_operand.hbm [shape: bf16[256,128], index: 11, kind: input, shape index: {}]   ;;  %s9152_s12 = inlined_call_operand.vmem [shape: f32[1,128], index: 12, kind: input, shape index: {}]   ;;  %s9153_s13 = inlined_call_operand.vmem [shape: f32[2,1,128], index: 13, kind: output, shape index: {}]  }
   0x1 LB: > { %s374_s28 = sshll.u32 %s9151_s11, 4  ;;  %s5051_s29 = sadd.s32 4294967295, %s6590_s25   ;;  %s6590_s25 = sphi %s6670_s25, %s24_s25   ;;  %s375_s28 = int_to_ptr.hbm [resolvable:$true] %s374_s28 }
   0x2   : > { %p5053_p0 = scmp.ge.s32.totalorder %s6590_s25, 1  ;;  %p333_p1 = scmp.lt.s32.totalorder %s6590_s25, 3 }
   0x3   : > { %p6528_p2 = scmp.eq.s32.totalorder %s5051_s29, 0  ;;  %s6592_s30 = smov [#allocation11]  }
   0x4   : > { %p334_p3 = pnand %p5053_p0, %p333_p1  ;;  %s376_s14 = sshll.u32 %s6592_s30, 4  ;;  %s377_s14 = int_to_ptr.vmem [resolvable:$true] %s376_s14 }
   0x5   : > { %s6593_s15 = smov 64   ;;  %s6594_s16 = smov 4  }
   0x6   : > { %p6524_p4 = pneg %p334_p3  ;;  %403 = sbr.rel (%p334_p3) target bundleno = 1675 (0x68b), region = 72 }
   0x8   : > { %p6525_p5 = pnand %p6528_p2, %p6524_p4 }
   0xa   : > { %6527 = dma.hbm_to_vmem [thread:$0]  (!%p6525_p5), %s375_s28, 2048, %s377_s14, [#allocation12], %s6593_s15, %s6593_s15, %s6594_s16  }
   0xb   : > { %6585 = dma.done.wait (%p6528_p2), [#allocation12], 2048  }
   0xc   : > { %6587 = vsyncadd (%p6528_p2), [#allocation12], 4294965248  ;;  %p446_p6 = scmp.lt.s32.totalorder %s5051_s29, 1  ;;  %vm662_vm0 = vcmask 1044480   ;;  %vm663_vm1 = vcmask 1045504   ;;  %v6595_v0 = vmov 65535  }
   0xd   : > { %v664_v1 = vsel %vm662_vm0, 4294967295, %v6595_v0  ;;  %v5130_v2 = vld [vmem:[%s9141_s1 + $0x8] sm:$0xf]  ;;  %v6253_v3 = vld [vmem:[%s9141_s1 + $0x8] sm:$0x30]  ;;  %v6252_v7 = vld [vmem:[%s9141_s1] sm:$0xff] }
   0xe   : > { %s9213_s29 = smov (!%p446_p6, %s5051_s29), 1  ;;  %v665_v4 = vsel %vm663_vm1, %v664_v1, 0  ;;  %v5131_v5 = vor.u32 %v6253_v3, %v5130_v2  ;;  %vm613_vm2 = vcmask 220160   ;;  %v6717_v16 = vld [vmem:[%s9142_s2] ss:$0 sm:$0xff]  ;;  %vm790_vm3 = vcmask 261120  }
   0xf   : > { %s6235_s21 = sshll.u32 %s9213_s29, 7  ;;  %vm455_vm4 = vcmask 257024   ;;  %v6596_v23 = vmov 0   ;;  %vm916_vm5 = vsmask.f32 7942  ;;  %vm915_vm6 = vcmask 257025   ;;  %s453_s26 = scalar_lea.vmem %s9153_s13, %s9213_s29 }
  0x10   : > { %v667_v6 = vand.u32 %v5131_v5, %v665_v4  ;;  %s6696_s27 = scalar_lea.vmem %s9140_s0, %s6235_s21  ;;  %456 = vst.msk [vmem:[#allocation3] sm:$0xf] %vm455_vm4, %v6596_v23  ;;  %vm921_vm7 = vcmask 254976   ;;  %vm9157_vm8 = vsmask.f32 1280  ;;  %vm6766_vm9 = vmand %vm915_vm6, %vm916_vm5  ;;  %vm469_vm11 = vcmask 256000  }
  0x11   : > { %v6236_v8 = vld [vmem:[%s6696_s27] sm:$0xff]  ;;  %v6237_v9 = vld [vmem:[%s6696_s27 + $0x8] sm:$0xff]  ;;  %v6238_v10 = vld [vmem:[%s6696_s27 + $0x10] sm:$0xff]  ;;  %457 = vst.msk [vmem:[#allocation3 + $0x4] sm:$0xf] %vm455_vm4, %v6596_v23  ;;  %vm9156_vm12 = vcmask 1042432  }
  0x12   : > { %675 = vmatpush.bf16.msra.mxu0 %v667_v6  ;;  %v6239_v11 = vld [vmem:[%s6696_s27 + $0x18] sm:$0xff]  ;;  %v6240_v12 = vld [vmem:[%s6696_s27 + $0x20] sm:$0xff]  ;;  %v6241_v13 = vld [vmem:[%s6696_s27 + $0x28] sm:$0xff]  ;;  %458 = vst.msk [vmem:[#allocation3 + $0x8] sm:$0xf] %vm455_vm4, %v6596_v23  ;;  %vm1276_vm13 = vcmask 1046532  }
  0x13   : > { %v6242_v14 = vld [vmem:[%s6696_s27 + $0x30] sm:$0xff]  ;;  %v6243_v15 = vld [vmem:[%s6696_s27 + $0x38] sm:$0xff]  ;;  %v6244_v17 = vld [vmem:[%s6696_s27 + $0x40] sm:$0xff]  ;;  %459 = vst.msk [vmem:[#allocation3 + $0xc] sm:$0xf] %vm455_vm4, %v6596_v23  ;;  %s6597_s14 = smov 64  }
  0x14   : > { %460 = vst.msk [vmem:[#allocation3 + $0x10] sm:$0xf] %vm455_vm4, %v6596_v23  ;;  %v6245_v25 = vld [vmem:[%s6696_s27 + $0x48] sm:$0xff]  ;;  %v6246_v32 = vld [vmem:[%s6696_s27 + $0x50] sm:$0xff]  ;;  %v6247_v56 = vld [vmem:[%s6696_s27 + $0x58] sm:$0xff]  ;;  %s6598_s15 = smov 32  }
  0x15   : > { %461 = vst.msk [vmem:[#allocation3 + $0x14] sm:$0xf] %vm455_vm4, %v6596_v23  ;;  %vm6772_vm10 = vmand %vm921_vm7, %vm9157_vm8  ;;  %vm972_vm14 = vsmask.f32 3328  ;;  %vm1106_vm15 = vsmask.f32 7440 }
  0x16   : > { %676 = vmatpush.bf16.msra.mxu0 %v6252_v7  ;;  %462 = vst.msk [vmem:[#allocation3 + $0x18] sm:$0xf] %vm455_vm4, %v6596_v23  ;;  %vm6787_vm0 = vmor %vm9156_vm12, %vm1276_vm13  ;;  %vm940_vm5 = vcmask 257026   ;;  %vm9154_vm6 = vsmask.f32 7946  ;;  %s6599_s16 = smov 96  }
  0x17   : > { %463 = vst.msk [vmem:[#allocation3 + $0x1c] sm:$0xf] %vm455_vm4, %v6596_v23  ;;  %v1095_v49 = vld [vmem:[#allocation3] sm:$0xf]  ;;  %vm6796_vm1 = vmor %vm972_vm14, %vm1106_vm15  ;;  %vm947_vm7 = vsmask.f32 2304 }
  0x18   : > { %464 = vst.msk [vmem:[#allocation3 + $0x20] sm:$0xf] %vm455_vm4, %v6596_v23  ;;  %v918_v53 = vld [vmem:[#allocation3 + $0x4] sm:$0xe]  ;;  %v1109_v54 = vshrl.u32 %v1095_v49, 16  ;;  %v1112_v55 = vshll.u32 %v1095_v49, 16  ;;  %vm6820_vm13 = vmand %vm940_vm5, %vm9154_vm6 }
  0x19   : > { %5132 = vmatmul.msk.bf16.vlgmr.msra.gmra.mxu0 %vm613_vm2, %v6236_v8  ;;  %465 = vst.msk [vmem:[#allocation3 + $0x24] sm:$0xf] %vm455_vm4, %v6596_v23  ;;  %v924_v60 = vld [vmem:[#allocation3 + $0x8] sm:$0x3]  ;;  %v1253_v4 = vld [vmem:[#allocation3] sm:$0xe]  ;;  %vm6827_vm15 = vmand %vm469_vm11, %vm947_vm7 }
  0x1a   : > { %466 = vst.msk [vmem:[#allocation3 + $0x28] sm:$0xf] %vm455_vm4, %v6596_v23  ;;  %v1111_v0 = vrot.slane %v1109_v54, 4  ;;  %v1114_v1 = vrot.slane %v1112_v55, 5  ;;  %v5148_v7 = vrot.slane %v1253_v4, 9  ;;  %vm9155_vm11 = vcmask 1041408   ;;  %vm6916_vm8 = vmand %vm455_vm4, %vm972_vm14 }
  0x1b   : > { %467 = vst.msk [vmem:[#allocation3 + $0x2c] sm:$0xf] %vm455_vm4, %v6596_v23  ;;  %vm1608_vm5 = vcmask 1045508   ;;  %vm1957_vm14 = vcmask 1040384   ;;  %v6274_v52 = vld [vmem:[%s9143_s3 + $0x28] sm:$0xff] }
  0x1c   : > { %468 = vst.msk [vmem:[#allocation3 + $0x30] sm:$0xf] %vm455_vm4, %v6596_v23  ;;  %v1115_v5 = vor.u32 %v1114_v1, %v1111_v0  ;;  %vm6840_vm6 = vmor %vm9155_vm11, %vm1608_vm5  ;;  %vm1455_vm5 = vsmask.f32 6416 }
  0x1d   : > { %479 = vst [vmem:[#allocation9] sm:$0xf] %v6596_v23  ;;  %vm6881_vm11 = vmor %vm947_vm7, %vm1455_vm5  ;;  %vm965_vm7 = vcmask 257027   ;;  %vm9158_vm5 = vsmask.f32 7950 }
  0x1e   : > { %480 = vst [vmem:[#allocation9 + $0x4] sm:$0xf] %v6596_v23  ;;  %vm6906_vm12 = vmand %vm965_vm7, %vm9158_vm5  ;;  %vm1958_vm7 = vcmask 1044484   ;;  %vm1785_vm5 = vsmask.f32 5392 }
  0x1f   : > { %481 = vst [vmem:[#allocation9 + $0x8] sm:$0x3] %v6596_v23 }
  0x29   : > { %5133 = vmatmul.msk.bf16.gmra.mxu0 %vm613_vm2, %v6237_v9 }
  0x39   : > { %5134 = vmatmul.msk.bf16.gmra.mxu0 %vm613_vm2, %v6238_v10 }
  0x49   : > { %5135 = vmatmul.msk.bf16.gmra.mxu0 %vm613_vm2, %v6239_v11 }
  0x59   : > { %5136 = vmatmul.msk.bf16.gmra.mxu0 %vm613_vm2, %v6240_v12 }
  0x69   : > { %5137 = vmatmul.msk.bf16.gmra.mxu0 %vm613_vm2, %v6241_v13  ;;  %v1116_v13 = vrot.slane %v1115_v5, 4 }
  0x79   : > { %5138 = vmatmul.msk.bf16.gmra.mxu0 %vm613_vm2, %v6242_v14 }
  0x89   : > { %5139 = vmatmul.msk.bf16.gmra.mxu0 %vm613_vm2, %v6243_v15 }
  0x96   : > { %v678_v18 = vpop.f32.mrf.mxu0 }
  0x97   : > { %v679_v19 = vadd.f32 %v6717_v16, %v678_v18 }
  0x99   : > { %v758_v20 = vmax.f32 %v679_v19, 0.0  ;;  %5140 = vmatmul.msk.bf16.gmra.mxu0 %vm613_vm2, %v6244_v17  ;;  %v6463_v17 = vld [vmem:[%s9147_s7 + $0x434] sm:$0xf0] }
  0x9b   : > { %791 = vst.msk [vmem:[#allocation2] sm:$0xff] %vm790_vm3, %v758_v20 }
  0x9e   : > { %v680_v21 = vpop.f32.mrf.mxu0 }
  0x9f   : > { %v681_v22 = vadd.f32 %v6717_v16, %v680_v21 }
  0xa1   : > { %v759_v24 = vmax.f32 %v681_v22, 0.0  ;;  %v6248_v22 = vld [vmem:[%s6696_s27 + $0x60] sm:$0xff] }
  0xa3   : > { %792 = vst.msk [vmem:[#allocation2 + $0x8] sm:$0xff] %vm790_vm3, %v759_v24 }
  0xa6   : > { %v683_v26 = vpop.f32.mrf.mxu0 }
  0xa7   : > { %v684_v27 = vadd.f32 %v6717_v16, %v683_v26 }
  0xa9   : > { %v760_v28 = vmax.f32 %v684_v27, 0.0  ;;  %5141 = vmatmul.msk.bf16.gmra.mxu0 %vm613_vm2, %v6245_v25 }
  0xaa   : > { %v823_v35 = vld [vmem:[#allocation2] ss:$2 sm:$0xff]  ;;  %v855_v36 = vld [vmem:[#allocation2 + $0x1] ss:$2 sm:$0xff] }
  0xab   : > { %793 = vst.msk [vmem:[#allocation2 + $0x10] sm:$0xff] %vm790_vm3, %v760_v28  ;;  %v886_v40 = vmax.f32 %v823_v35, %v855_v36 }
  0xae   : > { %v685_v29 = vpop.f32.mrf.mxu0 }
  0xaf   : > { %v686_v30 = vadd.f32 %v6717_v16, %v685_v29 }
  0xb1   : > { %v761_v31 = vmax.f32 %v686_v30, 0.0 }
  0xb3   : > { %794 = vst.msk [vmem:[#allocation2 + $0x18] sm:$0xff] %vm790_vm3, %v761_v31 }
  0xb6   : > { %v688_v33 = vpop.f32.mrf.mxu0 }
  0xb7   : > { %v689_v34 = vadd.f32 %v6717_v16, %v688_v33 }
  0xb9   : > { %v762_v37 = vmax.f32 %v689_v34, 0.0  ;;  %5142 = vmatmul.msk.bf16.gmra.mxu0 %vm613_vm2, %v6246_v32 }
  0xba   : > { %v825_v38 = vld [vmem:[#allocation2 + $0x10] ss:$2 sm:$0xff]  ;;  %v857_v39 = vld [vmem:[#allocation2 + $0x11] ss:$2 sm:$0xff] }
  0xbb   : > { %v887_v41 = vmax.f32 %v825_v38, %v857_v39  ;;  %795 = vst.msk [vmem:[#allocation2 + $0x20] sm:$0xff] %vm790_vm3, %v762_v37 }
  0xbd   : > { %v902_v42 = vmax.f32 %v886_v40, %v887_v41 }
  0xbe   : > { %v690_v43 = vpop.f32.mrf.mxu0 }
  0xbf   : > { %v903_v44 = vpack.c.bf16 %v902_v42, %v902_v42  ;;  %v691_v45 = vadd.f32 %v6717_v16, %v690_v43  ;;  %v943_v43 = vld [vmem:[#allocation3 + $0x8] sm:$0xc]  ;;  %v6281_v42 = vld [vmem:[%s9143_s3 + $0x60] sm:$0xff] }
  0xc1   : > { %v905_v46 = vshrl.u32 %v903_v44, 16  ;;  %v908_v47 = vshll.u32 %v903_v44, 16  ;;  %v763_v48 = vmax.f32 %v691_v45, 0.0  ;;  %v6249_v44 = vld [vmem:[%s6696_s27 + $0x68] sm:$0xff] }
  0xc3   : > { %v907_v50 = vrot.slane %v905_v46, 6  ;;  %v910_v51 = vrot.slane %v908_v47, 7  ;;  %796 = vst.msk [vmem:[#allocation2 + $0x28] sm:$0xff] %vm790_vm3, %v763_v48  ;;  %v9172_v47 = vmov 0  ;;  %v949_v48 = vld [vmem:[#allocation3 + $0xc] sm:$0x7] }
  0xc4   : > { %v9173_v47 = vsel %vm6827_vm15, 4294967295, %v9172_v47 }
  0xc5   : > { %v911_v57 = vor.u32 %v910_v51, %v907_v50 }
  0xc6   : > { %v693_v58 = vpop.f32.mrf.mxu0 }
  0xc7   : > { %v694_v61 = vadd.f32 %v6717_v16, %v693_v58  ;;  %v919_v62 = vsel %vm6766_vm9, %v911_v57, %v918_v53  ;;  %v912_v63 = vrot.slane %v911_v57, 4 }
  0xc8   : > { %920 = vst [vmem:[#allocation3 + $0x4] sm:$0xe] %v919_v62 }
  0xc9   : > { %v764_v2 = vmax.f32 %v694_v61, 0.0  ;;  %5143 = vmatmul.msk.bf16.gmra.mxu0 %vm613_vm2, %v6247_v56  ;;  %v925_v3 = vsel %vm6772_vm10, %v912_v63, %v924_v60 }
  0xca   : > { %926 = vst [vmem:[#allocation3 + $0x8] sm:$0x3] %v925_v3  ;;  %v827_v26 = vld [vmem:[#allocation2 + $0x20] ss:$2 sm:$0xff]  ;;  %v859_v27 = vld [vmem:[#allocation2 + $0x21] ss:$2 sm:$0xff] }
  0xcb   : > { %797 = vst.msk [vmem:[#allocation2 + $0x30] sm:$0xff] %vm790_vm3, %v764_v2  ;;  %v888_v31 = vmax.f32 %v827_v26, %v859_v27  ;;  %v6250_v26 = vld [vmem:[%s6696_s27 + $0x70] sm:$0xff] }
  0xce   : > { %v695_v6 = vpop.f32.mrf.mxu0 }
  0xcf   : > { %v696_v8 = vadd.f32 %v6717_v16, %v695_v6  ;;  %v6784_v9 = vld [vmem:[#allocation3 + $0x4] sm:$0xf] }
  0xd0   : > { %v6791_v11 = vld [vmem:[#allocation3 + $0x4] sm:$0xf]  ;;  %v1280_v12 = vrot.slane %v6784_v9, 5 }
  0xd1   : > { %v1118_v14 = vshll.u32 %v6791_v11, 16  ;;  %v765_v15 = vmax.f32 %v696_v8, 0.0  ;;  %v1076_v20 = vld [vmem:[#allocation3 + $0x4] sm:$0xf]  ;;  %v1122_v55 = vshrl.u32 %v6791_v11, 16 }
  0xd2   : > { %v1281_v18 = vsel %vm6787_vm0, %v5148_v7, %v1280_v12  ;;  %1086 = vst.msk [vmem:[#allocation4 + $0xc] sm:$0xf] %vm455_vm4, %v1076_v20  ;;  %v1444_v56 = vld [vmem:[#allocation3 + $0x4] sm:$0xe] }
  0xd3   : > { %v6804_v19 = vrot.slane %v1118_v14, 5  ;;  %798 = vst.msk [vmem:[#allocation2 + $0x38] sm:$0xff] %vm790_vm3, %v765_v15  ;;  %1309 = vrot.lane.b32.xlu2 %v1281_v18, %s6597_s14  ;;  %v1350_v57 = vld [vmem:[#allocation3 + $0x4] sm:$0xe]  ;;  %v1458_v60 = vshrl.u32 %v1444_v56, 16  ;;  %v1461_v61 = vshll.u32 %v1444_v56, 16 }
  0xd4   : > { %v1585_v58 = vld [vmem:[#allocation3 + $0x4] sm:$0xc]  ;;  %v1124_v62 = vrot.slane %v1122_v55, 4  ;;  %v5149_v5 = vrot.slane %v1350_v57, 9 }
  0xd5   : > { %v1121_v21 = vsel %vm6796_vm1, %v1116_v13, %v6804_v19  ;;  %v5150_v7 = vrot.slane %v1585_v58, 10  ;;  %v1460_v13 = vrot.slane %v1458_v60, 5  ;;  %v1463_v14 = vrot.slane %v1461_v61, 6 }
  0xd6   : > { %1212 = vrot.lane.b32.xlu0 %v1121_v21, %s6598_s15  ;;  %v698_v24 = vpop.f32.mrf.mxu0  ;;  %v9178_v61 = vmov 0 }
  0xd7   : > { %v699_v25 = vadd.f32 %v6717_v16, %v698_v24  ;;  %v1464_v27 = vor.u32 %v1463_v14, %v1460_v13  ;;  %v9179_v61 = vsel %vm6906_vm12, 4294967295, %v9178_v61 }
  0xd9   : > { %v766_v28 = vmax.f32 %v699_v25, 0.0  ;;  %5144 = vmatmul.msk.bf16.gmra.mxu0 %vm613_vm2, %v6248_v22  ;;  %v1125_v22 = vor.u32 %v1124_v62, %v6804_v19  ;;  %v1282_v19 = vrot.slane %v1280_v12, 4  ;;  %v968_v62 = vld [vmem:[#allocation3 + $0xc] sm:$0x8] }
  0xda   : > { %v829_v29 = vld [vmem:[#allocation2 + $0x30] ss:$2 sm:$0xff]  ;;  %v861_v30 = vld [vmem:[#allocation2 + $0x31] ss:$2 sm:$0xff] }
  0xdb   : > { %v889_v32 = vmax.f32 %v829_v29, %v861_v30  ;;  %799 = vst.msk [vmem:[#allocation2 + $0x40] sm:$0xff] %vm790_vm3, %v766_v28 }
  0xdd   : > { %v927_v33 = vmax.f32 %v888_v31, %v889_v32 }
  0xde   : > { %v700_v34 = vpop.f32.mrf.mxu0 }
  0xdf   : > { %v928_v35 = vpack.c.bf16 %v927_v33, %v927_v33  ;;  %v701_v36 = vadd.f32 %v6717_v16, %v700_v34  ;;  %v1126_v34 = vrot.slane %v1125_v22, 4 }
  0xe1   : > { %v930_v37 = vshrl.u32 %v928_v35, 16  ;;  %v933_v38 = vshll.u32 %v928_v35, 16  ;;  %v767_v39 = vmax.f32 %v701_v36, 0.0 }
  0xe3   : > { %v932_v40 = vrot.slane %v930_v37, 5  ;;  %v935_v41 = vrot.slane %v933_v38, 6  ;;  %800 = vst.msk [vmem:[#allocation2 + $0x48] sm:$0xff] %vm790_vm3, %v767_v39  ;;  %v6286_v38 = vld [vmem:[%s9143_s3 + $0x88] sm:$0xff] }
  0xe4   : > { %2343 = vmatpush.bf16.msra.mxu3 %v6286_v38 }
  0xe5   : > { %v936_v45 = vor.u32 %v935_v41, %v932_v40 }
  0xe6   : > { %v703_v46 = vpop.f32.mrf.mxu0 }
  0xe7   : > { %v704_v49 = vadd.f32 %v6717_v16, %v703_v46  ;;  %v944_v50 = vsel %vm6820_vm13, %v936_v45, %v943_v43  ;;  %v937_v51 = vrot.slane %v936_v45, 4  ;;  %v1465_v45 = vrot.slane %v1464_v27, 4 }
  0xe8   : > { %945 = vst [vmem:[#allocation3 + $0x8] sm:$0xc] %v944_v50 }
  0xe9   : > { %v768_v53 = vmax.f32 %v704_v49, 0.0  ;;  %5145 = vmatmul.msk.bf16.gmra.mxu0 %vm613_vm2, %v6249_v44  ;;  %v950_v54 = vsel %vm6827_vm15, %v937_v51, %v949_v48 }
  0xea   : > { %951 = vst [vmem:[#allocation3 + $0xc] sm:$0x7] %v950_v54  ;;  %v831_v36 = vld [vmem:[#allocation2 + $0x40] ss:$2 sm:$0xff]  ;;  %v863_v37 = vld [vmem:[#allocation2 + $0x41] ss:$2 sm:$0xff] }
  0xeb   : > { %801 = vst.msk [vmem:[#allocation2 + $0x50] sm:$0xff] %vm790_vm3, %v768_v53  ;;  %v890_v48 = vmax.f32 %v831_v36, %v863_v37  ;;  %v6285_v53 = vld [vmem:[%s9143_s3 + $0x80] sm:$0xff] }
  0xec   : > { %2344 = vmatpush.bf16.msra.mxu3 %v6285_v53 }
  0xee   : > { %v705_v63 = vpop.f32.mrf.mxu0 }
  0xef   : > { %v706_v1 = vadd.f32 %v6717_v16, %v705_v63  ;;  %v6845_v2 = vld [vmem:[#allocation3 + $0x8] sm:$0xf] }
  0xf0   : > { %v6847_v3 = vld [vmem:[#allocation3 + $0x8] sm:$0xf]  ;;  %v1374_v6 = vrot.slane %v6845_v2, 5 }
  0xf1   : > { %v6849_v4 = vld [vmem:[#allocation3 + $0x8] sm:$0xf]  ;;  %v1612_v8 = vrot.slane %v6847_v3, 6  ;;  %v769_v11 = vmax.f32 %v706_v1, 0.0 }
  0xf2   : > { %v1375_v15 = vsel %vm6787_vm0, %v5149_v5, %v1374_v6  ;;  %v1128_v20 = vshll.u32 %v6849_v4, 16  ;;  %v1445_v21 = vld [vmem:[#allocation3 + $0x8] sm:$0xf]  ;;  %v1132_v22 = vshrl.u32 %v6849_v4, 16 }
  0xf3   : > { %v1613_v18 = vsel %vm6840_vm6, %v5150_v7, %v1612_v8  ;;  %802 = vst.msk [vmem:[#allocation2 + $0x58] sm:$0xff] %vm790_vm3, %v769_v11  ;;  %1403 = vrot.lane.b32.xlu1 %v1375_v15, %s6599_s16  ;;  %v6866_v24 = vld [vmem:[#allocation3 + $0x8] sm:$0xf]  ;;  %v1467_v28 = vshrl.u32 %v1445_v21, 16  ;;  %v1470_v32 = vshll.u32 %v1445_v21, 16  ;;  %v6251_v7 = vld [vmem:[%s6696_s27 + $0x78] sm:$0xff] }
  0xf4   : > { %1641 = vrot.lane.b32.xlu0 %v1613_v18, %s6598_s15  ;;  %v1077_v25 = vld [vmem:[#allocation3 + $0x8] sm:$0xf]  ;;  %v6870_v30 = vrot.slane %v1128_v20, 5  ;;  %v1283_v31 = vrot.slane %v6866_v24, 5  ;;  %v9180_v15 = vmov 0  ;;  %v1134_v4 = vrot.slane %v1132_v22, 4 }
  0xf5   : > { %1087 = vst.msk [vmem:[#allocation4 + $0x18] sm:$0xf] %vm455_vm4, %v1077_v25  ;;  %v1469_v35 = vrot.slane %v1467_v28, 5  ;;  %v1472_v39 = vrot.slane %v1470_v32, 6  ;;  %v1774_v13 = vld [vmem:[#allocation3 + $0x8] sm:$0xc] }
  0xf6   : > { %v708_v29 = vpop.f32.mrf.mxu0  ;;  %v1131_v9 = vsel %vm6796_vm1, %v1126_v34, %v6870_v30  ;;  %v1284_v12 = vsel %vm6787_vm0, %v1282_v19, %v1283_v31  ;;  %v9181_v15 = vsel %vm6916_vm8, 4294967295, %v9180_v15  ;;  %v974_v18 = vld [vmem:[#allocation3 + $0x10] sm:$0xf]  ;;  %v1681_v25 = vld [vmem:[#allocation3 + $0x8] sm:$0xc]  ;;  %v1614_v34 = vrot.slane %v1612_v8, 4 }
  0xf7   : > { %v709_v33 = vadd.f32 %v6717_v16, %v708_v29  ;;  %v6892_v46 = vor.u32 %v1472_v39, %v1469_v35  ;;  %v1791_v29 = vshll.u32 %v1774_v13, 16  ;;  %v5151_v32 = vrot.slane %v1681_v25, 10  ;;  %v1935_v8 = vld [vmem:[#allocation3 + $0x8] sm:$0x8] }
  0xf9   : > { %v770_v40 = vmax.f32 %v709_v33, 0.0  ;;  %5146 = vmatmul.msk.bf16.gmra.mxu0 %vm613_vm2, %v6250_v26  ;;  %v1474_v50 = vsel %vm6881_vm11, %v1465_v45, %v6892_v46  ;;  %v1788_v26 = vshrl.u32 %v1774_v13, 16  ;;  %v1376_v33 = vrot.slane %v1374_v6, 4 }
  0xfa   : > { %v833_v43 = vld [vmem:[#allocation2 + $0x50] ss:$2 sm:$0xff]  ;;  %v865_v44 = vld [vmem:[#allocation2 + $0x51] ss:$2 sm:$0xff]  ;;  %1575 = vst.msk [vmem:[#allocation4 + $0x4] sm:$0xf] %vm455_vm4, %v1474_v50 }
  0xfb   : > { %v891_v49 = vmax.f32 %v833_v43, %v865_v44  ;;  %803 = vst.msk [vmem:[#allocation2 + $0x60] sm:$0xff] %vm790_vm3, %v770_v40  ;;  %1214 = vrot.lane.b32.xlu1 %v1131_v9, %s6598_s15  ;;  %v1790_v19 = vrot.slane %v1788_v26, 6  ;;  %v1793_v2 = vrot.slane %v1791_v29, 7 }
  0xfc   : > { %1311 = vrot.lane.b32.xlu0 %v1284_v12, %s6597_s14 }
  0xfd   : > { %v952_v51 = vmax.f32 %v890_v48, %v891_v49 }
  0xfe   : > { %v710_v54 = vpop.f32.mrf.mxu0 }
  0xff   : > { %v953_v55 = vpack.c.bf16 %v952_v51, %v952_v51  ;;  %v711_v56 = vadd.f32 %v6717_v16, %v710_v54  ;;  %v1135_v51 = vor.u32 %v1134_v4, %v6870_v30  ;;  %v6435_v54 = vld [vmem:[%s9147_s7 + $0x354] sm:$0xf0] }
 0x101   : > { %v955_v57 = vshll.u32 %v953_v55, 16  ;;  %v958_v58 = vshrl.u32 %v953_v55, 16  ;;  %v771_v60 = vmax.f32 %v711_v56, 0.0  ;;  %v1136_v13 = vrot.slane %v1135_v51, 4 }
 0x103   : > { %v957_v63 = vrot.slane %v955_v57, 5  ;;  %v960_v1 = vrot.slane %v958_v58, 4  ;;  %804 = vst.msk [vmem:[#allocation2 + $0x68] sm:$0xff] %vm790_vm3, %v771_v60  ;;  %v5152_v57 = vrot.slane %v1935_v8, 11  ;;  %v1794_v60 = vor.u32 %v1793_v2, %v1790_v19 }
 0x105   : > { %v961_v5 = vor.u32 %v960_v1, %v957_v63  ;;  %v969_v11 = vsel %vm6906_vm12, %v957_v63, %v968_v62  ;;  %vm9189_vm12 = vcmask 253952  }
 0x106   : > { %v713_v14 = vpop.f32.mrf.mxu0  ;;  %970 = vst [vmem:[#allocation3 + $0xc] sm:$0x8] %v969_v11  ;;  %v1285_v11 = vrot.slane %v1283_v31, 4 }
 0x107   : > { %v714_v20 = vadd.f32 %v6717_v16, %v713_v14  ;;  %v962_v21 = vrot.slane %v961_v5, 4 }
 0x109   : > { %v772_v27 = vmax.f32 %v714_v20, 0.0  ;;  %5147 = vmatmul.msk.bf16.gmra.mxu0 %vm613_vm2, %v6251_v7  ;;  %v975_v28 = vsel %vm6916_vm8, %v962_v21, %v974_v18  ;;  %vm6956_vm2 = vmor %vm1957_vm14, %vm1958_vm7  ;;  %vm9184_vm7 = vsmask.f32 1280 }
 0x10a   : > { %976 = vst [vmem:[#allocation3 + $0x10] sm:$0xf] %v975_v28  ;;  %v835_v28 = vld [vmem:[#allocation2 + $0x60] ss:$2 sm:$0xff]  ;;  %v867_v29 = vld [vmem:[#allocation2 + $0x61] ss:$2 sm:$0xff]  ;;  %vm7011_vm14 = vmor %vm9184_vm7, %vm1785_vm5 }
 0x10b   : > { %805 = vst.msk [vmem:[#allocation2 + $0x70] sm:$0xff] %vm790_vm3, %v772_v27  ;;  %v1795_v27 = vrot.slane %v1794_v60, 4  ;;  %vm989_vm5 = vsmask.f32 7938  ;;  %vm995_vm7 = vsmask.f32 256 }
 0x10c   : > { %vm7041_vm8 = vmand %vm455_vm4, %vm989_vm5  ;;  %vm1339_vm5 = vcmask 781824  }
 0x10d   : > { %v1682_v35 = vld [vmem:[#allocation3 + $0xc] sm:$0xf]  ;;  %vm7048_vm15 = vmand %vm9189_vm12, %vm995_vm7  ;;  %vm1242_vm12 = vcmask 519424  }
 0x10e   : > { %v6930_v36 = vld [vmem:[#allocation3 + $0xc] sm:$0xf]  ;;  %v715_v38 = vpop.f32.mrf.mxu0  ;;  %v1705_v39 = vrot.slane %v1682_v35, 6 }
 0x10f   : > { %v6932_v37 = vld [vmem:[#allocation3 + $0xc] sm:$0xf]  ;;  %v1377_v40 = vrot.slane %v6930_v36, 5  ;;  %v716_v6 = vadd.f32 %v6717_v16, %v715_v38 }
 0x110   : > { %v1615_v43 = vrot.slane %v6932_v37, 6  ;;  %v1098_v3 = vld [vmem:[#allocation3 + $0xc] sm:$0xf]  ;;  %v1706_v9 = vsel %vm6840_vm6, %v5151_v32, %v1705_v39  ;;  %v1707_v21 = vrot.slane %v1705_v39, 4 }
 0x111   : > { %v1936_v44 = vld [vmem:[#allocation3 + $0xc] sm:$0xf]  ;;  %v1378_v12 = vsel %vm6787_vm0, %v1376_v33, %v1377_v40  ;;  %v773_v49 = vmax.f32 %v716_v6, 0.0  ;;  %1734 = vrot.lane.b32.xlu1 %v1706_v9, %s6597_s14  ;;  %v6951_v50 = vld [vmem:[#allocation3 + $0x10] sm:$0xf]  ;;  %v1138_v53 = vshll.u32 %v1098_v3, 16 }
 0x112   : > { %v1616_v45 = vsel %vm6840_vm6, %v1614_v34, %v1615_v43  ;;  %v6947_v48 = vld [vmem:[#allocation3 + $0xc] sm:$0xf]  ;;  %1405 = vrot.lane.b32.xlu2 %v1378_v12, %s6599_s16  ;;  %v6961_v56 = vld [vmem:[#allocation3 + $0x10] sm:$0xf]  ;;  %v1962_v58 = vrot.slane %v1936_v44, 7  ;;  %v1708_v63 = vrot.slane %v6951_v50, 6  ;;  %v892_v44 = vmax.f32 %v835_v28, %v867_v29 }
 0x113   : > { %v1775_v55 = vld [vmem:[#allocation3 + $0xc] sm:$0xf]  ;;  %1643 = vrot.lane.b32.xlu0 %v1616_v45, %s6598_s15  ;;  %806 = vst.msk [vmem:[#allocation2 + $0x78] sm:$0xff] %vm790_vm3, %v773_v49  ;;  %v1286_v30 = vrot.slane %v6947_v48, 5  ;;  %v1965_v62 = vrot.slane %v6961_v56, 7  ;;  %v6971_v14 = vrot.slane %v1138_v53, 5 }
 0x114   : > { %v1963_v1 = vsel %vm6956_vm2, %v5152_v57, %v1962_v58  ;;  %v1964_v5 = vrot.slane %v1962_v58, 4  ;;  %v1797_v7 = vshrl.u32 %v1775_v55, 16  ;;  %v1800_v18 = vshll.u32 %v1775_v55, 16  ;;  %v6978_v26 = vld [vmem:[#allocation3 + $0x10] sm:$0xf] }
 0x115   : > { %2001 = vst.msk [vmem:[#allocation4 + $0x8] sm:$0xf] %vm455_vm4, %v1963_v1  ;;  %v1142_v22 = vshrl.u32 %v1098_v3, 16  ;;  %v6982_v31 = vld [vmem:[#allocation3 + $0x10] sm:$0xf]  ;;  %v1709_v32 = vsel %vm6840_vm6, %v1707_v21, %v1708_v63  ;;  %v1287_v33 = vsel %vm6787_vm0, %v1285_v11, %v1286_v30  ;;  %v1141_v38 = vsel %vm6796_vm1, %v1136_v13, %v6971_v14 }
 0x116   : > { %v718_v20 = vpop.f32.mrf.mxu0  ;;  %v1966_v25 = vsel %vm6956_vm2, %v1964_v5, %v1965_v62  ;;  %v1799_v34 = vrot.slane %v1797_v7, 6  ;;  %v1802_v4 = vrot.slane %v1800_v18, 7  ;;  %v1776_v19 = vld [vmem:[#allocation3 + $0x10] sm:$0xf]  ;;  %v1380_v39 = vrot.slane %v6978_v26, 5 }
 0x117   : > { %v719_v24 = vadd.f32 %v6717_v16, %v718_v20  ;;  %2002 = vst.msk [vmem:[#allocation4 + $0x14] sm:$0xf] %vm455_vm4, %v1966_v25  ;;  %v1618_v3 = vrot.slane %v6982_v31, 6  ;;  %v1144_v8 = vrot.slane %v1142_v22, 4  ;;  %v7001_v12 = vld [vmem:[#allocation3 + $0x10] sm:$0xf] }
 0x118   : > { %v1807_v45 = vshrl.u32 %v1776_v19, 16  ;;  %v1078_v49 = vld [vmem:[#allocation3 + $0xc] sm:$0xf]  ;;  %v1379_v51 = vrot.slane %v1377_v40, 4  ;;  %v7005_v53 = vor.u32 %v1802_v4, %v1799_v34  ;;  %v1617_v55 = vrot.slane %v1615_v43, 4 }
 0x119   : > { %v774_v35 = vmax.f32 %v719_v24, 0.0  ;;  %1736 = vrot.lane.b32.xlu1 %v1709_v32, %s6597_s14  ;;  %v1810_v57 = vshll.u32 %v1776_v19, 16  ;;  %v1446_v1 = vld [vmem:[#allocation3 + $0xc] sm:$0xf]  ;;  %1088 = vst.msk [vmem:[#allocation4 + $0x24] sm:$0xf] %vm455_vm4, %v1078_v49  ;;  %v1145_v11 = vor.u32 %v1144_v8, %v6971_v14 }
 0x11a   : > { %1313 = vrot.lane.b32.xlu2 %v1287_v33, %s6597_s14  ;;  %v837_v2 = vld [vmem:[#allocation2 + $0x70] ss:$2 sm:$0xff]  ;;  %v869_v6 = vld [vmem:[#allocation2 + $0x71] ss:$2 sm:$0xff]  ;;  %v1381_v37 = vsel %vm6787_vm0, %v1379_v51, %v1380_v39  ;;  %v1619_v43 = vsel %vm6840_vm6, %v1617_v55, %v1618_v3  ;;  %v1148_v13 = vshll.u32 %v7001_v12, 16  ;;  %v1809_v22 = vrot.slane %v1807_v45, 6 }
 0x11b   : > { %1216 = vrot.lane.b32.xlu0 %v1141_v38, %s6598_s15  ;;  %v893_v9 = vmax.f32 %v837_v2, %v869_v6  ;;  %807 = vst.msk [vmem:[#allocation2 + $0x80] sm:$0xff] %vm790_vm3, %v774_v35  ;;  %v1079_v5 = vld [vmem:[#allocation3 + $0x10] sm:$0xf]  ;;  %v1804_v28 = vsel %vm7011_vm14, %v1795_v27, %v7005_v53  ;;  %v1812_v24 = vrot.slane %v1810_v57, 7  ;;  %v1477_v32 = vshrl.u32 %v1446_v1, 16 }
 0x11c   : > { %v5163_v36 = vld [vmem:[#allocation4 + $0x8] sm:$0xf]  ;;  %v1447_v25 = vld [vmem:[#allocation3 + $0x10] sm:$0xf]  ;;  %1089 = vst.msk [vmem:[#allocation4 + $0x30] sm:$0xf] %vm455_vm4, %v1079_v5 }
 0x11d   : > { %v977_v60 = vmax.f32 %v892_v44, %v893_v9  ;;  %v7031_v29 = vld [vmem:[#allocation3 + $0x10] sm:$0xf]  ;;  %v1480_v34 = vshll.u32 %v1446_v1, 16  ;;  %v991_v4 = vld [vmem:[#allocation3 + $0x14] sm:$0xf]  ;;  %v1475_v27 = vrot.slane %v6892_v46, 4  ;;  %v7052_v5 = vor.u32 %v1812_v24, %v1809_v22 }
 0x11e   : > { %v720_v7 = vpop.f32.mrf.mxu0  ;;  %v6256_v40 = vld [vmem:[#allocation4 + $0x10] sm:$0xf0]  ;;  %v1479_v19 = vrot.slane %v1477_v32, 5  ;;  %v1487_v35 = vshrl.u32 %v1447_v25, 16  ;;  %v1490_v38 = vshll.u32 %v1447_v25, 16  ;;  %v1150_v8 = vrot.slane %v1148_v13, 5 }
 0x11f   : > { %v978_v18 = vpack.c.bf16 %v977_v60, %v977_v60  ;;  %v721_v20 = vadd.f32 %v6717_v16, %v720_v7  ;;  %v5164_v21 = vor.u32 %v6256_v40, %v5163_v36  ;;  %v1482_v9 = vrot.slane %v1480_v34, 6  ;;  %v997_v51 = vld [vmem:[#allocation3 + $0x18] sm:$0x1]  ;;  %v1075_v24 = vld [vmem:[#allocation3] sm:$0xf] }
 0x120   : > { %v1146_v45 = vrot.slane %v1145_v11, 4  ;;  %v1289_v49 = vrot.slane %v7031_v29, 5  ;;  %v1489_v55 = vrot.slane %v1487_v35, 5  ;;  %v1492_v57 = vrot.slane %v1490_v38, 6  ;;  %1085 = vst.msk [vmem:[#allocation4] sm:$0xf] %vm455_vm4, %v1075_v24 }
 0x121   : > { %v980_v14 = vshrl.u32 %v978_v18, 16  ;;  %v775_v33 = vmax.f32 %v721_v20, 0.0  ;;  %5285 = vmatmul.msk.bf16.vlgmr.msra.gmra.mxu3 %vm790_vm3, %v5164_v21  ;;  %1407 = vrot.lane.b32.xlu1 %v1381_v37, %s6599_s16  ;;  %v983_v6 = vshll.u32 %v978_v18, 16  ;;  %v1483_v7 = vor.u32 %v1482_v9, %v1479_v19  ;;  %v1013_v29 = vld [vmem:[#allocation3 + $0x18] sm:$0xe] }
 0x122   : > { %1895 = vrot.lane.b32.xlu2 %v1804_v28, %s6599_s16  ;;  %v1152_v40 = vshrl.u32 %v7001_v12, 16  ;;  %v1805_v37 = vrot.slane %v7005_v53, 4  ;;  %v7058_v11 = vor.u32 %v1492_v57, %v1489_v55  ;;  %v1151_v12 = vsel %vm6796_vm1, %v1146_v45, %v1150_v8  ;;  %v6465_v58 = vld [vmem:[%s9147_s7 + $0x444] sm:$0xf0] }
 0x123   : > { %1645 = vrot.lane.b32.xlu0 %v1619_v43, %s6598_s15  ;;  %v982_v2 = vrot.slane %v980_v14, 7  ;;  %808 = vst.msk [vmem:[#allocation2 + $0x88] sm:$0xff] %vm790_vm3, %v775_v33  ;;  %v1288_v43 = vrot.slane %v1286_v30, 4  ;;  %v1484_v21 = vsel %vm6881_vm11, %v1475_v27, %v1483_v7  ;;  %v1485_v53 = vrot.slane %v1483_v7, 4 }
 0x124   : > { %v1814_v30 = vsel %vm7011_vm14, %v1805_v37, %v7052_v5  ;;  %v1154_v25 = vrot.slane %v1152_v40, 4  ;;  %1576 = vst.msk [vmem:[#allocation4 + $0x10] sm:$0xf] %vm455_vm4, %v1484_v21  ;;  %v1620_v14 = vrot.slane %v1618_v3, 4  ;;  %v1710_v38 = vrot.slane %v1708_v63, 4 }
 0x125   : > { %v985_v60 = vor.u32 %v983_v6, %v982_v2  ;;  %v986_v1 = vrot.slane %v982_v2, 4  ;;  %v1290_v22 = vsel %vm6787_vm0, %v1288_v43, %v1289_v49  ;;  %v1494_v28 = vsel %vm6881_vm11, %v1485_v53, %v7058_v11 }
 0x126   : > { %v723_v36 = vpop.f32.mrf.mxu0  ;;  %1577 = vst.msk [vmem:[#allocation4 + $0x1c] sm:$0xf] %vm455_vm4, %v1494_v28  ;;  %v1155_v33 = vor.u32 %v1154_v25, %v1150_v8  ;;  %v1382_v56 = vrot.slane %v1380_v39, 4 }
 0x127   : > { %v724_v13 = vadd.f32 %v6717_v16, %v723_v36  ;;  %v992_v18 = vsel %vm7041_vm8, %v985_v60, %v991_v4  ;;  %v998_v20 = vsel %vm7048_vm15, %v986_v1, %v997_v51  ;;  %v1967_v36 = vrot.slane %v1965_v62, 4 }
 0x128   : > { %993 = vst [vmem:[#allocation3 + $0x14] sm:$0xf] %v992_v18  ;;  %v1156_v50 = vrot.slane %v1155_v33, 4 }
 0x129   : > { %v776_v48 = vmax.f32 %v724_v13, 0.0  ;;  %1218 = vrot.lane.b32.xlu1 %v1151_v12, %s6598_s15  ;;  %999 = vst [vmem:[#allocation3 + $0x18] sm:$0x1] %v998_v20 }
 0x12a   : > { %1897 = vrot.lane.b32.xlu2 %v1814_v30, %s6599_s16  ;;  %v839_v12 = vld [vmem:[#allocation2 + $0x80] ss:$2 sm:$0xff]  ;;  %v871_v30 = vld [vmem:[#allocation2 + $0x81] ss:$2 sm:$0xff] }
 0x12b   : > { %1315 = vrot.lane.b32.xlu0 %v1290_v22, %s6597_s14  ;;  %809 = vst.msk [vmem:[#allocation2 + $0x90] sm:$0xff] %vm790_vm3, %v776_v48  ;;  %v1815_v48 = vrot.slane %v7052_v5, 4 }
 0x12e   : > { %v725_v32 = vpop.f32.mrf.mxu0 }
 0x12f   : > { %v726_v34 = vadd.f32 %v6717_v16, %v725_v32  ;;  %v7089_v4 = vld [vmem:[#allocation3 + $0x14] sm:$0xf] }
 0x130   : > { %v7091_v27 = vld [vmem:[#allocation3 + $0x14] sm:$0xf]  ;;  %v1621_v35 = vrot.slane %v7089_v4, 6 }
 0x131   : > { %v7093_v19 = vld [vmem:[#allocation3 + $0x14] sm:$0xf]  ;;  %v1711_v2 = vrot.slane %v7091_v27, 6  ;;  %v777_v3 = vmax.f32 %v726_v34, 0.0 }
 0x132   : > { %v1158_v6 = vshll.u32 %v7093_v19, 16  ;;  %v1777_v31 = vld [vmem:[#allocation3 + $0x14] sm:$0xf]  ;;  %v1622_v45 = vsel %vm6840_vm6, %v1620_v14, %v1621_v35  ;;  %v894_v14 = vmax.f32 %v839_v12, %v871_v30 }
 0x133   : > { %v1817_v8 = vshrl.u32 %v1777_v31, 16  ;;  %v1820_v9 = vshll.u32 %v1777_v31, 16  ;;  %v1712_v51 = vsel %vm6840_vm6, %v1710_v38, %v1711_v2  ;;  %810 = vst.msk [vmem:[#allocation2 + $0x98] sm:$0xff] %vm790_vm3, %v777_v3  ;;  %1647 = vrot.lane.b32.xlu1 %v1622_v45, %s6598_s15  ;;  %v7113_v60 = vld [vmem:[#allocation3 + $0x14] sm:$0xf]  ;;  %v1495_v38 = vrot.slane %v7058_v11, 4 }
 0x134   : > { %v7108_v63 = vrot.slane %v1158_v6, 5  ;;  %1738 = vrot.lane.b32.xlu2 %v1712_v51, %s6597_s14  ;;  %v7118_v7 = vld [vmem:[#allocation3 + $0x14] sm:$0xf]  ;;  %v1383_v20 = vrot.slane %v7113_v60, 5 }
 0x135   : > { %v1819_v55 = vrot.slane %v1817_v8, 6  ;;  %v1822_v57 = vrot.slane %v1820_v9, 7  ;;  %v1968_v40 = vrot.slane %v7118_v7, 7  ;;  %v1448_v37 = vld [vmem:[#allocation3 + $0x14] sm:$0xf] }
 0x136   : > { %v1161_v1 = vsel %vm6796_vm1, %v1156_v50, %v7108_v63  ;;  %v1080_v43 = vld [vmem:[#allocation3 + $0x14] sm:$0xf]  ;;  %v728_v13 = vpop.f32.mrf.mxu0  ;;  %v1497_v21 = vshrl.u32 %v1448_v37, 16  ;;  %v1500_v25 = vshll.u32 %v1448_v37, 16  ;;  %v1384_v26 = vsel %vm6787_vm0, %v1382_v56, %v1383_v20 }
 0x137   : > { %1220 = vrot.lane.b32.xlu0 %v1161_v1, %s6598_s15  ;;  %v7124_v18 = vor.u32 %v1822_v57, %v1819_v55  ;;  %1090 = vst.msk [vmem:[#allocation4 + $0x3c] sm:$0xf] %vm455_vm4, %v1080_v43  ;;  %v729_v53 = vadd.f32 %v6717_v16, %v728_v13  ;;  %v1969_v62 = vsel %vm6956_vm2, %v1967_v36, %v1968_v40  ;;  %v7147_v34 = vld [vmem:[#allocation3 + $0x14] sm:$0xf]  ;;  %v1291_v50 = vrot.slane %v1289_v49, 4  ;;  %v6276_v43 = vld [vmem:[%s9143_s3 + $0x38] sm:$0xff] }
 0x138   : > { %2003 = vst.msk [vmem:[#allocation4 + $0x20] sm:$0xf] %vm455_vm4, %v1969_v62  ;;  %v1499_v22 = vrot.slane %v1497_v21, 5  ;;  %v1502_v39 = vrot.slane %v1500_v25, 6  ;;  %v1292_v8 = vrot.slane %v7147_v34, 5  ;;  %2269 = vmatpush.bf16.msra.mxu1 %v6276_v43  ;;  %v1310_v62 = vpop.permute.xlu2 %1309 }
 0x139   : > { %v778_v28 = vmax.f32 %v729_v53, 0.0  ;;  %v1824_v5 = vsel %vm7011_vm14, %v1815_v48, %v7124_v18  ;;  %v1016_v21 = vld [vmem:[#allocation3 + $0x1c] sm:$0x3]  ;;  %v1032_v34 = vld [vmem:[#allocation3 + $0x1c] sm:$0xc] }
 0x13a   : > { %v841_v24 = vld [vmem:[#allocation2 + $0x90] ss:$2 sm:$0xff]  ;;  %v873_v32 = vld [vmem:[#allocation2 + $0x91] ss:$2 sm:$0xff]  ;;  %v7150_v6 = vor.u32 %v1502_v39, %v1499_v22  ;;  %v1293_v1 = vsel %vm6787_vm0, %v1291_v50, %v1292_v8 }
 0x13b   : > { %v895_v33 = vmax.f32 %v841_v24, %v873_v32  ;;  %811 = vst.msk [vmem:[#allocation2 + $0xa0] sm:$0xff] %vm790_vm3, %v778_v28  ;;  %1899 = vrot.lane.b32.xlu1 %v1824_v5, %s6599_s16  ;;  %v6275_v22 = vld [vmem:[%s9143_s3 + $0x30] sm:$0xff]  ;;  %v7187_v24 = vld [vmem:[%s9142_s2] ss:$0 sm:$0xff]  ;;  %v1385_v32 = vrot.slane %v1383_v20, 4 }
 0x13c   : > { %1409 = vrot.lane.b32.xlu2 %v1384_v26, %s6599_s16  ;;  %v1504_v9 = vsel %vm6881_vm11, %v1495_v38, %v7150_v6  ;;  %2270 = vmatpush.bf16.msra.mxu1 %v6275_v22  ;;  %v6273_v26 = vld [vmem:[%s9143_s3 + $0x20] sm:$0xff]  ;;  %v1623_v22 = vrot.slane %v1621_v35, 4 }
 0x13d   : > { %v1000_v31 = vmax.f32 %v894_v14, %v895_v33  ;;  %1578 = vst.msk [vmem:[#allocation4 + $0x28] sm:$0xf] %vm455_vm4, %v1504_v9 }
 0x13e   : > { %v730_v3 = vpop.f32.mrf.mxu0 }
 0x13f   : > { %v1001_v45 = vpack.c.bf16 %v1000_v31, %v1000_v31  ;;  %v731_v51 = vadd.f32 %v6717_v16, %v730_v3 }
 0x140   : > { %2271 = vmatpush.bf16.msra.mxu1 %v6274_v52 }
 0x141   : > { %v1003_v55 = vshrl.u32 %v1001_v45, 16  ;;  %v1006_v11 = vshll.u32 %v1001_v45, 16  ;;  %v779_v57 = vmax.f32 %v731_v51, 0.0 }
 0x143   : > { %v1005_v36 = vrot.slane %v1003_v55, 6  ;;  %v1008_v37 = vrot.slane %v1006_v11, 7  ;;  %812 = vst.msk [vmem:[#allocation2 + $0xa8] sm:$0xff] %vm790_vm3, %v779_v57  ;;  %v6272_v55 = vld [vmem:[%s9143_s3 + $0x18] sm:$0xff] }
 0x144   : > { %1317 = vrot.lane.b32.xlu2 %v1293_v1, %s6597_s14  ;;  %2272 = vmatpush.bf16.msra.mxu1 %v6273_v26  ;;  %v1970_v1 = vrot.slane %v1968_v40, 4 }
 0x145   : > { %v1009_v49 = vor.u32 %v1008_v37, %v1005_v36  ;;  %v1825_v37 = vrot.slane %v7124_v18, 4 }
 0x146   : > { %v733_v13 = vpop.f32.mrf.mxu0 }
 0x147   : > { %v734_v12 = vadd.f32 %v6717_v16, %v733_v13  ;;  %v1014_v48 = vsel %vm6766_vm9, %v1009_v49, %v1013_v29  ;;  %v1010_v56 = vrot.slane %v1009_v49, 4  ;;  %v1162_v16 = vshrl.u32 %v7093_v19, 16 }
 0x148   : > { %v1213_v53 = vpop.permute.xlu0 %1212  ;;  %1015 = vst [vmem:[#allocation3 + $0x18] sm:$0xe] %v1014_v48  ;;  %v1713_v19 = vrot.slane %v1711_v2, 4  ;;  %2273 = vmatpush.bf16.msra.mxu1 %v6272_v55  ;;  %vm1433_vm9 = vcmask 1044224  }
 0x149   : > { %1243 = vst.msk [vmem:[#allocation4] sm:$0xf] %vm1242_vm12, %v1213_v53  ;;  %v780_v30 = vmax.f32 %v734_v12, 0.0  ;;  %v1017_v25 = vsel %vm6772_vm10, %v1010_v56, %v1016_v21  ;;  %v1164_v5 = vrot.slane %v1162_v16, 4  ;;  %vm9192_vm10 = vnez %v9173_v47 }
 0x14a   : > { %1340 = vst.msk [vmem:[#allocation4] sm:$0xf] %vm1339_vm5, %v1310_v62  ;;  %v843_v29 = vld [vmem:[#allocation2 + $0xa0] ss:$2 sm:$0xff]  ;;  %v875_v48 = vld [vmem:[#allocation2 + $0xa1] ss:$2 sm:$0xff] }
 0x14b   : > { %813 = vst.msk [vmem:[#allocation2 + $0xb0] sm:$0xff] %vm790_vm3, %v780_v30  ;;  %v1165_v43 = vor.u32 %v1164_v5, %v7108_v63  ;;  %v896_v52 = vmax.f32 %v843_v29, %v875_v48 }
 0x14c   : > { %1018 = vst [vmem:[#allocation3 + $0x1c] sm:$0x3] %v1017_v25  ;;  %v6271_v25 = vld [vmem:[%s9143_s3 + $0x10] sm:$0xff] }
 0x14d   : > { %v1166_v30 = vrot.slane %v1165_v43, 4  ;;  %2274 = vmatpush.bf16.msra.mxu1 %v6271_v25 }
 0x14e   : > { %v735_v28 = vpop.f32.mrf.mxu0 }
 0x14f   : > { %v736_v59 = vadd.f32 %v7187_v24, %v735_v28  ;;  %v7197_v39 = vld [vmem:[#allocation3 + $0x18] sm:$0xf] }
 0x150   : > { %v7199_v14 = vld [vmem:[#allocation3 + $0x18] sm:$0xf]  ;;  %v1386_v31 = vrot.slane %v7197_v39, 5 }
 0x151   : > { %v1778_v33 = vld [vmem:[#allocation3 + $0x18] sm:$0xf]  ;;  %v781_v38 = vmax.f32 %v736_v59, 0.0  ;;  %v1714_v60 = vrot.slane %v7199_v14, 6 }
 0x152   : > { %v1827_v20 = vshrl.u32 %v1778_v33, 16  ;;  %v7203_v3 = vld [vmem:[#allocation3 + $0x18] sm:$0xf]  ;;  %v1830_v27 = vshll.u32 %v1778_v33, 16  ;;  %v1387_v2 = vsel %vm6787_vm0, %v1385_v32, %v1386_v31 }
 0x153   : > { %814 = vst.msk [vmem:[#allocation2 + $0xb8] sm:$0xff] %vm790_vm3, %v781_v38  ;;  %v1715_v9 = vsel %vm6840_vm6, %v1713_v19, %v1714_v60  ;;  %v1168_v51 = vshll.u32 %v7203_v3, 16  ;;  %v7215_v50 = vld [vmem:[#allocation3 + $0x18] sm:$0xf]  ;;  %1411 = vrot.lane.b32.xlu1 %v1387_v2, %s6599_s16  ;;  %v6270_v38 = vld [vmem:[%s9143_s3 + $0x8] sm:$0xff]  ;;  %v1172_v25 = vshrl.u32 %v7203_v3, 16 }
 0x154   : > { %v1829_v45 = vrot.slane %v1827_v20, 6  ;;  %1740 = vrot.lane.b32.xlu0 %v1715_v9, %s6597_s14  ;;  %v1832_v11 = vrot.slane %v1830_v27, 7  ;;  %v7222_v57 = vld [vmem:[#allocation3 + $0x18] sm:$0xf]  ;;  %v1971_v36 = vrot.slane %v7215_v50, 7  ;;  %v1505_v20 = vrot.slane %v7150_v6, 4  ;;  %2275 = vmatpush.bf16.msra.mxu1 %v6270_v38 }
 0x155   : > { %v1449_v12 = vld [vmem:[#allocation3 + $0x18] sm:$0xf]  ;;  %v7236_v40 = vrot.slane %v1168_v51, 5  ;;  %v1624_v18 = vrot.slane %v7222_v57, 6  ;;  %v1174_v3 = vrot.slane %v1172_v25, 4  ;;  %v1716_v38 = vrot.slane %v1714_v60, 4 }
 0x156   : > { %v738_v49 = vpop.f32.mrf.mxu0  ;;  %v7229_v13 = vor.u32 %v1832_v11, %v1829_v45  ;;  %v1972_v21 = vsel %vm6956_vm2, %v1970_v1, %v1971_v36  ;;  %v1081_v53 = vld [vmem:[#allocation3 + $0x18] sm:$0xf]  ;;  %v1507_v56 = vshrl.u32 %v1449_v12, 16  ;;  %v1510_v16 = vshll.u32 %v1449_v12, 16 }
 0x157   : > { %v739_v7 = vadd.f32 %v7187_v24, %v738_v49  ;;  %2004 = vst.msk [vmem:[#allocation4 + $0x2c] sm:$0xf] %vm455_vm4, %v1972_v21  ;;  %v1171_v5 = vsel %vm6796_vm1, %v1166_v30, %v7236_v40  ;;  %v1625_v4 = vsel %vm6840_vm6, %v1623_v22, %v1624_v18  ;;  %v7258_v35 = vld [vmem:[#allocation3 + $0x18] sm:$0xf]  ;;  %v1294_v49 = vrot.slane %v1292_v8, 4  ;;  %v6269_v21 = vld [vmem:[%s9143_s3] sm:$0xff] }
 0x158   : > { %v1834_v63 = vsel %vm7011_vm14, %v1825_v37, %v7229_v13  ;;  %1091 = vst.msk [vmem:[#allocation4 + $0x48] sm:$0xf] %vm455_vm4, %v1081_v53  ;;  %v1509_v32 = vrot.slane %v1507_v56, 5  ;;  %v1512_v26 = vrot.slane %v1510_v16, 6  ;;  %v5175_v2 = vld [vmem:[#allocation4 + $0x20] sm:$0xf]  ;;  %2276 = vmatpush.bf16.msra.mxu1 %v6269_v21 }
 0x159   : > { %v782_v62 = vmax.f32 %v739_v7, 0.0  ;;  %1901 = vrot.lane.b32.xlu2 %v1834_v63, %s6599_s16  ;;  %v1295_v51 = vrot.slane %v7258_v35, 5  ;;  %v6284_v12 = vld [vmem:[%s9143_s3 + $0x78] sm:$0xff]  ;;  %v6283_v30 = vld [vmem:[%s9143_s3 + $0x70] sm:$0xff]  ;;  %v1035_v22 = vld [vmem:[#allocation3 + $0x20] sm:$0x7] }
 0x15a   : > { %v845_v28 = vld [vmem:[#allocation2 + $0xb0] ss:$2 sm:$0xff]  ;;  %v877_v59 = vld [vmem:[#allocation2 + $0xb1] ss:$2 sm:$0xff]  ;;  %v7266_v27 = vor.u32 %v1512_v26, %v1509_v32  ;;  %2303 = vmatpush.bf16.msra.mxu2 %v6284_v12  ;;  %v1388_v50 = vrot.slane %v1386_v31, 4  ;;  %v6278_v35 = vld [vmem:[%s9143_s3 + $0x48] sm:$0xff] }
 0x15b   : > { %v897_v19 = vmax.f32 %v845_v28, %v877_v59  ;;  %815 = vst.msk [vmem:[#allocation2 + $0xc0] sm:$0xff] %vm790_vm3, %v782_v62  ;;  %1222 = vrot.lane.b32.xlu1 %v1171_v5, %s6598_s15  ;;  %v1296_v7 = vsel %vm6787_vm0, %v1294_v49, %v1295_v51 }
 0x15c   : > { %1649 = vrot.lane.b32.xlu0 %v1625_v4, %s6598_s15  ;;  %v1514_v37 = vsel %vm6881_vm11, %v1505_v20, %v7266_v27  ;;  %v6280_v20 = vld [vmem:[%s9143_s3 + $0x58] sm:$0xff] }
 0x15d   : > { %v1019_v33 = vmax.f32 %v896_v52, %v897_v19  ;;  %1579 = vst.msk [vmem:[#allocation4 + $0x34] sm:$0xf] %vm455_vm4, %v1514_v37  ;;  %v6282_v19 = vld [vmem:[%s9143_s3 + $0x68] sm:$0xff] }
 0x15e   : > { %v6259_v9 = vld [vmem:[#allocation4 + $0x28] sm:$0xf0]  ;;  %v740_v45 = vpop.f32.mrf.mxu0  ;;  %2304 = vmatpush.bf16.msra.mxu2 %v6283_v30 }
 0x15f   : > { %v1020_v55 = vpack.c.bf16 %v1019_v33, %v1019_v33  ;;  %v5176_v11 = vor.u32 %v6259_v9, %v5175_v2  ;;  %v741_v1 = vadd.f32 %v7187_v24, %v740_v45  ;;  %v1626_v33 = vrot.slane %v1624_v18, 4 }
 0x161   : > { %v1022_v43 = vshrl.u32 %v1020_v55, 16  ;;  %v1025_v6 = vshll.u32 %v1020_v55, 16  ;;  %5286 = vmatmul.msk.bf16.gmra.mxu3 %vm790_vm3, %v5176_v11  ;;  %v783_v29 = vmax.f32 %v741_v1, 0.0  ;;  %v1175_v55 = vor.u32 %v1174_v3, %v7236_v40 }
 0x162   : > { %2305 = vmatpush.bf16.msra.mxu2 %v6282_v19 }
 0x163   : > { %v1024_v53 = vrot.slane %v1022_v43, 5  ;;  %v1027_v48 = vrot.slane %v1025_v6, 6  ;;  %816 = vst.msk [vmem:[#allocation2 + $0xc8] sm:$0xff] %vm790_vm3, %v783_v29  ;;  %v1176_v29 = vrot.slane %v1175_v55, 4 }
 0x164   : > { %1319 = vrot.lane.b32.xlu0 %v1296_v7, %s6597_s14 }
 0x165   : > { %v1028_v8 = vor.u32 %v1027_v48, %v1024_v53  ;;  %v1404_v63 = vpop.permute.xlu1 %1403  ;;  %v6279_v48 = vld [vmem:[%s9143_s3 + $0x50] sm:$0xff] }
 0x166   : > { %v1642_v56 = vpop.permute.xlu0 %1641  ;;  %1434 = vst.msk [vmem:[#allocation4] sm:$0xf] %vm1433_vm9, %v1404_v63  ;;  %v743_v62 = vpop.f32.mrf.mxu0  ;;  %2306 = vmatpush.bf16.msra.mxu2 %v6281_v42 }
 0x167   : > { %1671 = vst.msk [vmem:[#allocation4 + $0x4] sm:$0xf] %vm1242_vm12, %v1642_v56  ;;  %v744_v16 = vadd.f32 %v7187_v24, %v743_v62  ;;  %v1033_v52 = vsel %vm6820_vm13, %v1028_v8, %v1032_v34  ;;  %v1029_v28 = vrot.slane %v1028_v8, 4  ;;  %vm9193_vm13 = vnez %v9179_v61 }
 0x168   : > { %1034 = vst [vmem:[#allocation3 + $0x1c] sm:$0xc] %v1033_v52 }
 0x169   : > { %v784_v59 = vmax.f32 %v744_v16, 0.0  ;;  %v1036_v32 = vsel %vm9192_vm10, %v1029_v28, %v1035_v22  ;;  %v1973_v22 = vrot.slane %v1971_v36, 4  ;;  %vm9194_vm10 = vnez %v9181_v15 }
 0x16a   : > { %1037 = vst [vmem:[#allocation3 + $0x20] sm:$0x7] %v1036_v32  ;;  %2307 = vmatpush.bf16.msra.mxu2 %v6280_v20  ;;  %v847_v3 = vld [vmem:[#allocation2 + $0xc0] ss:$2 sm:$0xff] }
 0x16b   : > { %817 = vst.msk [vmem:[#allocation2 + $0xd0] sm:$0xff] %vm790_vm3, %v784_v59 }
 0x16c   : > { %v1406_v5 = vpop.permute.xlu2 %1405 }
 0x16d   : > { %v1215_v4 = vpop.permute.xlu1 %1214  ;;  %v5155_v28 = vld [vmem:[#allocation4] sm:$0xf] }
 0x16e   : > { %v1312_v26 = vpop.permute.xlu0 %1311  ;;  %1244 = vst.msk [vmem:[#allocation4 + $0xc] sm:$0xf] %vm1242_vm12, %v1215_v4  ;;  %v745_v47 = vpop.f32.mrf.mxu0  ;;  %v1835_v4 = vrot.slane %v7229_v13, 4  ;;  %2308 = vmatpush.bf16.msra.mxu2 %v6279_v48 }
 0x16f   : > { %1341 = vst.msk [vmem:[#allocation4 + $0xc] sm:$0xf] %vm1339_vm5, %v1312_v26  ;;  %v746_v2 = vadd.f32 %v7187_v24, %v745_v47  ;;  %v7317_v9 = vld [vmem:[#allocation3 + $0x1c] sm:$0xf] }
 0x170   : > { %v7319_v45 = vld [vmem:[#allocation3 + $0x1c] sm:$0xf]  ;;  %1435 = vst.msk [vmem:[#allocation4 + $0xc] sm:$0xf] %vm1433_vm9, %v1406_v5  ;;  %v1627_v57 = vrot.slane %v7317_v9, 6 }
 0x171   : > { %v1717_v14 = vrot.slane %v7319_v45, 6  ;;  %v7325_v60 = vld [vmem:[#allocation3 + $0x1c] sm:$0xf]  ;;  %v785_v18 = vmax.f32 %v746_v2, 0.0  ;;  %v879_v5 = vld [vmem:[#allocation2 + $0xc1] ss:$2 sm:$0xff] }
 0x172   : > { %v1178_v11 = vshll.u32 %v7325_v60, 16  ;;  %v1779_v1 = vld [vmem:[#allocation3 + $0x1c] sm:$0xf]  ;;  %v1628_v37 = vsel %vm6840_vm6, %v1626_v33, %v1627_v57  ;;  %v898_v31 = vmax.f32 %v847_v3, %v879_v5  ;;  %2309 = vmatpush.bf16.msra.mxu2 %v6278_v35  ;;  %v1054_v3 = vld [vmem:[#allocation3 + $0x24] sm:$0xf] }
 0x173   : > { %v1718_v40 = vsel %vm6840_vm6, %v1716_v38, %v1717_v14  ;;  %v1837_v43 = vshrl.u32 %v1779_v1, 16  ;;  %v1840_v6 = vshll.u32 %v1779_v1, 16  ;;  %818 = vst.msk [vmem:[#allocation2 + $0xd8] sm:$0xff] %vm790_vm3, %v785_v18  ;;  %1651 = vrot.lane.b32.xlu1 %v1628_v37, %s6598_s15  ;;  %v7341_v21 = vld [vmem:[#allocation3 + $0x1c] sm:$0xf] }
 0x174   : > { %1742 = vrot.lane.b32.xlu2 %v1718_v40, %s6597_s14  ;;  %v7339_v49 = vrot.slane %v1178_v11, 5  ;;  %v7346_v7 = vld [vmem:[#allocation3 + $0x1c] sm:$0xf]  ;;  %v1389_v30 = vrot.slane %v7341_v21, 5  ;;  %v7359_v16 = vpop.permute.xlu2 %1313  ;;  %v1515_v11 = vrot.slane %v7266_v27, 4 }
 0x175   : > { %v1839_v12 = vrot.slane %v1837_v43, 6  ;;  %v1842_v53 = vrot.slane %v1840_v6, 7  ;;  %v1450_v8 = vld [vmem:[#allocation3 + $0x1c] sm:$0xf]  ;;  %v1974_v25 = vrot.slane %v7346_v7, 7 }
 0x176   : > { %v1181_v34 = vsel %vm6796_vm1, %v1176_v29, %v7339_v49  ;;  %v1082_v63 = vld [vmem:[#allocation3 + $0x1c] sm:$0xf]  ;;  %v748_v56 = vpop.f32.mrf.mxu0  ;;  %v1517_v32 = vshrl.u32 %v1450_v8, 16  ;;  %v1520_v19 = vshll.u32 %v1450_v8, 16  ;;  %v1390_v39 = vsel %vm6787_vm0, %v1388_v50, %v1389_v30 }
 0x177   : > { %1224 = vrot.lane.b32.xlu0 %v1181_v34, %s6598_s15  ;;  %v7352_v62 = vor.u32 %v1842_v53, %v1839_v12  ;;  %1092 = vst.msk [vmem:[#allocation4 + $0x54] sm:$0xf] %vm455_vm4, %v1082_v63  ;;  %v749_v52 = vadd.f32 %v7187_v24, %v748_v56  ;;  %v6255_v59 = vld [vmem:[#allocation4 + $0x8] sm:$0xf0]  ;;  %v1975_v26 = vsel %vm6956_vm2, %v1973_v22, %v1974_v25  ;;  %v7380_v2 = vld [vmem:[#allocation3 + $0x1c] sm:$0xf] }
 0x178   : > { %v5156_v42 = vor.u32 %v6255_v59, %v5155_v28  ;;  %v1519_v47 = vrot.slane %v1517_v32, 5  ;;  %2005 = vst.msk [vmem:[#allocation4 + $0x38] sm:$0xf] %vm455_vm4, %v1975_v26  ;;  %v1522_v55 = vrot.slane %v1520_v19, 6  ;;  %v1298_v40 = vrot.slane %v7380_v2, 5  ;;  %v6277_v32 = vld [vmem:[%s9143_s3 + $0x40] sm:$0xff] }
 0x179   : > { %v786_v36 = vmax.f32 %v749_v52, 0.0  ;;  %v1844_v20 = vsel %vm7011_vm14, %v1835_v4, %v7352_v62  ;;  %v1297_v12 = vrot.slane %v1295_v51, 4  ;;  %v1051_v63 = vld [vmem:[#allocation3 + $0x20] sm:$0x8]  ;;  %v1182_v4 = vshrl.u32 %v7325_v60, 16  ;;  %2310 = vmatpush.bf16.msra.mxu2 %v6277_v32 }
 0x17a   : > { %v849_v33 = vld [vmem:[#allocation2 + $0xd0] ss:$2 sm:$0xff]  ;;  %v881_v38 = vld [vmem:[#allocation2 + $0xd1] ss:$2 sm:$0xff]  ;;  %2277 = vmatmul.bf16.vlgmr.msra.gmra.mxu1 %v5156_v42  ;;  %v7383_v1 = vor.u32 %v1522_v55, %v1519_v47  ;;  %v1719_v60 = vrot.slane %v1717_v14, 4  ;;  %v1300_v32 = vrot.slane %v1298_v40, 4 }
 0x17b   : > { %v899_v13 = vmax.f32 %v849_v33, %v881_v38  ;;  %819 = vst.msk [vmem:[#allocation2 + $0xe0] sm:$0xff] %vm790_vm3, %v786_v36  ;;  %1903 = vrot.lane.b32.xlu1 %v1844_v20, %s6599_s16  ;;  %v1299_v8 = vsel %vm6787_vm0, %v1297_v12, %v1298_v40  ;;  %v1391_v33 = vrot.slane %v1389_v30, 4  ;;  %v1184_v38 = vrot.slane %v1182_v4, 4 }
 0x17c   : > { %1413 = vrot.lane.b32.xlu2 %v1390_v39, %s6599_s16  ;;  %v1524_v29 = vsel %vm6881_vm11, %v1515_v11, %v7383_v1  ;;  %v1896_v27 = vpop.permute.xlu2 %1895  ;;  %v1629_v12 = vrot.slane %v1627_v57, 4 }
 0x17d   : > { %v1038_v18 = vmax.f32 %v898_v31, %v899_v13  ;;  %1580 = vst.msk [vmem:[#allocation4 + $0x40] sm:$0xf] %vm455_vm4, %v1524_v29 }
 0x17e   : > { %v750_v37 = vpop.f32.mrf.mxu0 }
 0x17f   : > { %v1039_v43 = vpack.c.bf16 %v1038_v18, %v1038_v18  ;;  %v751_v6 = vadd.f32 %v7187_v24, %v750_v37 }
 0x181   : > { %v1041_v53 = vshll.u32 %v1039_v43, 16  ;;  %v1044_v48 = vshrl.u32 %v1039_v43, 16  ;;  %v787_v34 = vmax.f32 %v751_v6, 0.0 }
 0x183   : > { %v1043_v56 = vrot.slane %v1041_v53, 5  ;;  %v1046_v22 = vrot.slane %v1044_v48, 4  ;;  %820 = vst.msk [vmem:[#allocation2 + $0xe8] sm:$0xff] %vm790_vm3, %v787_v34  ;;  %v1735_v52 = vpop.permute.xlu1 %1734  ;;  %v1185_v34 = vor.u32 %v1184_v38, %v7339_v49 }
 0x184   : > { %1321 = vrot.lane.b32.xlu2 %v1299_v8, %s6597_s14  ;;  %1764 = vst.msk [vmem:[#allocation4 + $0x4] sm:$0xf] %vm1339_vm5, %v1735_v52  ;;  %v1898_v36 = vpop.permute.xlu2 %1897  ;;  %v1976_v8 = vrot.slane %v1974_v25, 4 }
 0x185   : > { %v1644_v51 = vpop.permute.xlu0 %1643  ;;  %v1047_v28 = vor.u32 %v1046_v22, %v1043_v56  ;;  %1925 = vst.msk [vmem:[#allocation4 + $0x4] sm:$0xf] %vm1433_vm9, %v1896_v27  ;;  %v1052_v59 = vsel %vm9193_vm13, %v1043_v56, %v1051_v63  ;;  %v1845_v27 = vrot.slane %v7352_v62, 4 }
 0x186   : > { %1672 = vst.msk [vmem:[#allocation4 + $0x10] sm:$0xf] %vm1242_vm12, %v1644_v51  ;;  %v753_v19 = vpop.f32.mrf.mxu0 }
 0x187   : > { %v1048_v5 = vrot.slane %v1047_v28, 4  ;;  %v754_v42 = vadd.f32 %v7187_v24, %v753_v19  ;;  %1053 = vst [vmem:[#allocation3 + $0x20] sm:$0x8] %v1052_v59  ;;  %v1186_v59 = vrot.slane %v1185_v34, 4 }
 0x189   : > { %v788_v50 = vmax.f32 %v754_v42, 0.0  ;;  %v1055_v61 = vsel %vm9194_vm10, %v1048_v5, %v1054_v3  ;;  %v1525_v42 = vrot.slane %v7383_v1, 4  ;;  %vm477_vm10 = vcmask 516096  }
 0x18a   : > { %1056 = vst [vmem:[#allocation3 + $0x24] sm:$0xf] %v1055_v61  ;;  %v851_v28 = vld [vmem:[#allocation2 + $0xe0] ss:$2 sm:$0xff]  ;;  %v883_v19 = vld [vmem:[#allocation2 + $0xe1] ss:$2 sm:$0xff] }
 0x18b   : > { %821 = vst.msk [vmem:[#allocation2 + $0xf0] sm:$0xff] %vm790_vm3, %v788_v50  ;;  %v1737_v26 = vpop.permute.xlu1 %1736 }
 0x18c   : > { %1765 = vst.msk [vmem:[#allocation4 + $0x10] sm:$0xf] %vm1339_vm5, %v1737_v26  ;;  %v6254_v52 = vld [vmem:[#allocation4 + $0x4] sm:$0xf] }
 0x18d   : > { %v1217_v47 = vpop.permute.xlu0 %1216  ;;  %1926 = vst.msk [vmem:[#allocation4 + $0x10] sm:$0xf] %vm1433_vm9, %v1898_v36 }
 0x18e   : > { %1245 = vst.msk [vmem:[#allocation4 + $0x18] sm:$0xf] %vm1242_vm12, %v1217_v47  ;;  %v755_v15 = vpop.f32.mrf.mxu0  ;;  %v7422_v20 = vld [vmem:[#allocation3 + $0x20] sm:$0xf]  ;;  %v1739_v53 = vpop.permute.xlu2 %1738  ;;  %v900_v47 = vmax.f32 %v851_v28, %v883_v19 }
 0x18f   : > { %v7424_v39 = vld [vmem:[#allocation3 + $0x20] sm:$0xf]  ;;  %1342 = vst.msk [vmem:[#allocation4 + $0x18] sm:$0xf] %vm1339_vm5, %v7359_v16  ;;  %v756_v31 = vadd.f32 %v7187_v24, %v755_v15  ;;  %v1392_v13 = vrot.slane %v7422_v20, 5 }
 0x190   : > { %v1720_v21 = vrot.slane %v7424_v39, 6  ;;  %v1780_v30 = vld [vmem:[#allocation3 + $0x20] sm:$0xf] }
 0x191   : > { %v1847_v45 = vshrl.u32 %v1780_v30, 16  ;;  %v1850_v14 = vshll.u32 %v1780_v30, 16  ;;  %v7431_v55 = vld [vmem:[#allocation3 + $0x20] sm:$0xf]  ;;  %v789_v18 = vmax.f32 %v756_v31, 0.0  ;;  %v1393_v11 = vsel %vm6787_vm0, %v1391_v33, %v1392_v13 }
 0x192   : > { %v1721_v16 = vsel %vm6840_vm6, %v1719_v60, %v1720_v21  ;;  %v1188_v24 = vshll.u32 %v7431_v55, 16  ;;  %v1941_v37 = vld [vmem:[#allocation3 + $0x20] sm:$0xf]  ;;  %1415 = vrot.lane.b32.xlu1 %v1393_v11, %s6599_s16  ;;  %v7461_v62 = vld [vmem:[#allocation3 + $0x24] sm:$0xf]  ;;  %v1192_v3 = vshrl.u32 %v7431_v55, 16 }
 0x193   : > { %1744 = vrot.lane.b32.xlu0 %v1721_v16, %s6597_s14  ;;  %v1849_v43 = vrot.slane %v1847_v45, 6  ;;  %v1852_v6 = vrot.slane %v1850_v14, 7  ;;  %v1592_v29 = vld [vmem:[#allocation3 + $0x20] sm:$0xf]  ;;  %822 = vst.msk [vmem:[#allocation2 + $0xf8] sm:$0xff] %vm790_vm3, %v789_v18  ;;  %v1408_v48 = vpop.permute.xlu1 %1407  ;;  %v1977_v63 = vrot.slane %v1941_v37, 7 }
 0x194   : > { %1436 = vst.msk [vmem:[#allocation4 + $0x18] sm:$0xf] %vm1433_vm9, %v1408_v48  ;;  %v5157_v9 = vld [vmem:[#allocation4 + $0xc] sm:$0xf0]  ;;  %v7453_v35 = vrot.slane %v1188_v24, 5  ;;  %v1630_v51 = vrot.slane %v1592_v29, 6 }
 0x195   : > { %v1646_v56 = vpop.permute.xlu0 %1645  ;;  %v7450_v22 = vor.u32 %v1852_v6, %v1849_v43  ;;  %v5160_v57 = vor.u32 %v6254_v52, %v5157_v9  ;;  %v1978_v49 = vsel %vm6956_vm2, %v1976_v8, %v1977_v63  ;;  %v7463_v25 = vld [vmem:[#allocation3 + $0x24] sm:$0xf]  ;;  %v1723_v61 = vrot.slane %v7461_v62, 6  ;;  %v7480_v40 = vld [vmem:[#allocation3 + $0x20] sm:$0xf] }
 0x196   : > { %1673 = vst.msk [vmem:[#allocation4 + $0x1c] sm:$0xf] %vm1242_vm12, %v1646_v56  ;;  %v1781_v5 = vld [vmem:[#allocation3 + $0x24] sm:$0xf]  ;;  %v1191_v4 = vsel %vm6796_vm1, %v1186_v59, %v7453_v35  ;;  %v1631_v50 = vsel %vm6840_vm6, %v1629_v12, %v1630_v51  ;;  %v1633_v36 = vrot.slane %v7463_v25, 6  ;;  %v1722_v38 = vrot.slane %v1720_v21, 4  ;;  %v1410_v16 = vpop.permute.xlu2 %1409 }
 0x197   : > { %1766 = vst.msk [vmem:[#allocation4 + $0x1c] sm:$0xf] %vm1339_vm5, %v1739_v53  ;;  %v1854_v7 = vsel %vm7011_vm14, %v1845_v27, %v7450_v22  ;;  %2311 = vmatmul.bf16.vlgmr.msra.gmra.mxu2 %v5160_v57  ;;  %v1857_v15 = vshrl.u32 %v1781_v5, 16  ;;  %v7482_v39 = vld [vmem:[#allocation3 + $0x24] sm:$0xf]  ;;  %v1632_v45 = vrot.slane %v1630_v51, 4 }
 0x198   : > { %1905 = vrot.lane.b32.xlu2 %v1854_v7, %s6599_s16  ;;  %2006 = vst.msk [vmem:[#allocation4 + $0x44] sm:$0xf] %vm455_vm4, %v1978_v49  ;;  %v5187_v31 = vld [vmem:[#allocation4 + $0x38] sm:$0xf]  ;;  %v1860_v14 = vshll.u32 %v1781_v5, 16  ;;  %v1979_v55 = vrot.slane %v1977_v63, 4  ;;  %v1724_v6 = vsel %vm6840_vm6, %v1722_v38, %v1723_v61 }
 0x199   : > { %v1980_v18 = vrot.slane %v7482_v39, 7  ;;  %v1301_v24 = vrot.slane %v7480_v40, 5  ;;  %v7488_v37 = vld [vmem:[#allocation3 + $0x24] sm:$0xf]  ;;  %v1194_v21 = vrot.slane %v1192_v3, 4  ;;  %v1634_v29 = vsel %vm6840_vm6, %v1632_v45, %v1633_v36 }
 0x19a   : > { %v853_v26 = vld [vmem:[#allocation2 + $0xf0] ss:$2 sm:$0xff]  ;;  %v885_v2 = vld [vmem:[#allocation2 + $0xf1] ss:$2 sm:$0xff]  ;;  %1226 = vrot.lane.b32.xlu1 %v1191_v4, %s6598_s15  ;;  %v7499_v12 = vld [vmem:[#allocation3 + $0x24] sm:$0xf] }
 0x19b   : > { %1653 = vrot.lane.b32.xlu0 %v1631_v50, %s6598_s15  ;;  %v901_v33 = vmax.f32 %v853_v26, %v885_v2  ;;  %v1219_v60 = vpop.permute.xlu1 %1218  ;;  %v1981_v53 = vsel %vm6956_vm2, %v1979_v55, %v1980_v18  ;;  %v1394_v34 = vrot.slane %v1392_v13, 4  ;;  %v1859_v8 = vrot.slane %v1857_v15, 6  ;;  %v1451_v63 = vld [vmem:[#allocation3 + $0x20] sm:$0xf]  ;;  %v1452_v7 = vld [vmem:[#allocation3 + $0x24] sm:$0xf] }
 0x19c   : > { %1246 = vst.msk [vmem:[#allocation4 + $0x24] sm:$0xf] %vm1242_vm12, %v1219_v60  ;;  %v1862_v56 = vrot.slane %v1860_v14, 7  ;;  %v1198_v52 = vshll.u32 %v7488_v37, 16  ;;  %v1527_v9 = vshrl.u32 %v1451_v63, 16  ;;  %v1530_v57 = vshll.u32 %v1451_v63, 16 }
 0x19d   : > { %v1316_v30 = vpop.permute.xlu0 %1315  ;;  %v1057_v11 = vmax.f32 %v900_v47, %v901_v33  ;;  %2007 = vst.msk [vmem:[#allocation4 + $0x50] sm:$0xf] %vm455_vm4, %v1981_v53  ;;  %v1302_v49 = vsel %vm6787_vm0, %v1300_v32, %v1301_v24  ;;  %v1395_v20 = vrot.slane %v7499_v12, 5  ;;  %v1195_v13 = vor.u32 %v1194_v21, %v7453_v35  ;;  %v1069_v59 = vld [vmem:[#allocation3 + $0x28] sm:$0xf] }
 0x19e   : > { %1343 = vst.msk [vmem:[#allocation4 + $0x24] sm:$0xf] %vm1339_vm5, %v1316_v30  ;;  %v1529_v19 = vrot.slane %v1527_v9, 5  ;;  %v1532_v3 = vrot.slane %v1530_v57, 6  ;;  %v1537_v5 = vshrl.u32 %v1452_v7, 16  ;;  %v1540_v2 = vshll.u32 %v1452_v7, 16  ;;  %v1318_v53 = vpop.permute.xlu2 %1317 }
 0x19f   : > { %v6262_v43 = vld [vmem:[#allocation4 + $0x40] sm:$0xf0]  ;;  %1437 = vst.msk [vmem:[#allocation4 + $0x24] sm:$0xf] %vm1433_vm9, %v1410_v16  ;;  %v1058_v48 = vpack.c.bf16 %v1057_v11, %v1057_v11  ;;  %v1083_v4 = vld [vmem:[#allocation3 + $0x20] sm:$0xf]  ;;  %v7520_v33 = vor.u32 %v1862_v56, %v1859_v8  ;;  %v1396_v11 = vsel %vm6787_vm0, %v1394_v34, %v1395_v20 }
 0x1a0   : > { %v5188_v27 = vor.u32 %v6262_v43, %v5187_v31  ;;  %1746 = vrot.lane.b32.xlu2 %v1724_v6, %s6597_s14  ;;  %v1072_v26 = vld [vmem:[#allocation3 + $0x2c] sm:$0x1]  ;;  %1093 = vst.msk [vmem:[#allocation4 + $0x60] sm:$0xf] %vm455_vm4, %v1083_v4  ;;  %v1084_v32 = vld [vmem:[#allocation3 + $0x24] sm:$0xf]  ;;  %v1533_v60 = vor.u32 %v1532_v3, %v1529_v19 }
 0x1a1   : > { %v1060_v51 = vshrl.u32 %v1058_v48, 16  ;;  %v1063_v28 = vshll.u32 %v1058_v48, 16  ;;  %v5167_v47 = vld [vmem:[#allocation4 + $0x18] sm:$0xf]  ;;  %v7522_v35 = vrot.slane %v1198_v52, 5  ;;  %v1539_v38 = vrot.slane %v1537_v5, 5 }
 0x1a2   : > { %5287 = vmatmul.msk.bf16.gmra.mxu3 %vm790_vm3, %v5188_v27  ;;  %1655 = vrot.lane.b32.xlu1 %v1634_v29, %s6598_s15  ;;  %1094 = vst.msk [vmem:[#allocation4 + $0x6c] sm:$0xf] %vm455_vm4, %v1084_v32  ;;  %v1196_v14 = vrot.slane %v1195_v13, 4  ;;  %v1542_v55 = vrot.slane %v1540_v2, 6  ;;  %v1534_v21 = vsel %vm6881_vm11, %v1525_v42, %v1533_v60  ;;  %v1855_v6 = vrot.slane %v7450_v22, 4 }
 0x1a3   : > { %1323 = vrot.lane.b32.xlu0 %v1302_v49, %s6597_s14  ;;  %v1062_v50 = vrot.slane %v1060_v51, 7  ;;  %1581 = vst.msk [vmem:[#allocation4 + $0x4c] sm:$0xf] %vm455_vm4, %v1534_v21  ;;  %v1535_v48 = vrot.slane %v1533_v60, 4  ;;  %v1202_v34 = vshrl.u32 %v7488_v37, 16  ;;  %v1725_v8 = vrot.slane %v1723_v61, 4 }
 0x1a4   : > { %v7542_v27 = vor.u32 %v1542_v55, %v1539_v38  ;;  %v1864_v22 = vsel %vm7011_vm14, %v1855_v6, %v7520_v33  ;;  %v1201_v44 = vsel %vm6796_vm1, %v1196_v14, %v7522_v35  ;;  %v1982_v7 = vrot.slane %v1980_v18, 4 }
 0x1a5   : > { %v1065_v15 = vor.u32 %v1063_v28, %v1062_v50  ;;  %v1066_v31 = vrot.slane %v1062_v50, 4  ;;  %v1648_v30 = vpop.permute.xlu1 %1647  ;;  %v1204_v19 = vrot.slane %v1202_v34, 4 }
 0x1a6   : > { %v6258_v45 = vld [vmem:[#allocation4 + $0x20] sm:$0xf0]  ;;  %1674 = vst.msk [vmem:[#allocation4 + $0x28] sm:$0xf] %vm1242_vm12, %v1648_v30  ;;  %v1544_v46 = vsel %vm6881_vm11, %v1535_v48, %v7542_v27 }
 0x1a7   : > { %v5168_v16 = vor.u32 %v6258_v45, %v5167_v47  ;;  %v1070_v29 = vsel %vm7041_vm8, %v1065_v15, %v1069_v59  ;;  %v1073_v1 = vsel %vm7048_vm15, %v1066_v31, %v1072_v26  ;;  %1582 = vst.msk [vmem:[#allocation4 + $0x58] sm:$0xf] %vm455_vm4, %v1544_v46  ;;  %v1205_v47 = vor.u32 %v1204_v19, %v7522_v35  ;;  %v1945_v15 = vld [vmem:[#allocation3 + $0x30] sm:$0x7] }
 0x1a8   : > { %1417 = vrot.lane.b32.xlu2 %v1396_v11, %s6599_s16  ;;  %1071 = vst [vmem:[#allocation3 + $0x28] sm:$0xf] %v1070_v29  ;;  %v1691_v31 = vld [vmem:[#allocation3 + $0x30] sm:$0x3]  ;;  %v1865_v35 = vrot.slane %v7520_v33, 4  ;;  %vm9195_vm8 = vcmask 1042432  }
 0x1a9   : > { %v1221_v43 = vpop.permute.xlu0 %1220  ;;  %2282 = vmatmul.bf16.gmra.mxu1 %v5168_v16  ;;  %1074 = vst [vmem:[#allocation3 + $0x2c] sm:$0x1] %v1073_v1  ;;  %v1635_v16 = vrot.slane %v1633_v36, 4  ;;  %v1206_v1 = vrot.slane %v1205_v47, 4  ;;  %v1732_v48 = vrot.slane %v1691_v31, 6  ;;  %vm2436_vm15 = vcmask 519171  }
 0x1aa   : > { %1247 = vst.msk [vmem:[#allocation4 + $0x30] sm:$0xf] %vm1242_vm12, %v1221_v43  ;;  %1907 = vrot.lane.b32.xlu1 %v1864_v22, %s6599_s16  ;;  %v1989_v43 = vrot.slane %v1945_v15, 7 }
 0x1ab   : > { %1344 = vst.msk [vmem:[#allocation4 + $0x30] sm:$0xf] %vm1339_vm5, %v1318_v53  ;;  %1228 = vrot.lane.b32.xlu0 %v1201_v44, %s6598_s15  ;;  %v5199_v53 = vld [vmem:[#allocation4 + $0x50] sm:$0xf] }
 0x1ad   : > { %v1900_v42 = vpop.permute.xlu1 %1899 }
 0x1ae   : > { %1927 = vst.msk [vmem:[#allocation4 + $0x1c] sm:$0xf] %vm1433_vm9, %v1900_v42 }
 0x1af   : > { %v1689_v63 = vld [vmem:[#allocation3 + $0x28] sm:$0xf] }
 0x1b0   : > { %v1594_v56 = vld [vmem:[#allocation3 + $0x28] sm:$0xf]  ;;  %v1726_v9 = vrot.slane %v1689_v63, 6  ;;  %v1595_v57 = vld [vmem:[#allocation3 + $0x2c] sm:$0x3] }
 0x1b1   : > { %v1943_v52 = vld [vmem:[#allocation3 + $0x28] sm:$0xf]  ;;  %v1636_v51 = vrot.slane %v1594_v56, 6  ;;  %v7561_v49 = vld [vmem:[#allocation3 + $0x2c] sm:$0xf]  ;;  %v1639_v13 = vrot.slane %v1595_v57, 6 }
 0x1b2   : > { %v1983_v28 = vrot.slane %v1943_v52, 7  ;;  %v1105_v59 = vld [vmem:[#allocation3 + $0x28] sm:$0x1]  ;;  %v1727_v37 = vsel %vm6840_vm6, %v1725_v8, %v1726_v9  ;;  %v1728_v61 = vrot.slane %v1726_v9, 4  ;;  %v1729_v3 = vrot.slane %v7561_v49, 6 }
 0x1b3   : > { %v1638_v62 = vrot.slane %v1636_v51, 4  ;;  %v1782_v5 = vld [vmem:[#allocation3 + $0x28] sm:$0xf]  ;;  %1748 = vrot.lane.b32.xlu0 %v1727_v37, %s6597_s14  ;;  %v1208_v50 = vshll.u32 %v1105_v59, 16  ;;  %v1944_v32 = vld [vmem:[#allocation3 + $0x2c] sm:$0xf]  ;;  %v1637_v44 = vsel %vm6840_vm6, %v1635_v16, %v1636_v51 }
 0x1b4   : > { %v1984_v4 = vsel %vm6956_vm2, %v1982_v7, %v1983_v28  ;;  %v1867_v26 = vshrl.u32 %v1782_v5, 16  ;;  %v1870_v39 = vshll.u32 %v1782_v5, 16  ;;  %v1730_v2 = vsel %vm6840_vm6, %v1728_v61, %v1729_v3  ;;  %v1783_v14 = vld [vmem:[#allocation3 + $0x2c] sm:$0xf]  ;;  %v1453_v11 = vld [vmem:[#allocation3 + $0x28] sm:$0xf] }
 0x1b5   : > { %v1640_v18 = vsel %vm6840_vm6, %v1638_v62, %v1639_v13  ;;  %2008 = vst.msk [vmem:[#allocation4 + $0x5c] sm:$0xf] %vm455_vm4, %v1984_v4  ;;  %1750 = vrot.lane.b32.xlu2 %v1730_v2, %s6597_s14  ;;  %v1985_v30 = vrot.slane %v1983_v28, 4  ;;  %v1210_v45 = vrot.slane %v1208_v50, 5  ;;  %v1986_v55 = vrot.slane %v1944_v32, 7 }
 0x1b6   : > { %1659 = vrot.lane.b32.xlu1 %v1640_v18, %s6598_s15  ;;  %v1869_v60 = vrot.slane %v1867_v26, 6  ;;  %v1872_v38 = vrot.slane %v1870_v39, 7  ;;  %v1454_v6 = vld [vmem:[#allocation3 + $0x2c] sm:$0x3]  ;;  %v1547_v29 = vshrl.u32 %v1453_v11, 16  ;;  %v1877_v46 = vshrl.u32 %v1783_v14, 16 }
 0x1b7   : > { %v1987_v22 = vsel %vm6956_vm2, %v1985_v30, %v1986_v55  ;;  %v1880_v42 = vshll.u32 %v1783_v14, 16  ;;  %v1988_v34 = vrot.slane %v1986_v55, 4  ;;  %v1211_v36 = vsel %vm6796_vm1, %v1206_v1, %v1210_v45  ;;  %v1262_v9 = vld [vmem:[#allocation3 + $0x24] sm:$0xf]  ;;  %v1784_v49 = vld [vmem:[#allocation3 + $0x30] sm:$0x7] }
 0x1b8   : > { %v1873_v21 = vor.u32 %v1872_v38, %v1869_v60  ;;  %2009 = vst.msk [vmem:[#allocation4 + $0x68] sm:$0xf] %vm455_vm4, %v1987_v22  ;;  %v1549_v8 = vrot.slane %v1547_v29, 5  ;;  %v1550_v33 = vshll.u32 %v1453_v11, 16  ;;  %v1557_v63 = vshrl.u32 %v1454_v6, 16  ;;  %v1902_v60 = vpop.permute.xlu2 %1901 }
 0x1b9   : > { %v1990_v57 = vsel %vm6956_vm2, %v1988_v34, %v1989_v43  ;;  %v1560_v51 = vshll.u32 %v1454_v6, 16  ;;  %v1731_v28 = vrot.slane %v1729_v3, 4  ;;  %v1879_v59 = vrot.slane %v1877_v46, 6  ;;  %v1359_v41 = vld [vmem:[#allocation3 + $0x28] sm:$0xf] }
 0x1ba   : > { %v1874_v52 = vsel %vm7011_vm14, %v1865_v35, %v1873_v21  ;;  %2010 = vst.msk [vmem:[#allocation4 + $0x74] sm:$0xf] %vm455_vm4, %v1990_v57  ;;  %v1552_v13 = vrot.slane %v1550_v33, 6  ;;  %v1559_v7 = vrot.slane %v1557_v63, 5  ;;  %v1882_v19 = vrot.slane %v1880_v42, 7 }
 0x1bb   : > { %1657 = vrot.lane.b32.xlu0 %v1637_v44, %s6598_s15  ;;  %v1562_v37 = vrot.slane %v1560_v51, 6  ;;  %v1545_v61 = vrot.slane %v7542_v27, 4  ;;  %v1875_v5 = vrot.slane %v1873_v21, 4  ;;  %v1304_v4 = vrot.slane %v1262_v9, 5  ;;  %v1263_v27 = vld [vmem:[#allocation3 + $0x28] sm:$0x1] }
 0x1bc   : > { %v6265_v25 = vld [vmem:[#allocation4 + $0x58] sm:$0xf0]  ;;  %v1553_v62 = vor.u32 %v1552_v13, %v1549_v8  ;;  %v1887_v50 = vshrl.u32 %v1784_v49, 16  ;;  %v1890_v26 = vshll.u32 %v1784_v49, 16  ;;  %v1733_v32 = vsel %vm6840_vm6, %v1731_v28, %v1732_v48  ;;  %v1360_v34 = vld [vmem:[#allocation3 + $0x2c] sm:$0x1] }
 0x1bd   : > { %v5200_v56 = vor.u32 %v6265_v25, %v5199_v53  ;;  %1909 = vrot.lane.b32.xlu2 %v1874_v52, %s6599_s16  ;;  %v1563_v18 = vor.u32 %v1562_v37, %v1559_v7  ;;  %v1883_v47 = vor.u32 %v1882_v19, %v1879_v59  ;;  %v1303_v3 = vrot.slane %v1301_v24, 4  ;;  %v6257_v12 = vld [vmem:[#allocation4 + $0x1c] sm:$0xf] }
 0x1be   : > { %1230 = vrot.lane.b32.xlu1 %v1211_v36, %s6598_s15  ;;  %v1555_v39 = vrot.slane %v1553_v62, 4  ;;  %v1554_v2 = vsel %vm6881_vm11, %v1545_v61, %v1553_v62  ;;  %v1889_v14 = vrot.slane %v1887_v50, 6  ;;  %v1892_v40 = vrot.slane %v1890_v26, 7 }
 0x1bf   : > { %5288 = vmatmul.msk.bf16.gmra.mxu3 %vm790_vm3, %v5200_v56  ;;  %1583 = vst.msk [vmem:[#allocation4 + $0x64] sm:$0xf] %vm455_vm4, %v1554_v2  ;;  %v1884_v15 = vsel %vm7011_vm14, %v1875_v5, %v1883_v47  ;;  %v1305_v30 = vsel %vm6787_vm0, %v1303_v3, %v1304_v4  ;;  %v1307_v24 = vrot.slane %v1263_v27, 5  ;;  %v1306_v55 = vrot.slane %v1304_v4, 4  ;;  %v5211_v43 = vld [vmem:[#allocation4 + $0x68] sm:$0xf] }
 0x1c0   : > { %v1564_v38 = vsel %vm6881_vm11, %v1555_v39, %v1563_v18  ;;  %v1398_v11 = vrot.slane %v1359_v41, 5  ;;  %v1885_v16 = vrot.slane %v1883_v47, 4  ;;  %v1893_v21 = vor.u32 %v1892_v40, %v1889_v14 }
 0x1c1   : > { %1584 = vst.msk [vmem:[#allocation4 + $0x70] sm:$0xf] %vm455_vm4, %v1564_v38  ;;  %v6268_v6 = vld [vmem:[#allocation4 + $0x70] sm:$0xf0]  ;;  %v1308_v29 = vsel %vm6787_vm0, %v1306_v55, %v1307_v24  ;;  %v1397_v53 = vrot.slane %v1395_v20, 4  ;;  %v1401_v36 = vrot.slane %v1360_v34, 5 }
 0x1c2   : > { %v5212_v35 = vor.u32 %v6268_v6, %v5211_v43  ;;  %v1894_v44 = vsel %vm7011_vm14, %v1885_v16, %v1893_v21  ;;  %v1400_v25 = vrot.slane %v1398_v11, 4  ;;  %vm471_vm4 = vcmask 519168  }
 0x1c3   : > { %1752 = vrot.lane.b32.xlu0 %v1733_v32, %s6597_s14  ;;  %v1399_v48 = vsel %vm6787_vm0, %v1397_v53, %v1398_v11  ;;  %v7652_v32 = vld [vmem:[%s9144_s4] ss:$0 sm:$0xff]  ;;  %472 = vst.msk [vmem:[#allocation6] sm:$0xf] %vm471_vm4, %v6596_v23  ;;  %vm9196_vm11 = vsmask.f32 7950 }
 0x1c4   : > { %v1402_v33 = vsel %vm6787_vm0, %v1400_v25, %v1401_v36  ;;  %473 = vst.msk [vmem:[#allocation6 + $0x4] sm:$0xf] %vm471_vm4, %v6596_v23 }
 0x1c5   : > { %v1412_v31 = vpop.permute.xlu1 %1411  ;;  %1325 = vrot.lane.b32.xlu2 %v1305_v30, %s6597_s14  ;;  %474 = vst.msk [vmem:[#allocation6 + $0x8] sm:$0xf] %vm471_vm4, %v6596_v23 }
 0x1c6   : > { %v1741_v45 = vpop.permute.xlu0 %1740  ;;  %1911 = vrot.lane.b32.xlu1 %v1884_v15, %s6599_s16  ;;  %1438 = vst.msk [vmem:[#allocation4 + $0x30] sm:$0xf] %vm1433_vm9, %v1412_v31 }
 0x1c7   : > { %1767 = vst.msk [vmem:[#allocation4 + $0x28] sm:$0xf] %vm1339_vm5, %v1741_v45 }
 0x1c8   : > { %1928 = vst.msk [vmem:[#allocation4 + $0x28] sm:$0xf] %vm1433_vm9, %v1902_v60  ;;  %v2346_v60 = vpop.f32.mrf.mxu3 }
 0x1c9   : > { %475 = vst.msk [vmem:[#allocation6 + $0xc] sm:$0xf] %vm471_vm4, %v6596_v23 }
 0x1ca   : > { %476 = vst.msk [vmem:[#allocation6 + $0x10] sm:$0xf] %vm471_vm4, %v6596_v23 }
 0x1cb   : > { %1327 = vrot.lane.b32.xlu0 %v1308_v29, %s6597_s14 }
 0x1cd   : > { %v1223_v22 = vpop.permute.xlu1 %1222  ;;  %1913 = vrot.lane.b32.xlu2 %v1894_v44, %s6599_s16  ;;  %v5179_v56 = vld [vmem:[#allocation4 + $0x30] sm:$0xf] }
 0x1ce   : > { %v1743_v1 = vpop.permute.xlu2 %1742  ;;  %v1650_v46 = vpop.permute.xlu0 %1649  ;;  %1419 = vrot.lane.b32.xlu1 %v1399_v48, %s6599_s16  ;;  %1248 = vst.msk [vmem:[#allocation4 + $0x3c] sm:$0xf] %vm1242_vm12, %v1223_v22 }
 0x1cf   : > { %5289 = vmatmul.msk.bf16.gmra.mxu3 %vm790_vm3, %v5212_v35  ;;  %1675 = vst.msk [vmem:[#allocation4 + $0x34] sm:$0xf] %vm1242_vm12, %v1650_v46  ;;  %v5169_v20 = vld [vmem:[#allocation4 + $0x24] sm:$0xf0]  ;;  %vm2381_vm3 = vcmask 523264  }
 0x1d0   : > { %1768 = vst.msk [vmem:[#allocation4 + $0x34] sm:$0xf] %vm1339_vm5, %v1743_v1  ;;  %v5172_v42 = vor.u32 %v6257_v12, %v5169_v20  ;;  %v2348_v43 = vpop.f32.mrf.mxu3 }
 0x1d2   : > { %2316 = vmatmul.bf16.gmra.mxu2 %v5172_v42 }
 0x1d5   : > { %1421 = vrot.lane.b32.xlu2 %v1402_v33, %s6599_s16 }
 0x1d6   : > { %v1414_v8 = vpop.permute.xlu2 %1413  ;;  %v1320_v63 = vpop.permute.xlu0 %1319 }
 0x1d7   : > { %1345 = vst.msk [vmem:[#allocation4 + $0x3c] sm:$0xf] %vm1339_vm5, %v1320_v63 }
 0x1d8   : > { %1439 = vst.msk [vmem:[#allocation4 + $0x3c] sm:$0xf] %vm1433_vm9, %v1414_v8 }
 0x1de   : > { %v1322_v49 = vpop.permute.xlu2 %1321 }
 0x1df   : > { %v6261_v52 = vld [vmem:[#allocation4 + $0x38] sm:$0xf0] }
 0x1e0   : > { %v5180_v9 = vor.u32 %v6261_v52, %v5179_v56 }
 0x1e2   : > { %2287 = vmatmul.bf16.gmra.mxu1 %v5180_v9 }
 0x1e5   : > { %v1652_v57 = vpop.permute.xlu1 %1651 }
 0x1e6   : > { %1676 = vst.msk [vmem:[#allocation4 + $0x40] sm:$0xf] %vm1242_vm12, %v1652_v57 }
 0x1e9   : > { %v1225_v51 = vpop.permute.xlu0 %1224 }
 0x1ea   : > { %1249 = vst.msk [vmem:[#allocation4 + $0x48] sm:$0xf] %vm1242_vm12, %v1225_v51 }
 0x1eb   : > { %1346 = vst.msk [vmem:[#allocation4 + $0x48] sm:$0xf] %vm1339_vm5, %v1322_v49  ;;  %v2351_v49 = vpop.f32.mrf.mxu3 }
 0x1ed   : > { %v1904_v13 = vpop.permute.xlu1 %1903 }
 0x1ee   : > { %1929 = vst.msk [vmem:[#allocation4 + $0x34] sm:$0xf] %vm1433_vm9, %v1904_v13 }
 0x1f2   : > { %v1906_v7 = vpop.permute.xlu2 %1905 }
 0x1f5   : > { %v6260_v5 = vld [vmem:[#allocation4 + $0x34] sm:$0xf] }
 0x1f7   : > { %v2278_v39 = vpop.f32.mrf.mxu1 }
 0x1f8   : > { %v2279_v47 = vadd.f32 %v7652_v32, %v2278_v39 }
 0x1fa   : > { %v1747_v28 = vpop.permute.xlu2 %1746 }
 0x1ff   : > { %v2280_v45 = vpop.f32.mrf.mxu1 }
 0x200   : > { %v2281_v55 = vadd.f32 %v7652_v32, %v2280_v45 }
 0x202   : > { %v1418_v37 = vpop.permute.xlu2 %1417 }
 0x204   : > { %v1416_v59 = vpop.permute.xlu1 %1415 }
 0x205   : > { %v1745_v19 = vpop.permute.xlu0 %1744  ;;  %1440 = vst.msk [vmem:[#allocation4 + $0x48] sm:$0xf] %vm1433_vm9, %v1416_v59 }
 0x206   : > { %1769 = vst.msk [vmem:[#allocation4 + $0x40] sm:$0xf] %vm1339_vm5, %v1745_v19 }
 0x207   : > { %1930 = vst.msk [vmem:[#allocation4 + $0x40] sm:$0xf] %vm1433_vm9, %v1906_v7 }
 0x20c   : > { %v1227_v62 = vpop.permute.xlu1 %1226  ;;  %v5191_v14 = vld [vmem:[#allocation4 + $0x48] sm:$0xf] }
 0x20d   : > { %v1654_v61 = vpop.permute.xlu0 %1653  ;;  %1250 = vst.msk [vmem:[#allocation4 + $0x54] sm:$0xf] %vm1242_vm12, %v1227_v62 }
 0x20e   : > { %1677 = vst.msk [vmem:[#allocation4 + $0x4c] sm:$0xf] %vm1242_vm12, %v1654_v61  ;;  %v5181_v4 = vld [vmem:[#allocation4 + $0x3c] sm:$0xf0] }
 0x20f   : > { %1770 = vst.msk [vmem:[#allocation4 + $0x4c] sm:$0xf] %vm1339_vm5, %v1747_v28  ;;  %v5184_v50 = vor.u32 %v6260_v5, %v5181_v4  ;;  %v1751_v26 = vpop.permute.xlu2 %1750  ;;  %v2353_v5 = vpop.f32.mrf.mxu3 }
 0x211   : > { %2321 = vmatmul.bf16.gmra.mxu2 %v5184_v50 }
 0x214   : > { %v1656_v18 = vpop.permute.xlu1 %1655 }
 0x215   : > { %v1324_v2 = vpop.permute.xlu0 %1323  ;;  %1678 = vst.msk [vmem:[#allocation4 + $0x58] sm:$0xf] %vm1242_vm12, %v1656_v18 }
 0x216   : > { %1347 = vst.msk [vmem:[#allocation4 + $0x54] sm:$0xf] %vm1339_vm5, %v1324_v2 }
 0x217   : > { %1441 = vst.msk [vmem:[#allocation4 + $0x54] sm:$0xf] %vm1433_vm9, %v1418_v37  ;;  %v1910_v3 = vpop.permute.xlu2 %1909 }
 0x21a   : > { %v2312_v27 = vpop.f32.mrf.mxu2 }
 0x21b   : > { %v2313_v38 = vadd.f32 %v2312_v27, %v2279_v47 }
 0x21c   : > { %v1908_v15 = vpop.permute.xlu1 %1907 }
 0x21d   : > { %v1229_v31 = vpop.permute.xlu0 %1228  ;;  %v2347_v30 = vadd.f32 %v2346_v60, %v2313_v38  ;;  %1931 = vst.msk [vmem:[#allocation4 + $0x4c] sm:$0xf] %vm1433_vm9, %v1908_v15 }
 0x21e   : > { %1251 = vst.msk [vmem:[#allocation4 + $0x60] sm:$0xf] %vm1242_vm12, %v1229_v31  ;;  %v6264_v40 = vld [vmem:[#allocation4 + $0x50] sm:$0xf0] }
 0x21f   : > { %v2371_v41 = vmax.f32 %v2347_v30, 0.0  ;;  %v5192_v24 = vor.u32 %v6264_v40, %v5191_v14  ;;  %v1326_v11 = vpop.permute.xlu2 %1325  ;;  %v2438_v14 = vld [vmem:[#allocation6] sm:$0x8] }
 0x220   : > { %1348 = vst.msk [vmem:[#allocation4 + $0x60] sm:$0xf] %vm1339_vm5, %v1326_v11 }
 0x221   : > { %2382 = vst.msk [vmem:[#allocation5] sm:$0xff] %vm2381_vm3, %v2371_v41  ;;  %2292 = vmatmul.bf16.gmra.mxu1 %v5192_v24 }
 0x222   : > { %v2314_v16 = vpop.f32.mrf.mxu2 }
 0x223   : > { %v2315_v21 = vadd.f32 %v2314_v16, %v2281_v55  ;;  %v2443_v55 = vld [vmem:[#allocation6 + $0x4] sm:$0x3] }
 0x224   : > { %v6263_v22 = vld [vmem:[#allocation4 + $0x4c] sm:$0xf] }
 0x225   : > { %v2349_v6 = vadd.f32 %v2348_v43, %v2315_v21  ;;  %v1749_v53 = vpop.permute.xlu0 %1748 }
 0x226   : > { %1771 = vst.msk [vmem:[#allocation4 + $0x58] sm:$0xf] %vm1339_vm5, %v1749_v53  ;;  %v2283_v57 = vpop.f32.mrf.mxu1 }
 0x227   : > { %v2372_v29 = vmax.f32 %v2349_v6, 0.0  ;;  %1932 = vst.msk [vmem:[#allocation4 + $0x58] sm:$0xf] %vm1433_vm9, %v1910_v3  ;;  %v1914_v12 = vpop.permute.xlu2 %1913  ;;  %v2284_v51 = vadd.f32 %v7652_v32, %v2283_v57 }
 0x228   : > { %v1660_v1 = vpop.permute.xlu1 %1659 }
 0x229   : > { %2383 = vst.msk [vmem:[#allocation5 + $0x8] sm:$0xff] %vm2381_vm3, %v2372_v29  ;;  %v2356_v29 = vpop.f32.mrf.mxu3 }
 0x22a   : > { %1680 = vst.msk [vmem:[#allocation4 + $0x70] sm:$0xf] %vm1242_vm12, %v1660_v1 }
 0x22d   : > { %v1658_v35 = vpop.permute.xlu0 %1657 }
 0x22e   : > { %1679 = vst.msk [vmem:[#allocation4 + $0x64] sm:$0xf] %vm1242_vm12, %v1658_v35  ;;  %v5193_v44 = vld [vmem:[#allocation4 + $0x54] sm:$0xf0]  ;;  %v2285_v59 = vpop.f32.mrf.mxu1 }
 0x22f   : > { %1772 = vst.msk [vmem:[#allocation4 + $0x64] sm:$0xf] %vm1339_vm5, %v1751_v26  ;;  %v5196_v46 = vor.u32 %v6263_v22, %v5193_v44  ;;  %v1422_v25 = vpop.permute.xlu2 %1421  ;;  %v2286_v37 = vadd.f32 %v7652_v32, %v2285_v59 }
 0x230   : > { %v1231_v48 = vpop.permute.xlu1 %1230  ;;  %v2392_v26 = vld [vmem:[#allocation5] ss:$2 sm:$0xff]  ;;  %v2402_v39 = vld [vmem:[#allocation5 + $0x1] ss:$2 sm:$0xff] }
 0x231   : > { %1252 = vst.msk [vmem:[#allocation4 + $0x6c] sm:$0xf] %vm1242_vm12, %v1231_v48  ;;  %2326 = vmatmul.bf16.gmra.mxu2 %v5196_v46  ;;  %v2411_v18 = vmax.f32 %v2392_v26, %v2402_v39  ;;  %vm2437_vm12 = vmand %vm2436_vm15, %vm9196_vm11  ;;  %vm2463_vm15 = vcmask 519170   ;;  %vm9198_vm11 = vsmask.f32 7946 }
 0x233   : > { %v2419_v60 = vrot.slane %v2411_v18, 5 }
 0x235   : > { %v1753_v20 = vpop.permute.xlu0 %1752 }
 0x236   : > { %1773 = vst.msk [vmem:[#allocation4 + $0x70] sm:$0xf] %vm1339_vm5, %v1753_v20  ;;  %v2358_v20 = vpop.f32.mrf.mxu3 }
 0x237   : > { %1934 = vst.msk [vmem:[#allocation4 + $0x70] sm:$0xf] %vm1433_vm9, %v1914_v12 }
 0x238   : > { %v1912_v42 = vpop.permute.xlu1 %1911 }
 0x239   : > { %1933 = vst.msk [vmem:[#allocation4 + $0x64] sm:$0xf] %vm1433_vm9, %v1912_v42 }
 0x23d   : > { %v1328_v34 = vpop.permute.xlu0 %1327 }
 0x23e   : > { %1349 = vst.msk [vmem:[#allocation4 + $0x6c] sm:$0xf] %vm1339_vm5, %v1328_v34  ;;  %v5205_v36 = vld [vmem:[#allocation4 + $0x6c] sm:$0xf0]  ;;  %vm2441_vm5 = vcmask 517120  }
 0x23f   : > { %1443 = vst.msk [vmem:[#allocation4 + $0x6c] sm:$0xf] %vm1433_vm9, %v1422_v25 }
 0x240   : > { %v1420_v8 = vpop.permute.xlu1 %1419  ;;  %v6266_v33 = vld [vmem:[#allocation4 + $0x64] sm:$0xf] }
 0x241   : > { %1442 = vst.msk [vmem:[#allocation4 + $0x60] sm:$0xf] %vm1433_vm9, %v1420_v8  ;;  %v5208_v63 = vor.u32 %v6266_v33, %v5205_v36  ;;  %vm9197_vm9 = vsmask.f32 1280 }
 0x242   : > { %vm2442_vm13 = vmand %vm2441_vm5, %vm9197_vm9  ;;  %v2361_v59 = vpop.f32.mrf.mxu3  ;;  %vm2641_vm9 = vsmask.f32 4368 }
 0x243   : > { %2331 = vmatmul.bf16.gmra.mxu2 %v5208_v63  ;;  %vm2469_vm5 = vmand %vm477_vm10, %vm995_vm7  ;;  %vm2489_vm10 = vsmask.f32 3334 }
 0x246   : > { %v6267_v56 = vld [vmem:[#allocation4 + $0x68] sm:$0xf0] }
 0x248   : > { %v5203_v52 = vld [vmem:[#allocation4 + $0x60] sm:$0xf] }
 0x249   : > { %v5204_v9 = vor.u32 %v6267_v56, %v5203_v52 }
 0x24b   : > { %2297 = vmatmul.bf16.gmra.mxu1 %v5204_v9 }
 0x255   : > { %v2317_v13 = vpop.f32.mrf.mxu2 }
 0x256   : > { %v2318_v7 = vadd.f32 %v2317_v13, %v2284_v51 }
 0x258   : > { %v2352_v28 = vadd.f32 %v2351_v49, %v2318_v7 }
 0x25a   : > { %v2373_v19 = vmax.f32 %v2352_v28, 0.0 }
 0x25c   : > { %2384 = vst.msk [vmem:[#allocation5 + $0x10] sm:$0xff] %vm2381_vm3, %v2373_v19 }
 0x25d   : > { %v2319_v62 = vpop.f32.mrf.mxu2 }
 0x25e   : > { %v2320_v61 = vadd.f32 %v2319_v62, %v2286_v37  ;;  %v2465_v37 = vld [vmem:[#allocation6 + $0x4] sm:$0xc]  ;;  %v2470_v62 = vld [vmem:[#allocation6 + $0x8] sm:$0x1] }
 0x25f   : > { %v2288_v43 = vpop.f32.mrf.mxu1 }
 0x260   : > { %v2354_v4 = vadd.f32 %v2353_v5, %v2320_v61  ;;  %v2289_v6 = vadd.f32 %v7652_v32, %v2288_v43 }
 0x262   : > { %v2374_v50 = vmax.f32 %v2354_v4, 0.0 }
 0x264   : > { %2385 = vst.msk [vmem:[#allocation5 + $0x18] sm:$0xff] %vm2381_vm3, %v2374_v50 }
 0x267   : > { %v2290_v48 = vpop.f32.mrf.mxu1 }
 0x268   : > { %v2291_v44 = vadd.f32 %v7652_v32, %v2290_v48 }
 0x26b   : > { %v2394_v2 = vld [vmem:[#allocation5 + $0x10] ss:$2 sm:$0xff]  ;;  %v2404_v47 = vld [vmem:[#allocation5 + $0x11] ss:$2 sm:$0xff] }
 0x26c   : > { %v2412_v3 = vmax.f32 %v2394_v2, %v2404_v47 }
 0x26e   : > { %v2420_v27 = vrot.slane %v2412_v3, 5 }
 0x270   : > { %v2421_v38 = vsel %vm9195_vm8, %v2419_v60, %v2420_v27 }
 0x271   : > { %v2423_v15 = vmax.f32 %v2411_v18, %v2421_v38 }
 0x273   : > { %v2424_v31 = vpack.c.bf16 %v2423_v15, %v2423_v15 }
 0x275   : > { %v2426_v30 = vshll.u32 %v2424_v31, 16  ;;  %v2429_v45 = vshrl.u32 %v2424_v31, 16 }
 0x277   : > { %v2428_v40 = vrot.slane %v2426_v30, 5  ;;  %v2431_v41 = vrot.slane %v2429_v45, 4  ;;  %v2363_v45 = vpop.f32.mrf.mxu3 }
 0x279   : > { %v2432_v23 = vor.u32 %v2431_v41, %v2428_v40  ;;  %v2439_v24 = vsel %vm2437_vm12, %v2428_v40, %v2438_v14  ;;  %vm2464_vm12 = vmand %vm2463_vm15, %vm9198_vm11  ;;  %vm2520_vm15 = vcmask 518144   ;;  %vm2521_vm11 = vsmask.f32 2306 }
 0x27a   : > { %2440 = vst [vmem:[#allocation6] sm:$0x8] %v2439_v24 }
 0x27b   : > { %v2433_v11 = vrot.slane %v2432_v23, 4 }
 0x27d   : > { %v2444_v16 = vsel %vm2442_vm13, %v2433_v11, %v2443_v55  ;;  %vm7739_vm13 = vmor %vm995_vm7, %vm2641_vm9  ;;  %vm2488_vm7 = vcmask 519169  }
 0x27e   : > { %2445 = vst [vmem:[#allocation6 + $0x4] sm:$0x3] %v2444_v16 }
 0x281   : > { %v2526_v21 = vld [vmem:[#allocation6] sm:$0xf] }
 0x282   : > { %2529 = vst.msk [vmem:[#allocation7] sm:$0xf] %vm471_vm4, %v2526_v21  ;;  %v2532_v28 = vld [vmem:[#allocation6] sm:$0xf] }
 0x283   : > { %v2537_v50 = vshrl.u32 %v2532_v28, 16  ;;  %v2540_v26 = vshll.u32 %v2532_v28, 16  ;;  %v2607_v30 = vld [vmem:[#allocation6] sm:$0x8] }
 0x284   : > { %v5291_v24 = vrot.slane %v2607_v30, 11  ;;  %v2583_v16 = vld [vmem:[#allocation6] sm:$0xe] }
 0x285   : > { %v2539_v60 = vrot.slane %v2537_v50, 4  ;;  %v5290_v48 = vrot.slane %v2583_v16, 9 }
 0x294   : > { %v2322_v53 = vpop.f32.mrf.mxu2 }
 0x295   : > { %v2323_v1 = vadd.f32 %v2322_v53, %v2289_v6 }
 0x297   : > { %v2357_v35 = vadd.f32 %v2356_v29, %v2323_v1 }
 0x299   : > { %v2375_v22 = vmax.f32 %v2357_v35, 0.0  ;;  %v2637_v35 = vld [vmem:[#allocation6] sm:$0x8] }
 0x29b   : > { %2386 = vst.msk [vmem:[#allocation5 + $0x20] sm:$0xff] %vm2381_vm3, %v2375_v22 }
 0x29c   : > { %v2324_v46 = vpop.f32.mrf.mxu2 }
 0x29d   : > { %v2325_v12 = vadd.f32 %v2324_v46, %v2291_v44 }
 0x29e   : > { %v2293_v52 = vpop.f32.mrf.mxu1 }
 0x29f   : > { %v2359_v42 = vadd.f32 %v2358_v20, %v2325_v12  ;;  %v2294_v49 = vadd.f32 %v7652_v32, %v2293_v52  ;;  %v2644_v20 = vshrl.u32 %v2637_v35, 16 }
 0x2a1   : > { %v2376_v34 = vmax.f32 %v2359_v42, 0.0 }
 0x2a3   : > { %2387 = vst.msk [vmem:[#allocation5 + $0x28] sm:$0xff] %vm2381_vm3, %v2376_v34 }
 0x2a6   : > { %v2295_v47 = vpop.f32.mrf.mxu1 }
 0x2a7   : > { %v2296_v38 = vadd.f32 %v7652_v32, %v2295_v47 }
 0x2aa   : > { %v2396_v25 = vld [vmem:[#allocation5 + $0x20] ss:$2 sm:$0xff]  ;;  %v2406_v36 = vld [vmem:[#allocation5 + $0x21] ss:$2 sm:$0xff] }
 0x2ab   : > { %v7698_v8 = vmax.f32 %v2396_v25, %v2406_v36 }
 0x2ad   : > { %v2447_v33 = vrot.slane %v7698_v8, 5 }
 0x2af   : > { %v2448_v63 = vsel %vm9195_vm8, %v2420_v27, %v2447_v33  ;;  %v2542_v27 = vrot.slane %v2540_v26, 5  ;;  %vm2490_vm8 = vmand %vm2488_vm7, %vm2489_vm10  ;;  %vm9205_vm7 = vcmask 1041408  }
 0x2b0   : > { %v2450_v56 = vmax.f32 %v2412_v3, %v2448_v63 }
 0x2b1   : > { %v2543_v14 = vor.u32 %v2542_v27, %v2539_v60 }
 0x2b2   : > { %v2451_v9 = vpack.c.bf16 %v2450_v56, %v2450_v56  ;;  %v2366_v56 = vpop.f32.mrf.mxu3 }
 0x2b3   : > { %v2544_v29 = vrot.slane %v2543_v14, 4 }
 0x2b4   : > { %v2453_v57 = vshrl.u32 %v2451_v9, 16  ;;  %v2456_v51 = vshll.u32 %v2451_v9, 16  ;;  %v2327_v19 = vpop.f32.mrf.mxu2 }
 0x2b5   : > { %v2328_v61 = vadd.f32 %v2327_v19, %v2294_v49 }
 0x2b6   : > { %v2455_v13 = vrot.slane %v2453_v57, 6  ;;  %v2458_v7 = vrot.slane %v2456_v51, 7  ;;  %v5292_v57 = vrot.slane %v2644_v20, 11 }
 0x2b7   : > { %v2362_v39 = vadd.f32 %v2361_v59, %v2328_v61 }
 0x2b8   : > { %v2459_v5 = vor.u32 %v2458_v7, %v2455_v13  ;;  %v2460_v4 = vrot.slane %v2455_v13, 4 }
 0x2b9   : > { %v2377_v3 = vmax.f32 %v2362_v39, 0.0 }
 0x2ba   : > { %v2466_v18 = vsel %vm2464_vm12, %v2459_v5, %v2465_v37  ;;  %v2471_v2 = vsel %vm2469_vm5, %v2460_v4, %v2470_v62  ;;  %v2368_v39 = vpop.f32.mrf.mxu3  ;;  %vm7775_vm12 = vmand %vm2520_vm15, %vm2521_vm11  ;;  %vm3268_vm5 = vcmask 1043458  }
 0x2bb   : > { %2467 = vst [vmem:[#allocation6 + $0x4] sm:$0xc] %v2466_v18 }
 0x2bc   : > { %2472 = vst [vmem:[#allocation6 + $0x8] sm:$0x1] %v2471_v2  ;;  %v2329_v15 = vpop.f32.mrf.mxu2 }
 0x2bd   : > { %2388 = vst.msk [vmem:[#allocation5 + $0x30] sm:$0xff] %vm2381_vm3, %v2377_v3  ;;  %v2330_v31 = vadd.f32 %v2329_v15, %v2296_v38 }
 0x2bf   : > { %v2364_v40 = vadd.f32 %v2363_v45, %v2330_v31 }
 0x2c1   : > { %v2378_v21 = vmax.f32 %v2364_v40, 0.0 }
 0x2c2   : > { %v7708_v41 = vld [vmem:[#allocation6 + $0x4] sm:$0xf] }
 0x2c3   : > { %v7710_v23 = vld [vmem:[#allocation6 + $0x4] sm:$0xf]  ;;  %v2617_v55 = vrot.slane %v7708_v41, 7  ;;  %2389 = vst.msk [vmem:[#allocation5 + $0x38] sm:$0xff] %vm2381_vm3, %v2378_v21 }
 0x2c4   : > { %v2546_v11 = vshll.u32 %v7710_v23, 16  ;;  %v7714_v43 = vld [vmem:[#allocation6 + $0x4] sm:$0xf] }
 0x2c5   : > { %v2618_v6 = vsel %vm6956_vm2, %v5291_v24, %v2617_v55  ;;  %v2527_v1 = vld [vmem:[#allocation6 + $0x4] sm:$0xf]  ;;  %v2593_v22 = vrot.slane %v7714_v43, 5  ;;  %v2619_v35 = vrot.slane %v2617_v55, 4 }
 0x2c6   : > { %v7720_v53 = vrot.slane %v2546_v11, 5  ;;  %2625 = vrot.lane.b32.xlu2 %v2618_v6, %s6597_s14  ;;  %2530 = vst.msk [vmem:[#allocation7 + $0x14] sm:$0xf] %vm471_vm4, %v2527_v1  ;;  %v2638_v46 = vld [vmem:[#allocation6 + $0x4] sm:$0xf]  ;;  %v2332_v34 = vpop.f32.mrf.mxu2 }
 0x2c7   : > { %v2594_v12 = vsel %vm6787_vm0, %v5290_v48, %v2593_v22  ;;  %v2649_v42 = vshrl.u32 %v2638_v46, 16  ;;  %v2652_v63 = vshll.u32 %v2638_v46, 16  ;;  %v2698_v16 = vld [vmem:[#allocation6 + $0x4] sm:$0xc] }
 0x2c8   : > { %v2549_v44 = vsel %vm6796_vm1, %v2544_v29, %v7720_v53  ;;  %v2298_v25 = vpop.f32.mrf.mxu1  ;;  %2604 = vst.msk [vmem:[#allocation7 + $0x4] sm:$0xf] %vm471_vm4, %v2594_v12  ;;  %v5293_v12 = vrot.slane %v2698_v16, 10 }
 0x2c9   : > { %2570 = vrot.lane.b32.xlu0 %v2549_v44, %s6597_s14  ;;  %v2299_v36 = vadd.f32 %v7652_v32, %v2298_v25  ;;  %v7736_v33 = vrot.slane %v2649_v42, 7 }
 0x2ca   : > { %v2398_v49 = vld [vmem:[#allocation5 + $0x30] ss:$2 sm:$0xff]  ;;  %v2408_v13 = vld [vmem:[#allocation5 + $0x31] ss:$2 sm:$0xff] }
 0x2cb   : > { %v2333_v9 = vadd.f32 %v2332_v34, %v2299_v36  ;;  %v2654_v51 = vor.u32 %v2652_v63, %v7736_v33  ;;  %v2414_v7 = vmax.f32 %v2398_v49, %v2408_v13 }
 0x2cd   : > { %v2367_v28 = vadd.f32 %v2366_v56, %v2333_v9  ;;  %v2655_v59 = vsel %vm7739_vm13, %v5292_v57, %v2654_v51  ;;  %v2474_v19 = vrot.slane %v2414_v7, 5 }
 0x2ce   : > { %2677 = vst.msk [vmem:[#allocation7 + $0x8] sm:$0xf] %vm471_vm4, %v2655_v59  ;;  %v2334_v4 = vpop.f32.mrf.mxu2 }
 0x2cf   : > { %v2379_v37 = vmax.f32 %v2367_v28, 0.0  ;;  %v2476_v61 = vmax.f32 %v7698_v8, %v2474_v19  ;;  %v2491_v8 = vld [vmem:[#allocation6 + $0x8] sm:$0xe] }
 0x2d0   : > { %v2300_v62 = vpop.f32.mrf.mxu1 }
 0x2d1   : > { %2390 = vst.msk [vmem:[#allocation5 + $0x40] sm:$0xff] %vm2381_vm3, %v2379_v37  ;;  %v2301_v5 = vadd.f32 %v7652_v32, %v2300_v62  ;;  %v2477_v50 = vpack.c.bf16 %v2476_v61, %v2476_v61  ;;  %v2550_v32 = vshrl.u32 %v7710_v23, 16  ;;  %v2595_v61 = vrot.slane %v2593_v22, 4 }
 0x2d3   : > { %v2335_v26 = vadd.f32 %v2334_v4, %v2301_v5  ;;  %v2479_v18 = vshrl.u32 %v2477_v50, 16  ;;  %v2482_v2 = vshll.u32 %v2477_v50, 16  ;;  %v2552_v14 = vrot.slane %v2550_v32, 4  ;;  %v2680_v4 = vld [vmem:[#allocation6 + $0x4] sm:$0xf] }
 0x2d5   : > { %v2369_v47 = vadd.f32 %v2368_v39, %v2335_v26  ;;  %v2481_v3 = vrot.slane %v2479_v18, 4  ;;  %v2484_v60 = vrot.slane %v2482_v2, 5  ;;  %v2553_v11 = vor.u32 %v2552_v14, %v7720_v53  ;;  %v2776_v26 = vld [vmem:[#allocation6 + $0x4] sm:$0x8] }
 0x2d7   : > { %v2380_v27 = vmax.f32 %v2369_v47, 0.0  ;;  %v2485_v38 = vor.u32 %v2484_v60, %v2481_v3  ;;  %v2554_v20 = vrot.slane %v2553_v11, 4  ;;  %v2523_v3 = vld [vmem:[#allocation6 + $0xc] sm:$0x7]  ;;  %v2722_v60 = vld [vmem:[#allocation6 + $0x4] sm:$0xc] }
 0x2d8   : > { %v2727_v14 = vshrl.u32 %v2722_v60, 16 }
 0x2d9   : > { %2391 = vst.msk [vmem:[#allocation5 + $0x48] sm:$0xff] %vm2381_vm3, %v2380_v27  ;;  %v2486_v15 = vrot.slane %v2485_v38, 4 }
 0x2db   : > { %v2492_v31 = vsel %vm2490_vm8, %v2486_v15, %v2491_v8 }
 0x2dc   : > { %2493 = vst [vmem:[#allocation6 + $0x8] sm:$0xe] %v2492_v31  ;;  %v5294_v31 = vrot.slane %v2776_v26, 11 }
 0x2e0   : > { %v2400_v30 = vld [vmem:[#allocation5 + $0x40] ss:$2 sm:$0xff]  ;;  %v2410_v45 = vld [vmem:[#allocation5 + $0x41] ss:$2 sm:$0xff] }
 0x2e1   : > { %v2415_v40 = vmax.f32 %v2400_v30, %v2410_v45 }
 0x2e3   : > { %v2495_v24 = vrot.slane %v2415_v40, 5  ;;  %v7753_v29 = vld [vmem:[#allocation6 + $0x8] sm:$0xf] }
 0x2e4   : > { %v2534_v1 = vld [vmem:[#allocation6 + $0x8] sm:$0xf]  ;;  %v2620_v23 = vrot.slane %v7753_v29, 7 }
 0x2e5   : > { %v2497_v21 = vmax.f32 %v2414_v7, %v2495_v24  ;;  %v2498_v6 = vmax.f32 %v2415_v40, %v2495_v24  ;;  %v2556_v48 = vshll.u32 %v2534_v1, 16  ;;  %v2723_v34 = vld [vmem:[#allocation6 + $0x8] sm:$0xf]  ;;  %v2560_v28 = vshrl.u32 %v2534_v1, 16  ;;  %v7799_v1 = vld [vmem:[#allocation6 + $0x10] sm:$0x7] }
 0x2e6   : > { %v2621_v53 = vsel %vm6956_vm2, %v2619_v35, %v2620_v23  ;;  %v2528_v63 = vld [vmem:[#allocation6 + $0x8] sm:$0xf]  ;;  %v2736_v59 = vshrl.u32 %v2723_v34, 16  ;;  %v2739_v19 = vshll.u32 %v2723_v34, 16  ;;  %v2730_v40 = vshll.u32 %v2722_v60, 16 }
 0x2e7   : > { %v2499_v44 = vpack.c.bf16 %v2497_v21, %v2497_v21  ;;  %v2500_v46 = vpack.c.bf16 %v2498_v6, %v2498_v6  ;;  %v7762_v42 = vrot.slane %v2556_v48, 5  ;;  %2627 = vrot.lane.b32.xlu0 %v2621_v53, %s6597_s14  ;;  %v2585_v9 = vld [vmem:[#allocation6 + $0x8] sm:$0xf]  ;;  %2531 = vst.msk [vmem:[#allocation7 + $0x28] sm:$0xf] %vm471_vm4, %v2528_v63  ;;  %v2562_v22 = vrot.slane %v2560_v28, 4 }
 0x2e8   : > { %v2699_v57 = vld [vmem:[#allocation6 + $0x8] sm:$0xf]  ;;  %v2596_v62 = vrot.slane %v2585_v9, 5  ;;  %v2738_v38 = vrot.slane %v2736_v59, 6  ;;  %v2741_v8 = vrot.slane %v2739_v19, 7  ;;  %v2656_v35 = vrot.slane %v7736_v33, 4 }
 0x2e9   : > { %v2502_v25 = vshrl.u32 %v2499_v44, 16  ;;  %v2505_v36 = vshll.u32 %v2499_v44, 16  ;;  %v2511_v41 = vshrl.u32 %v2500_v46, 16  ;;  %v2514_v55 = vshll.u32 %v2500_v46, 16  ;;  %v2639_v50 = vld [vmem:[#allocation6 + $0x8] sm:$0xf] }
 0x2ea   : > { %v2559_v56 = vsel %vm6796_vm1, %v2554_v20, %v7762_v42  ;;  %v2708_v5 = vrot.slane %v2699_v57, 6  ;;  %v7772_v39 = vld [vmem:[#allocation6 + $0x8] sm:$0xf]  ;;  %v2597_v27 = vsel %vm6787_vm0, %v2595_v61, %v2596_v62  ;;  %v2658_v32 = vshrl.u32 %v2639_v50, 16  ;;  %v2701_v44 = vld [vmem:[#allocation6 + $0x10] sm:$0x3] }
 0x2eb   : > { %v2504_v51 = vrot.slane %v2502_v25, 6  ;;  %v2507_v49 = vrot.slane %v2505_v36, 7  ;;  %v2513_v13 = vrot.slane %v2511_v41, 6  ;;  %v2516_v7 = vrot.slane %v2514_v55, 7  ;;  %2572 = vrot.lane.b32.xlu1 %v2559_v56, %s6597_s14  ;;  %2605 = vst.msk [vmem:[#allocation7 + $0x18] sm:$0xf] %vm471_vm4, %v2597_v27 }
 0x2ec   : > { %v2709_v43 = vsel %vm6840_vm6, %v5293_v12, %v2708_v5  ;;  %v2786_v30 = vrot.slane %v7772_v39, 7  ;;  %v7791_v24 = vrot.slane %v2658_v32, 7  ;;  %v2661_v11 = vshll.u32 %v2639_v50, 16  ;;  %v2779_v46 = vld [vmem:[#allocation6 + $0x10] sm:$0x7] }
 0x2ed   : > { %v2508_v37 = vor.u32 %v2507_v49, %v2504_v51  ;;  %v2517_v2 = vor.u32 %v2516_v7, %v2513_v13  ;;  %2719 = vst.msk [vmem:[#allocation7 + $0xc] sm:$0xf] %vm471_vm4, %v2709_v43  ;;  %v2563_v21 = vor.u32 %v2562_v22, %v7762_v42  ;;  %v7796_v6 = vor.u32 %v2741_v8, %v2738_v38 }
 0x2ee   : > { %v2787_v16 = vsel %vm6956_vm2, %v5294_v31, %v2786_v30  ;;  %v2663_v48 = vor.u32 %v2661_v11, %v7791_v24  ;;  %v2729_v12 = vrot.slane %v2727_v14, 6  ;;  %v2732_v53 = vrot.slane %v2730_v40, 7 }
 0x2ef   : > { %v2509_v18 = vrot.slane %v2508_v37, 4  ;;  %2686 = vrot.lane.b32.xlu0 %v2680_v4, %s6597_s14  ;;  %2797 = vst.msk [vmem:[#allocation7 + $0x10] sm:$0xf] %vm471_vm4, %v2787_v16  ;;  %v2622_v42 = vrot.slane %v2620_v23, 4  ;;  %v2564_v34 = vrot.slane %v2563_v21, 4  ;;  %v2744_v25 = vrot.slane %v7796_v6, 4 }
 0x2f0   : > { %v2664_v20 = vsel %vm7739_vm13, %v2656_v35, %v2663_v48  ;;  %v2756_v36 = vshrl.u32 %v7799_v1, 16  ;;  %v2598_v33 = vrot.slane %v2596_v62, 4  ;;  %v2714_v41 = vrot.slane %v2701_v44, 6 }
 0x2f1   : > { %v2518_v15 = vsel %vm7011_vm14, %v2509_v18, %v2517_v2  ;;  %2678 = vst.msk [vmem:[#allocation7 + $0x1c] sm:$0xf] %vm471_vm4, %v2664_v20  ;;  %v2710_v55 = vrot.slane %v2708_v5, 4  ;;  %v2792_v63 = vrot.slane %v2779_v46, 7  ;;  %v2733_v29 = vor.u32 %v2732_v53, %v2729_v12  ;;  %v6307_v46 = vld [vmem:[%s9145_s5 + $0x78] sm:$0xff]  ;;  %v6306_v12 = vld [vmem:[%s9145_s5 + $0x70] sm:$0xff] }
 0x2f2   : > { %v2524_v45 = vsel %vm7775_vm12, %v2518_v15, %v2523_v3  ;;  %v2788_v39 = vrot.slane %v2786_v30, 4  ;;  %v2759_v8 = vshll.u32 %v7799_v1, 16  ;;  %v2665_v30 = vrot.slane %v7791_v24, 4  ;;  %v2681_v24 = vld [vmem:[#allocation6 + $0x8] sm:$0xf]  ;;  %3167 = vmatpush.bf16.msrb.mxu1 %v6307_v46  ;;  %v6298_v53 = vld [vmem:[%s9145_s5 + $0x30] sm:$0xff] }
 0x2f3   : > { %2525 = vst [vmem:[#allocation6 + $0xc] sm:$0x7] %v2524_v45  ;;  %v2734_v14 = vrot.slane %v2733_v29, 4  ;;  %v2758_v21 = vrot.slane %v2756_v36, 6  ;;  %v6296_v36 = vld [vmem:[%s9145_s5 + $0x20] sm:$0xff]  ;;  %v6323_v29 = vld [vmem:[%s9145_s5 + $0xf8] sm:$0xff] }
 0x2f4   : > { %v2761_v1 = vrot.slane %v2759_v8, 7 }
 0x2f5   : > { %v2743_v16 = vsel %vm7011_vm14, %v2734_v14, %v7796_v6  ;;  %v6299_v6 = vld [vmem:[%s9145_s5 + $0x38] sm:$0xff]  ;;  %v6316_v14 = vld [vmem:[%s9145_s5 + $0xc0] sm:$0xff] }
 0x2f6   : > { %v2762_v52 = vor.u32 %v2761_v1, %v2758_v21  ;;  %3149 = vmatpush.bf16.msrb.mxu3 %v6299_v6  ;;  %3168 = vmatpush.bf16.msrb.mxu1 %v6306_v12  ;;  %v5653_v6 = vld [vmem:[%s9147_s7 + $0x178] sm:$0xf0] }
 0x2fa   : > { %v2610_v56 = vld [vmem:[#allocation6 + $0xc] sm:$0x7]  ;;  %3150 = vmatpush.bf16.msrb.mxu3 %v6298_v53 }
 0x2fb   : > { %v2535_v9 = vld [vmem:[#allocation6 + $0xc] sm:$0x1]  ;;  %v2623_v51 = vrot.slane %v2610_v56, 7  ;;  %v6294_v56 = vld [vmem:[%s9145_s5 + $0x10] sm:$0xff] }
 0x2fc   : > { %v2724_v57 = vld [vmem:[#allocation6 + $0xc] sm:$0xf]  ;;  %v2566_v49 = vshll.u32 %v2535_v9, 16 }
 0x2fd   : > { %v2746_v13 = vshrl.u32 %v2724_v57, 16  ;;  %v2749_v7 = vshll.u32 %v2724_v57, 16  ;;  %v2586_v23 = vld [vmem:[#allocation6 + $0xc] sm:$0x1]  ;;  %v2624_v19 = vsel %vm6956_vm2, %v2622_v42, %v2623_v51  ;;  %v6300_v51 = vld [vmem:[%s9145_s5 + $0x40] sm:$0xff] }
 0x2fe   : > { %v2700_v28 = vld [vmem:[#allocation6 + $0xc] sm:$0xf]  ;;  %v2568_v37 = vrot.slane %v2566_v49, 5  ;;  %2629 = vrot.lane.b32.xlu2 %v2624_v19, %s6597_s14  ;;  %v2599_v5 = vrot.slane %v2586_v23, 5  ;;  %v6315_v49 = vld [vmem:[%s9145_s5 + $0xb8] sm:$0xff] }
 0x2ff   : > { %v2640_v59 = vld [vmem:[#allocation6 + $0xc] sm:$0xf]  ;;  %v2748_v61 = vrot.slane %v2746_v13, 6  ;;  %v2751_v62 = vrot.slane %v2749_v7, 7  ;;  %v2711_v50 = vrot.slane %v2700_v28, 6  ;;  %v6292_v13 = vld [vmem:[%s9145_s5] sm:$0xff]  ;;  %3185 = vmatpush.bf16.msrb.mxu2 %v6315_v49 }
 0x300   : > { %v2778_v4 = vld [vmem:[#allocation6 + $0xc] sm:$0xf]  ;;  %v2667_v26 = vshrl.u32 %v2640_v59, 16  ;;  %v2569_v18 = vsel %vm6796_vm1, %v2564_v34, %v2568_v37  ;;  %v2670_v47 = vshll.u32 %v2640_v59, 16  ;;  %v2600_v60 = vsel %vm6787_vm0, %v2598_v33, %v2599_v5  ;;  %v6303_v33 = vld [vmem:[%s9145_s5 + $0x58] sm:$0xff]  ;;  %v6314_v7 = vld [vmem:[%s9145_s5 + $0xb0] sm:$0xff] }
 0x301   : > { %v2752_v2 = vor.u32 %v2751_v62, %v2748_v61  ;;  %v2789_v3 = vrot.slane %v2778_v4, 7  ;;  %2574 = vrot.lane.b32.xlu1 %v2569_v18, %s6597_s14  ;;  %v2713_v27 = vrot.slane %v2711_v50, 4  ;;  %v2712_v43 = vsel %vm6840_vm6, %v2710_v55, %v2711_v50  ;;  %2606 = vst.msk [vmem:[#allocation7 + $0x2c] sm:$0xf] %vm471_vm4, %v2600_v60  ;;  %v2682_v44 = vld [vmem:[#allocation6 + $0xc] sm:$0xf] }
 0x302   : > { %v2669_v22 = vrot.slane %v2667_v26, 7  ;;  %2720 = vst.msk [vmem:[#allocation7 + $0x20] sm:$0xf] %vm471_vm4, %v2712_v43  ;;  %v6305_v42 = vld [vmem:[%s9145_s5 + $0x68] sm:$0xff]  ;;  %v6312_v28 = vld [vmem:[%s9145_s5 + $0xa0] sm:$0xff]  ;;  %v6322_v59 = vld [vmem:[%s9145_s5 + $0xf0] sm:$0xff] }
 0x303   : > { %v2753_v38 = vsel %vm7011_vm14, %v2744_v25, %v2752_v2  ;;  %v2790_v15 = vsel %vm6956_vm2, %v2788_v39, %v2789_v3  ;;  %v2791_v32 = vrot.slane %v2789_v3, 4  ;;  %v2715_v31 = vsel %vm6840_vm6, %v2713_v27, %v2714_v41  ;;  %v6297_v34 = vld [vmem:[%s9145_s5 + $0x28] sm:$0xff]  ;;  %3169 = vmatpush.bf16.msrb.mxu1 %v6305_v42  ;;  %v6304_v25 = vld [vmem:[%s9145_s5 + $0x60] sm:$0xff]  ;;  %v6295_v41 = vld [vmem:[%s9145_s5 + $0x18] sm:$0xff]  ;;  %3186 = vmatpush.bf16.msrb.mxu2 %v6314_v7 }
 0x304   : > { %2766 = vrot.lane.b32.xlu0 %v2753_v38, %s6597_s14  ;;  %v2672_v45 = vor.u32 %v2670_v47, %v2669_v22  ;;  %2721 = vst.msk [vmem:[#allocation7 + $0x34] sm:$0xf] %vm471_vm4, %v2715_v31  ;;  %v2754_v35 = vrot.slane %v2752_v2, 4  ;;  %3151 = vmatpush.bf16.msrb.mxu3 %v6297_v34  ;;  %v6301_v9 = vld [vmem:[%s9145_s5 + $0x48] sm:$0xff]  ;;  %v6311_v19 = vld [vmem:[%s9145_s5 + $0x98] sm:$0xff]  ;;  %v6310_v61 = vld [vmem:[%s9145_s5 + $0x90] sm:$0xff] }
 0x305   : > { %v2793_v40 = vsel %vm6956_vm2, %v2791_v32, %v2792_v63  ;;  %2798 = vst.msk [vmem:[#allocation7 + $0x24] sm:$0xf] %vm471_vm4, %v2790_v15  ;;  %v6302_v63 = vld [vmem:[%s9145_s5 + $0x50] sm:$0xff]  ;;  %v6293_v57 = vld [vmem:[%s9145_s5 + $0x8] sm:$0xff]  ;;  %v6320_v5 = vld [vmem:[%s9145_s5 + $0xe0] sm:$0xff] }
 0x306   : > { %v2673_v11 = vsel %vm7739_vm13, %v2665_v30, %v2672_v45  ;;  %2764 = vrot.lane.b32.xlu2 %v2743_v16, %s6597_s14  ;;  %2799 = vst.msk [vmem:[#allocation7 + $0x38] sm:$0xf] %vm471_vm4, %v2793_v40  ;;  %v2763_v48 = vsel %vm7011_vm14, %v2754_v35, %v2762_v52  ;;  %v6313_v23 = vld [vmem:[%s9145_s5 + $0xa8] sm:$0xff]  ;;  %v6319_v39 = vld [vmem:[%s9145_s5 + $0xd8] sm:$0xff]  ;;  %v6308_v2 = vld [vmem:[%s9145_s5 + $0x80] sm:$0xff] }
 0x307   : > { %2679 = vst.msk [vmem:[#allocation7 + $0x30] sm:$0xf] %vm471_vm4, %v2673_v11  ;;  %vm2579_vm4 = vcmask 1043968   ;;  %3170 = vmatpush.bf16.msrb.mxu1 %v6304_v25  ;;  %3187 = vmatpush.bf16.msrb.mxu2 %v6313_v23  ;;  %v6321_v37 = vld [vmem:[%s9145_s5 + $0xe8] sm:$0xff]  ;;  %v6327_v18 = vld [vmem:[%s9145_s5 + $0x118] sm:$0xff]  ;;  %v6318_v43 = vld [vmem:[%s9145_s5 + $0xd0] sm:$0xff] }
 0x308   : > { %3152 = vmatpush.bf16.msrb.mxu3 %v6296_v36  ;;  %v6309_v50 = vld [vmem:[%s9145_s5 + $0x88] sm:$0xff]  ;;  %v6326_v22 = vld [vmem:[%s9145_s5 + $0x110] sm:$0xff]  ;;  %v6324_v40 = vld [vmem:[%s9145_s5 + $0x100] sm:$0xff]  ;;  %vm3289_vm13 = vsmask.f32 1282 }
 0x309   : > { %2688 = vrot.lane.b32.xlu1 %v2681_v24, %s6597_s14  ;;  %v6317_v32 = vld [vmem:[%s9145_s5 + $0xc8] sm:$0xff]  ;;  %vm8291_vm10 = vmand %vm9205_vm7, %vm3289_vm13 }
 0x30a   : > { %v6325_v31 = vld [vmem:[%s9145_s5 + $0x108] sm:$0xff] }
 0x30b   : > { %3171 = vmatpush.bf16.msrb.mxu1 %v6303_v33  ;;  %3188 = vmatpush.bf16.msrb.mxu2 %v6312_v28  ;;  %v5313_v33 = vld [vmem:[#allocation7 + $0x10] sm:$0xf]  ;;  %v5645_v23 = vld [vmem:[%s9147_s7 + $0x168] sm:$0xf0] }
 0x30c   : > { %3153 = vmatpush.bf16.msrb.mxu3 %v6295_v41  ;;  %v6291_v25 = vld [vmem:[#allocation7 + $0x20] sm:$0xf0] }
 0x30e   : > { %2768 = vrot.lane.b32.xlu2 %v2763_v48, %s6597_s14 }
 0x30f   : > { %3172 = vmatpush.bf16.msrb.mxu1 %v6302_v63  ;;  %3189 = vmatpush.bf16.msrb.mxu2 %v6311_v19  ;;  %v5314_v63 = vor.u32 %v6291_v25, %v5313_v33  ;;  %v5637_v19 = vld [vmem:[%s9147_s7 + $0x158] sm:$0xf0]  ;;  %v6371_v33 = vld [vmem:[%s9147_s7 + $0x154] sm:$0xf0] }
 0x310   : > { %3154 = vmatpush.bf16.msrb.mxu3 %v6294_v56 }
 0x311   : > { %2690 = vrot.lane.b32.xlu1 %v2682_v44, %s6597_s14  ;;  %v6374_v44 = vld [vmem:[%s9147_s7 + $0x174] sm:$0xf] }
 0x312   : > { %v5656_v46 = vor.u32 %v6374_v44, %v5653_v6  ;;  %v5515_v44 = vld [vmem:[%s9147_s7 + $0x60] sm:$0xf]  ;;  %v6341_v6 = vld [vmem:[%s9147_s7 + $0x64] sm:$0xf0] }
 0x313   : > { %3173 = vmatpush.bf16.msrb.mxu1 %v6301_v9  ;;  %3190 = vmatpush.bf16.msrb.mxu2 %v6310_v61 }
 0x314   : > { %3155 = vmatpush.bf16.msrb.mxu3 %v6293_v57  ;;  %4446 = vmatpush.bf16.msrb.mxu0 %v5656_v46  ;;  %v2808_v57 = vld [vmem:[#allocation7 + $0x38] sm:$0xf] }
 0x315   : > { %v2908_v49 = vunpack.c.l.b16 %v2808_v57 }
 0x317   : > { %3174 = vmatpush.bf16.msrb.mxu1 %v6300_v51  ;;  %3191 = vmatpush.bf16.msrb.mxu2 %v6309_v50  ;;  %v2918_v7 = vpack.c.b16 %v2908_v49, %v2908_v49  ;;  %v6355_v49 = vld [vmem:[%s9147_s7 + $0xd4] sm:$0xf0] }
 0x318   : > { %3156 = vmatpush.bf16.msrb.mxu3 %v6292_v13 }
 0x31b   : > { %3225 = vmatpush.bf16.msra.mxu1 %v6327_v18  ;;  %3192 = vmatpush.bf16.msrb.mxu2 %v6308_v2  ;;  %v6548_v18 = vld [vmem:[%s9146_s6] ss:$0 sm:$0xff] }
 0x31c   : > { %3203 = vmatpush.bf16.msra.mxu3 %v6323_v29  ;;  %v6372_v29 = vld [vmem:[%s9147_s7 + $0x164] sm:$0xf] }
 0x31d   : > { %v5648_v28 = vor.u32 %v6372_v29, %v5645_v23  ;;  %v5627_v23 = vld [vmem:[%s9147_s7 + $0x140] sm:$0xf] }
 0x31f   : > { %3226 = vmatpush.bf16.msra.mxu1 %v6326_v22  ;;  %4447 = vmatpush.bf16.msrb.mxu0 %v5648_v28  ;;  %v6375_v22 = vld [vmem:[%s9147_s7 + $0x174] sm:$0xf0]  ;;  %v6369_v28 = vld [vmem:[%s9147_s7 + $0x144] sm:$0xf0] }
 0x320   : > { %v2626_v20 = vpop.permute.xlu2 %2625  ;;  %3204 = vmatpush.bf16.msra.mxu3 %v6322_v59  ;;  %v6370_v59 = vld [vmem:[%s9147_s7 + $0x154] sm:$0xf] }
 0x321   : > { %2634 = vst.msk [vmem:[#allocation7 + $0x4] sm:$0xf] %vm2579_vm4, %v2626_v20 }
 0x323   : > { %3227 = vmatpush.bf16.msra.mxu1 %v6325_v31  ;;  %v6343_v31 = vld [vmem:[%s9147_s7 + $0x74] sm:$0xf0] }
 0x324   : > { %3205 = vmatpush.bf16.msra.mxu3 %v6321_v37  ;;  %v5640_v37 = vor.u32 %v6370_v59, %v5637_v19  ;;  %v5628_v19 = vor.u32 %v6369_v28, %v5627_v23  ;;  %v6329_v23 = vld [vmem:[%s9147_s7 + $0x4] sm:$0xf0]  ;;  %v5531_v28 = vld [vmem:[%s9147_s7 + $0x80] sm:$0xf] }
 0x326   : > { %4448 = vmatpush.bf16.msrb.mxu0 %v5640_v37 }
 0x327   : > { %3228 = vmatpush.bf16.msra.mxu1 %v6324_v40  ;;  %v6359_v40 = vld [vmem:[%s9147_s7 + $0xf4] sm:$0xf0] }
 0x328   : > { %3206 = vmatpush.bf16.msra.mxu3 %v6320_v5  ;;  %v6287_v3 = vld [vmem:[#allocation7 + $0x4] sm:$0xf] }
 0x32c   : > { %3207 = vmatpush.bf16.msra.mxu3 %v6319_v39 }
 0x330   : > { %3208 = vmatpush.bf16.msra.mxu3 %v6318_v43  ;;  %v5651_v43 = vld [vmem:[%s9147_s7 + $0x170] sm:$0xf] }
 0x334   : > { %3209 = vmatpush.bf16.msra.mxu3 %v6317_v32  ;;  %v5523_v32 = vld [vmem:[%s9147_s7 + $0x70] sm:$0xf] }
 0x338   : > { %3210 = vmatpush.bf16.msra.mxu3 %v6316_v14  ;;  %v5524_v14 = vor.u32 %v6343_v31, %v5523_v32  ;;  %v5555_v31 = vld [vmem:[%s9147_s7 + $0xb0] sm:$0xf] }
 0x33a   : > { %4303 = vmatpush.bf16.msra.mxu2 %v5524_v14  ;;  %v6351_v14 = vld [vmem:[%s9147_s7 + $0xb4] sm:$0xf0] }
 0x33b   : > { %v2571_v55 = vpop.permute.xlu0 %2570 }
 0x33c   : > { %2580 = vst.msk [vmem:[#allocation7] sm:$0xf] %vm2579_vm4, %v2571_v55 }
 0x343   : > { %v5297_v8 = vld [vmem:[#allocation7] sm:$0xf] }
 0x358   : > { %v2630_v62 = vpop.permute.xlu2 %2629 }
 0x359   : > { %2636 = vst.msk [vmem:[#allocation7 + $0x2c] sm:$0xf] %vm2579_vm4, %v2630_v62  ;;  %v2628_v4 = vpop.permute.xlu0 %2627 }
 0x35a   : > { %2635 = vst.msk [vmem:[#allocation7 + $0x18] sm:$0xf] %vm2579_vm4, %v2628_v4 }
 0x35d   : > { %v2573_v26 = vpop.permute.xlu1 %2572 }
 0x35e   : > { %2581 = vst.msk [vmem:[#allocation7 + $0x14] sm:$0xf] %vm2579_vm4, %v2573_v26 }
 0x360   : > { %v2765_v47 = vpop.permute.xlu2 %2764 }
 0x361   : > { %2773 = vst.msk [vmem:[#allocation7 + $0xc] sm:$0xf] %vm2579_vm4, %v2765_v47  ;;  %v2687_v60 = vpop.permute.xlu0 %2686  ;;  %v5299_v27 = vld [vmem:[#allocation7 + $0x14] sm:$0xf0] }
 0x362   : > { %2695 = vst.msk [vmem:[#allocation7 + $0x8] sm:$0xf] %vm2579_vm4, %v2687_v60  ;;  %v5302_v38 = vor.u32 %v6287_v3, %v5299_v27 }
 0x364   : > { %3175 = vmatmul.bf16.vlgmr.msrb.gmra.mxu1 %v5302_v38 }
 0x365   : > { %v6289_v15 = vld [vmem:[#allocation7 + $0x10] sm:$0xf0] }
 0x366   : > { %v5298_v30 = vor.u32 %v6289_v15, %v5297_v8  ;;  %v5652_v8 = vor.u32 %v6375_v22, %v5651_v43  ;;  %v6335_v22 = vld [vmem:[%s9147_s7 + $0x34] sm:$0xf0] }
 0x368   : > { %3157 = vmatmul.bf16.vlgmr.msrb.gmra.mxu3 %v5298_v30  ;;  %v2769_v45 = vpop.permute.xlu2 %2768  ;;  %v6288_v36 = vld [vmem:[#allocation7 + $0xc] sm:$0xf]  ;;  %v5587_v30 = vld [vmem:[%s9147_s7 + $0xf0] sm:$0xf]  ;;  %4329 = vmatpush.bf16.msrb.mxu1 %v5652_v8 }
 0x369   : > { %2775 = vst.msk [vmem:[#allocation7 + $0x34] sm:$0xf] %vm2579_vm4, %v2769_v45  ;;  %v5305_v53 = vld [vmem:[#allocation7 + $0x8] sm:$0xf]  ;;  %v6368_v8 = vld [vmem:[%s9147_s7 + $0x144] sm:$0xf] }
 0x373   : > { %v2575_v11 = vpop.permute.xlu1 %2574 }
 0x374   : > { %2582 = vst.msk [vmem:[#allocation7 + $0x28] sm:$0xf] %vm2579_vm4, %v2575_v11 }
 0x376   : > { %v2767_v16 = vpop.permute.xlu0 %2766 }
 0x377   : > { %2774 = vst.msk [vmem:[#allocation7 + $0x20] sm:$0xf] %vm2579_vm4, %v2767_v16 }
 0x37b   : > { %v2689_v21 = vpop.permute.xlu1 %2688  ;;  %v2806_v1 = vld [vmem:[#allocation7 + $0x28] sm:$0xff] }
 0x37c   : > { %2696 = vst.msk [vmem:[#allocation7 + $0x1c] sm:$0xf] %vm2579_vm4, %v2689_v21  ;;  %v2904_v24 = vunpack.c.l.b16 %v2806_v1  ;;  %v2905_v35 = vunpack.c.h.b16 %v2806_v1  ;;  %v5588_v21 = vor.u32 %v6359_v40, %v5587_v30  ;;  %v5643_v1 = vld [vmem:[%s9147_s7 + $0x160] sm:$0xf] }
 0x37d   : > { %v5611_v40 = vld [vmem:[%s9147_s7 + $0x120] sm:$0xf] }
 0x37e   : > { %v2914_v52 = vpack.c.b16 %v2904_v24, %v2904_v24  ;;  %v2915_v48 = vpack.c.b16 %v2905_v35, %v2905_v35  ;;  %v5307_v34 = vld [vmem:[#allocation7 + $0x1c] sm:$0xf0]  ;;  %v6373_v24 = vld [vmem:[%s9147_s7 + $0x164] sm:$0xf0]  ;;  %4316 = vmatpush.bf16.msrb.mxu3 %v5588_v21  ;;  %v5556_v21 = vor.u32 %v6351_v14, %v5555_v31  ;;  %v5707_v31 = vld [vmem:[%s9147_s7 + $0x1e0] sm:$0xf] }
 0x37f   : > { %v5310_v55 = vor.u32 %v6288_v36, %v5307_v34  ;;  %v5635_v36 = vld [vmem:[%s9147_s7 + $0x150] sm:$0xf] }
 0x380   : > { %3162 = vmatmul.bf16.gmra.mxu3 %v2914_v52  ;;  %3180 = vmatmul.bf16.gmra.mxu1 %v2915_v48  ;;  %v5644_v52 = vor.u32 %v6373_v24, %v5643_v1  ;;  %v5483_v24 = vld [vmem:[%s9147_s7 + $0x20] sm:$0xf] }
 0x382   : > { %4330 = vmatpush.bf16.msrb.mxu1 %v5644_v52  ;;  %v5547_v52 = vld [vmem:[%s9147_s7 + $0xa0] sm:$0xf] }
 0x383   : > { %v2691_v12 = vpop.permute.xlu1 %2690  ;;  %v6290_v20 = vld [vmem:[#allocation7 + $0x18] sm:$0xf0] }
 0x384   : > { %2697 = vst.msk [vmem:[#allocation7 + $0x30] sm:$0xf] %vm2579_vm4, %v2691_v12  ;;  %v5306_v42 = vor.u32 %v6290_v20, %v5305_v53  ;;  %v5516_v53 = vor.u32 %v6341_v6, %v5515_v44  ;;  %v5579_v20 = vld [vmem:[%s9147_s7 + $0xe0] sm:$0xf]  ;;  %v6349_v6 = vld [vmem:[%s9147_s7 + $0xa4] sm:$0xf0] }
 0x386   : > { %3193 = vmatmul.bf16.vlgmr.msrb.gmra.mxu2 %v5306_v42  ;;  %v6357_v42 = vld [vmem:[%s9147_s7 + $0xe4] sm:$0xf0] }
 0x387   : > { %v5580_v25 = vor.u32 %v6357_v42, %v5579_v20  ;;  %4304 = vmatpush.bf16.msra.mxu2 %v5516_v53  ;;  %v5548_v53 = vor.u32 %v6349_v6, %v5547_v52  ;;  %v5475_v20 = vld [vmem:[%s9147_s7 + $0x10] sm:$0xf]  ;;  %v6331_v42 = vld [vmem:[%s9147_s7 + $0x14] sm:$0xf0]  ;;  %v3271_v52 = vld [vmem:[#allocation9] sm:$0xc] }
 0x388   : > { %v6362_v6 = vld [vmem:[%s9147_s7 + $0x114] sm:$0xf] }
 0x389   : > { %4317 = vmatpush.bf16.msrb.mxu3 %v5580_v25 }
 0x38b   : > { %v2807_v41 = vld [vmem:[#allocation7 + $0x30] sm:$0xff] }
 0x38c   : > { %v2906_v56 = vunpack.c.l.b16 %v2807_v41  ;;  %v2907_v51 = vunpack.c.h.b16 %v2807_v41 }
 0x38e   : > { %v2916_v9 = vpack.c.b16 %v2906_v56, %v2906_v56  ;;  %v2917_v13 = vpack.c.b16 %v2907_v51, %v2907_v51  ;;  %v6339_v56 = vld [vmem:[%s9147_s7 + $0x54] sm:$0xf0]  ;;  %v5571_v51 = vld [vmem:[%s9147_s7 + $0xd0] sm:$0xf] }
 0x38f   : > { %v5572_v29 = vor.u32 %v6355_v49, %v5571_v51  ;;  %v5843_v51 = vld [vmem:[%s9147_s7 + $0x2f0] sm:$0xf]  ;;  %v6423_v49 = vld [vmem:[%s9147_s7 + $0x2f4] sm:$0xf0] }
 0x390   : > { %3211 = vmatmul.bf16.vlgmr.msra.gmra.mxu3 %v5310_v55  ;;  %5459 = vmatmul.msk.bf16.vlgmr.msra.gmra.mxu1 %vm2381_vm3, %v5314_v63  ;;  %v5636_v55 = vor.u32 %v6371_v33, %v5635_v36  ;;  %v5507_v63 = vld [vmem:[%s9147_s7 + $0x50] sm:$0xf]  ;;  %v6347_v33 = vld [vmem:[%s9147_s7 + $0x94] sm:$0xf0] }
 0x391   : > { %v5508_v57 = vor.u32 %v6339_v56, %v5507_v63  ;;  %4318 = vmatpush.bf16.msrb.mxu3 %v5572_v29  ;;  %v6361_v56 = vld [vmem:[%s9147_s7 + $0x104] sm:$0xf0]  ;;  %v5467_v29 = vld [vmem:[%s9147_s7] sm:$0xf] }
 0x392   : > { %4331 = vmatpush.bf16.msrb.mxu1 %v5636_v55 }
 0x393   : > { %4305 = vmatpush.bf16.msra.mxu2 %v5508_v57  ;;  %v5476_v57 = vor.u32 %v6331_v42, %v5475_v20 }
 0x396   : > { %3198 = vmatmul.bf16.gmra.mxu2 %v2916_v9  ;;  %4332 = vmatpush.bf16.msrb.mxu1 %v5628_v19 }
 0x3a0   : > { %3216 = vmatmul.bf16.gmra.mxu3 %v2917_v13  ;;  %5460 = vmatmul.msk.bf16.gmra.mxu1 %vm2381_vm3, %v2918_v7  ;;  %vm3269_vm3 = vsmask.f32 3338 }
 0x3a1   : > { %vm8210_vm9 = vmand %vm3268_vm5, %vm3269_vm3 }
 0x3e1   : > { %v3176_v61 = vpop.f32.mrf.mxu1 }
 0x3e9   : > { %v3178_v4 = vpop.f32.mrf.mxu1 }
 0x3eb   : > { %v3158_v62 = vpop.f32.mrf.mxu3 }
 0x3ec   : > { %v3159_v3 = vadd.f32 %v6548_v18, %v3158_v62  ;;  %v6337_v62 = vld [vmem:[%s9147_s7 + $0x44] sm:$0xf0] }
 0x3ee   : > { %v3177_v27 = vadd.f32 %v3176_v61, %v3159_v3  ;;  %v5499_v61 = vld [vmem:[%s9147_s7 + $0x40] sm:$0xf]  ;;  %v5619_v3 = vld [vmem:[%s9147_s7 + $0x130] sm:$0xf] }
 0x3f3   : > { %v3160_v5 = vpop.f32.mrf.mxu3 }
 0x3f4   : > { %v3161_v11 = vadd.f32 %v6548_v18, %v3160_v5  ;;  %v5500_v5 = vor.u32 %v6337_v62, %v5499_v61  ;;  %v6366_v61 = vld [vmem:[%s9147_s7 + $0x134] sm:$0xf]  ;;  %v5844_v62 = vor.u32 %v6423_v49, %v5843_v51  ;;  %v5819_v51 = vld [vmem:[%s9147_s7 + $0x2c0] sm:$0xf]  ;;  %v6417_v49 = vld [vmem:[%s9147_s7 + $0x2c4] sm:$0xf0] }
 0x3f6   : > { %v3179_v46 = vadd.f32 %v3178_v4, %v3161_v11  ;;  %v5563_v4 = vld [vmem:[%s9147_s7 + $0xc0] sm:$0xf]  ;;  %4306 = vmatpush.bf16.msra.mxu2 %v5500_v5  ;;  %v6365_v11 = vld [vmem:[%s9147_s7 + $0x124] sm:$0xf0]  ;;  %v5715_v5 = vld [vmem:[%s9147_s7 + $0x1f0] sm:$0xf] }
 0x3f7   : > { %v5612_v1 = vor.u32 %v6365_v11, %v5611_v40 }
 0x3fd   : > { %v7988_v50 = vpop.f32.mrf.mxu1 }
 0x403   : > { %v3163_v26 = vpop.f32.mrf.mxu3 }
 0x404   : > { %v3164_v13 = vadd.f32 %v6548_v18, %v3163_v26  ;;  %v6353_v26 = vld [vmem:[%s9147_s7 + $0xc4] sm:$0xf0] }
 0x405   : > { %v3183_v39 = vpop.f32.mrf.mxu1 }
 0x406   : > { %v3182_v39 = vadd.f32 %v7988_v50, %v3164_v13  ;;  %v5491_v50 = vld [vmem:[%s9147_s7 + $0x30] sm:$0xf] }
 0x407   : > { %v5492_v32 = vor.u32 %v6335_v22, %v5491_v50  ;;  %v6421_v50 = vld [vmem:[%s9147_s7 + $0x2e4] sm:$0xf0]  ;;  %v6364_v22 = vld [vmem:[%s9147_s7 + $0x124] sm:$0xf] }
 0x409   : > { %v3194_v2 = vpop.f32.mrf.mxu2  ;;  %4307 = vmatpush.bf16.msra.mxu2 %v5492_v32 }
 0x40a   : > { %v3195_v15 = vadd.f32 %v3194_v2, %v3177_v27  ;;  %v5564_v2 = vor.u32 %v6353_v26, %v5563_v4  ;;  %v5621_v4 = vld [vmem:[%s9147_s7 + $0x138] sm:$0xf0]  ;;  %v6391_v26 = vld [vmem:[%s9147_s7 + $0x1f4] sm:$0xf0] }
 0x40b   : > { %v3165_v47 = vpop.f32.mrf.mxu3 }
 0x40c   : > { %4319 = vmatpush.bf16.msrb.mxu3 %v5564_v2  ;;  %v5624_v2 = vor.u32 %v6366_v61, %v5621_v4  ;;  %v5755_v61 = vld [vmem:[%s9147_s7 + $0x240] sm:$0xf]  ;;  %v5820_v4 = vor.u32 %v6417_v49, %v5819_v51  ;;  %v6395_v51 = vld [vmem:[%s9147_s7 + $0x214] sm:$0xf0] }
 0x40d   : > { %v3230_v60 = vpop.f32.mrf.mxu1 }
 0x410   : > { %4320 = vmatpush.bf16.msrb.mxu3 %v5556_v21 }
 0x411   : > { %v3196_v38 = vpop.f32.mrf.mxu2 }
 0x412   : > { %v3197_v41 = vadd.f32 %v3196_v38, %v3179_v46  ;;  %v5603_v46 = vld [vmem:[%s9147_s7 + $0x110] sm:$0xf] }
 0x413   : > { %v3212_v45 = vpop.f32.mrf.mxu3 }
 0x414   : > { %v3213_v16 = vadd.f32 %v3212_v45, %v3195_v15  ;;  %v5629_v15 = vld [vmem:[%s9147_s7 + $0x148] sm:$0xf0]  ;;  %4321 = vmatpush.bf16.msrb.mxu3 %v5548_v53 }
 0x415   : > { %v3232_v35 = vpop.f32.mrf.mxu1  ;;  %v5632_v45 = vor.u32 %v6368_v8, %v5629_v15 }
 0x416   : > { %v3231_v48 = vadd.f32 %v3230_v60, %v3213_v16  ;;  %v6367_v60 = vld [vmem:[%s9147_s7 + $0x134] sm:$0xf0] }
 0x417   : > { %v5620_v43 = vor.u32 %v6367_v60, %v5619_v3  ;;  %4449 = vmatpush.bf16.msrb.mxu0 %v5632_v45  ;;  %v6407_v3 = vld [vmem:[%s9147_s7 + $0x274] sm:$0xf0]  ;;  %v5835_v60 = vld [vmem:[%s9147_s7 + $0x2e0] sm:$0xf] }
 0x418   : > { %v3239_v12 = vmax.f32 %v3231_v48, 0.0  ;;  %v5771_v45 = vld [vmem:[%s9147_s7 + $0x260] sm:$0xf]  ;;  %v5836_v11 = vor.u32 %v6421_v50, %v5835_v60 }
 0x419   : > { %v3199_v34 = vpop.f32.mrf.mxu2  ;;  %4333 = vmatpush.bf16.msrb.mxu1 %v5620_v43  ;;  %v5716_v43 = vor.u32 %v6391_v26, %v5715_v5  ;;  %v6401_v5 = vld [vmem:[%s9147_s7 + $0x244] sm:$0xf0]  ;;  %v5909_v26 = vld [vmem:[%s9147_s7 + $0x378] sm:$0xf0] }
 0x41a   : > { %3242 = vst [vmem:[#allocation8] sm:$0xff] %v3239_v12  ;;  %v3200_v27 = vadd.f32 %v3199_v34, %v3182_v39  ;;  %v6363_v12 = vld [vmem:[%s9147_s7 + $0x114] sm:$0xf0]  ;;  %v5539_v34 = vld [vmem:[%s9147_s7 + $0x90] sm:$0xf] }
 0x41b   : > { %v3214_v9 = vpop.f32.mrf.mxu3  ;;  %v5604_v36 = vor.u32 %v6363_v12, %v5603_v46  ;;  %4450 = vmatpush.bf16.msrb.mxu0 %v5624_v2  ;;  %v5605_v46 = vld [vmem:[%s9147_s7 + $0x118] sm:$0xf0] }
 0x41c   : > { %v3215_v7 = vadd.f32 %v3214_v9, %v3197_v41  ;;  %v5595_v41 = vld [vmem:[%s9147_s7 + $0x100] sm:$0xf] }
 0x41d   : > { %v3235_v59 = vpop.f32.mrf.mxu1  ;;  %4334 = vmatpush.bf16.msrb.mxu1 %v5612_v1  ;;  %v5596_v19 = vor.u32 %v6361_v56, %v5595_v41  ;;  %v6387_v41 = vld [vmem:[%s9147_s7 + $0x1d4] sm:$0xf0] }
 0x41e   : > { %v3233_v37 = vadd.f32 %v3232_v35, %v3215_v7  ;;  %v6333_v35 = vld [vmem:[%s9147_s7 + $0x24] sm:$0xf0]  ;;  %v5540_v7 = vor.u32 %v6347_v33, %v5539_v34  ;;  %v5608_v33 = vor.u32 %v6362_v6, %v5605_v46 }
 0x41f   : > { %v5484_v44 = vor.u32 %v6333_v35, %v5483_v24  ;;  %v6405_v24 = vld [vmem:[%s9147_s7 + $0x264] sm:$0xf0]  ;;  %v5827_v35 = vld [vmem:[%s9147_s7 + $0x2d0] sm:$0xf] }
 0x420   : > { %v3240_v18 = vmax.f32 %v3233_v37, 0.0  ;;  %v6345_v37 = vld [vmem:[%s9147_s7 + $0x84] sm:$0xf0]  ;;  %4322 = vmatpush.bf16.msrb.mxu3 %v5540_v7  ;;  %v5772_v34 = vor.u32 %v6405_v24, %v5771_v45  ;;  %v6434_v24 = vld [vmem:[%s9147_s7 + $0x354] sm:$0xf] }
 0x421   : > { %v3201_v47 = vpop.f32.mrf.mxu2  ;;  %4308 = vmatpush.bf16.msra.mxu2 %v5484_v44  ;;  %4335 = vmatpush.bf16.msrb.mxu1 %v5604_v36  ;;  %v6419_v44 = vld [vmem:[%s9147_s7 + $0x2d4] sm:$0xf0]  ;;  %v6381_v6 = vld [vmem:[%s9147_s7 + $0x1a4] sm:$0xf0] }
 0x422   : > { %3243 = vst [vmem:[#allocation8 + $0x8] sm:$0xff] %v3240_v18  ;;  %v5468_v18 = vor.u32 %v6329_v23, %v5467_v29  ;;  %v5779_v47 = vld [vmem:[%s9147_s7 + $0x270] sm:$0xf]  ;;  %v5828_v36 = vor.u32 %v6419_v44, %v5827_v35  ;;  %v5597_v23 = vld [vmem:[%s9147_s7 + $0x108] sm:$0xf0] }
 0x423   : > { %v3217_v38 = vpop.f32.mrf.mxu3  ;;  %v5780_v15 = vor.u32 %v6407_v3, %v5779_v47  ;;  %v5811_v47 = vld [vmem:[%s9147_s7 + $0x2b0] sm:$0xf]  ;;  %v6415_v3 = vld [vmem:[%s9147_s7 + $0x2b4] sm:$0xf0]  ;;  %v5893_v35 = vld [vmem:[%s9147_s7 + $0x358] sm:$0xf0] }
 0x424   : > { %v3218_v30 = vadd.f32 %v3217_v38, %v3200_v27  ;;  %v5532_v27 = vor.u32 %v6345_v37, %v5531_v28  ;;  %v5613_v38 = vld [vmem:[%s9147_s7 + $0x128] sm:$0xf0]  ;;  %v6385_v37 = vld [vmem:[%s9147_s7 + $0x1c4] sm:$0xf0]  ;;  %v5675_v44 = vld [vmem:[%s9147_s7 + $0x1a0] sm:$0xf]  ;;  %v5896_v20 = vor.u32 %v6434_v24, %v5893_v35 }
 0x425   : > { %v3237_v16 = vpop.f32.mrf.mxu1  ;;  %4309 = vmatpush.bf16.msra.mxu2 %v5476_v57  ;;  %4336 = vmatpush.bf16.msrb.mxu1 %v5596_v19  ;;  %v5616_v32 = vor.u32 %v6364_v22, %v5613_v38  ;;  %v5756_v38 = vor.u32 %v6401_v5, %v5755_v61  ;;  %v5877_v61 = vld [vmem:[%s9147_s7 + $0x338] sm:$0xf0] }
 0x426   : > { %v3236_v48 = vadd.f32 %v3235_v59, %v3218_v30  ;;  %v6389_v30 = vld [vmem:[%s9147_s7 + $0x1e4] sm:$0xf0]  ;;  %4323 = vmatpush.bf16.msrb.mxu3 %v5532_v27  ;;  %v5683_v27 = vld [vmem:[%s9147_s7 + $0x1b0] sm:$0xf] }
 0x427   : > { %4451 = vmatpush.bf16.msrb.mxu0 %v5616_v32  ;;  %v5812_v32 = vor.u32 %v6415_v3, %v5811_v47  ;;  %v6393_v47 = vld [vmem:[%s9147_s7 + $0x204] sm:$0xf0] }
 0x428   : > { %v3241_v25 = vmax.f32 %v3236_v48, 0.0  ;;  %v5708_v48 = vor.u32 %v6389_v30, %v5707_v31  ;;  %v5747_v31 = vld [vmem:[%s9147_s7 + $0x230] sm:$0xf]  ;;  %v6399_v30 = vld [vmem:[%s9147_s7 + $0x234] sm:$0xf0] }
 0x429   : > { %v3245_v55 = vld [vmem:[#allocation8] ss:$2 sm:$0xff]  ;;  %v3249_v63 = vld [vmem:[#allocation8 + $0x1] ss:$2 sm:$0xff]  ;;  %4368 = vmatpush.bf16.msra.mxu1 %v5844_v62  ;;  %4310 = vmatpush.bf16.msra.mxu2 %v5468_v18 }
 0x42a   : > { %v8132_v9 = vmax.f32 %v3245_v55, %v3249_v63  ;;  %3244 = vst [vmem:[#allocation8 + $0x10] sm:$0xff] %v3241_v25  ;;  %4355 = vmatpush.bf16.msra.mxu3 %v5780_v15  ;;  %v5699_v25 = vld [vmem:[%s9147_s7 + $0x1d0] sm:$0xf]  ;;  %v6403_v63 = vld [vmem:[%s9147_s7 + $0x254] sm:$0xf0] }
 0x42b   : > { %v3219_v13 = vpop.f32.mrf.mxu3  ;;  %v5763_v55 = vld [vmem:[%s9147_s7 + $0x250] sm:$0xf]  ;;  %v5700_v7 = vor.u32 %v6387_v41, %v5699_v25  ;;  %4452 = vmatpush.bf16.msrb.mxu0 %v5608_v33  ;;  %v6438_v62 = vld [vmem:[%s9147_s7 + $0x374] sm:$0xf]  ;;  %v5901_v15 = vld [vmem:[%s9147_s7 + $0x368] sm:$0xf0]  ;;  %v5676_v41 = vor.u32 %v6381_v6, %v5675_v44 }
 0x42c   : > { %v3255_v59 = vrot.slane %v8132_v9, 3  ;;  %v6360_v13 = vld [vmem:[%s9147_s7 + $0x104] sm:$0xf]  ;;  %v5764_v29 = vor.u32 %v6403_v63, %v5763_v55  ;;  %v5912_v2 = vor.u32 %v6438_v62, %v5909_v26  ;;  %v6411_v25 = vld [vmem:[%s9147_s7 + $0x294] sm:$0xf0] }
 0x42d   : > { %4342 = vmatpush.bf16.msrb.mxu2 %v5716_v43  ;;  %4369 = vmatpush.bf16.msra.mxu1 %v5836_v11  ;;  %v5600_v19 = vor.u32 %v6360_v13, %v5597_v23  ;;  %v6383_v43 = vld [vmem:[%s9147_s7 + $0x1b4] sm:$0xf0]  ;;  %v5803_v11 = vld [vmem:[%s9147_s7 + $0x2a0] sm:$0xf]  ;;  %v5885_v33 = vld [vmem:[%s9147_s7 + $0x348] sm:$0xf0] }
 0x42e   : > { %v3257_v39 = vmax.f32 %v8132_v9, %v3255_v59  ;;  %4356 = vmatpush.bf16.msra.mxu3 %v5772_v34  ;;  %v5667_v55 = vld [vmem:[%s9147_s7 + $0x190] sm:$0xf] }
 0x42f   : > { %4453 = vmatpush.bf16.msrb.mxu0 %v5600_v19  ;;  %v6035_v6 = vld [vmem:[%s9147_s7 + $0x470] sm:$0xf] }
 0x430   : > { %v3258_v8 = vpack.c.bf16 %v3257_v39, %v3257_v39 }
 0x431   : > { %v3247_v14 = vld [vmem:[#allocation8 + $0x10] ss:$2 sm:$0xf]  ;;  %v3251_v40 = vld [vmem:[#allocation8 + $0x11] ss:$2 sm:$0xf]  ;;  %4343 = vmatpush.bf16.msrb.mxu2 %v5708_v48  ;;  %4370 = vmatpush.bf16.msra.mxu1 %v5828_v36  ;;  %v5748_v48 = vor.u32 %v6399_v30, %v5747_v31 }
 0x432   : > { %v3260_v16 = vshrl.u32 %v3258_v8, 16  ;;  %v3263_v21 = vshll.u32 %v3258_v8, 16  ;;  %v3253_v1 = vmax.f32 %v3247_v14, %v3251_v40  ;;  %4357 = vmatpush.bf16.msra.mxu3 %v5764_v29  ;;  %v6436_v8 = vld [vmem:[%s9147_s7 + $0x364] sm:$0xf]  ;;  %v3291_v40 = vld [vmem:[#allocation9 + $0x4] sm:$0x3] }
 0x433   : > { %4498 = vmatpush.bf16.msra.mxu0 %v5912_v2  ;;  %v5904_v45 = vor.u32 %v6436_v8, %v5901_v15  ;;  %v6432_v36 = vld [vmem:[%s9147_s7 + $0x344] sm:$0xf]  ;;  %v5723_v2 = vld [vmem:[%s9147_s7 + $0x200] sm:$0xf] }
 0x434   : > { %v3262_v12 = vrot.slane %v3260_v16, 5  ;;  %v3265_v53 = vrot.slane %v3263_v21, 6  ;;  %v3275_v42 = vrot.slane %v3253_v1, 3  ;;  %v6413_v16 = vld [vmem:[%s9147_s7 + $0x2a4] sm:$0xf0]  ;;  %v5684_v1 = vor.u32 %v6383_v43, %v5683_v27 }
 0x435   : > { %4344 = vmatpush.bf16.msrb.mxu2 %v5700_v7  ;;  %4371 = vmatpush.bf16.msra.mxu1 %v5820_v4  ;;  %v5804_v46 = vor.u32 %v6413_v16, %v5803_v11  ;;  %v5888_v13 = vor.u32 %v6432_v36, %v5885_v33  ;;  %v5787_v7 = vld [vmem:[%s9147_s7 + $0x280] sm:$0xf]  ;;  %v5724_v30 = vor.u32 %v6393_v47, %v5723_v2  ;;  %v6428_v16 = vld [vmem:[%s9147_s7 + $0x324] sm:$0xf]  ;;  %v5869_v21 = vld [vmem:[%s9147_s7 + $0x328] sm:$0xf0] }
 0x436   : > { %v3266_v56 = vor.u32 %v3265_v53, %v3262_v12  ;;  %v3277_v57 = vmax.f32 %v8132_v9, %v3275_v42  ;;  %v5691_v9 = vld [vmem:[%s9147_s7 + $0x1c0] sm:$0xf]  ;;  %4358 = vmatpush.bf16.msra.mxu3 %v5756_v38  ;;  %v6397_v53 = vld [vmem:[%s9147_s7 + $0x224] sm:$0xf0]  ;;  %v5795_v42 = vld [vmem:[%s9147_s7 + $0x290] sm:$0xf]  ;;  %v5872_v24 = vor.u32 %v6428_v16, %v5869_v21 }
 0x437   : > { %v5692_v60 = vor.u32 %v6385_v37, %v5691_v9  ;;  %4499 = vmatpush.bf16.msra.mxu0 %v5904_v45  ;;  %v5739_v12 = vld [vmem:[%s9147_s7 + $0x220] sm:$0xf]  ;;  %v5796_v49 = vor.u32 %v6411_v25, %v5795_v42  ;;  %v6409_v9 = vld [vmem:[%s9147_s7 + $0x284] sm:$0xf0]  ;;  %v6430_v37 = vld [vmem:[%s9147_s7 + $0x334] sm:$0xf] }
 0x438   : > { %v3272_v28 = vsel %vm8210_vm9, %v3266_v56, %v3271_v52  ;;  %v3278_v59 = vpack.c.bf16 %v3277_v57, %v3277_v57  ;;  %v5740_v63 = vor.u32 %v6397_v53, %v5739_v12  ;;  %v6379_v56 = vld [vmem:[%s9147_s7 + $0x194] sm:$0xf0]  ;;  %v5731_v57 = vld [vmem:[%s9147_s7 + $0x210] sm:$0xf]  ;;  %v5880_v3 = vor.u32 %v6430_v37, %v5877_v61  ;;  %v6424_v53 = vld [vmem:[%s9147_s7 + $0x304] sm:$0xf] }
 0x439   : > { %3273 = vst [vmem:[#allocation9] sm:$0xc] %v3272_v28  ;;  %4345 = vmatpush.bf16.msrb.mxu2 %v5692_v60  ;;  %4372 = vmatpush.bf16.msra.mxu1 %v5812_v32  ;;  %v5659_v28 = vld [vmem:[%s9147_s7 + $0x180] sm:$0xf]  ;;  %v5668_v19 = vor.u32 %v6379_v56, %v5667_v55  ;;  %v5732_v4 = vor.u32 %v6395_v51, %v5731_v57  ;;  %v8390_v12 = vld [vmem:[%s9147_s7 + $0x370] sm:$0xf] }
 0x43a   : > { %v3280_v39 = vshrl.u32 %v3278_v59, 16  ;;  %v3283_v18 = vshll.u32 %v3278_v59, 16  ;;  %4359 = vmatpush.bf16.msra.mxu3 %v5748_v48  ;;  %v6377_v59 = vld [vmem:[%s9147_s7 + $0x184] sm:$0xf0]  ;;  %v5861_v48 = vld [vmem:[%s9147_s7 + $0x318] sm:$0xf0] }
 0x43b   : > { %4500 = vmatpush.bf16.msra.mxu0 %v5896_v20  ;;  %v5853_v20 = vld [vmem:[%s9147_s7 + $0x308] sm:$0xf0]  ;;  %v6439_v42 = vld [vmem:[%s9147_s7 + $0x374] sm:$0xf0]  ;;  %v6027_v55 = vld [vmem:[%s9147_s7 + $0x460] sm:$0xf] }
 0x43c   : > { %v3282_v50 = vrot.slane %v3280_v39, 6  ;;  %v3285_v22 = vrot.slane %v3283_v18, 7  ;;  %v5788_v18 = vor.u32 %v6409_v9, %v5787_v7  ;;  %v6455_v25 = vld [vmem:[%s9147_s7 + $0x3f4] sm:$0xf0]  ;;  %v5856_v36 = vor.u32 %v6424_v53, %v5853_v20  ;;  %v6469_v9 = vld [vmem:[%s9147_s7 + $0x464] sm:$0xf0] }
 0x43d   : > { %4346 = vmatpush.bf16.msrb.mxu2 %v5684_v1  ;;  %4373 = vmatpush.bf16.msra.mxu1 %v5804_v46  ;;  %v6471_v46 = vld [vmem:[%s9147_s7 + $0x474] sm:$0xf0]  ;;  %v5963_v47 = vld [vmem:[%s9147_s7 + $0x3e0] sm:$0xf] }
 0x43e   : > { %v3286_v14 = vor.u32 %v3285_v22, %v3282_v50  ;;  %4360 = vmatpush.bf16.msra.mxu3 %v5740_v63  ;;  %v5660_v22 = vor.u32 %v6377_v59, %v5659_v28  ;;  %v6451_v53 = vld [vmem:[%s9147_s7 + $0x3d4] sm:$0xf0]  ;;  %v6011_v20 = vld [vmem:[%s9147_s7 + $0x440] sm:$0xf] }
 0x43f   : > { %4501 = vmatpush.bf16.msra.mxu0 %v5888_v13 }
 0x440   : > { %v3287_v52 = vrot.slane %v3286_v14, 4  ;;  %v3314_v29 = vld [vmem:[#allocation9] sm:$0xe] }
 0x441   : > { %v3324_v23 = vld [vmem:[#allocation9] sm:$0xc]  ;;  %4347 = vmatpush.bf16.msrb.mxu2 %v5676_v41  ;;  %v5461_v5 = vrot.slane %v3314_v29, 9  ;;  %4374 = vmatpush.bf16.msra.mxu1 %v5796_v49  ;;  %v6036_v41 = vor.u32 %v6471_v46, %v6035_v6  ;;  %v5908_v29 = vor.u32 %v6439_v42, %v8390_v12  ;;  %v5955_v12 = vld [vmem:[%s9147_s7 + $0x3d0] sm:$0xf] }
 0x442   : > { %v3292_v34 = vsel %vm8291_vm10, %v3287_v52, %v3291_v40  ;;  %v3294_v62 = vld [vmem:[#allocation9] sm:$0xf]  ;;  %v5462_v26 = vrot.slane %v3324_v23, 10  ;;  %4361 = vmatpush.bf16.msra.mxu3 %v5732_v4  ;;  %v6426_v52 = vld [vmem:[%s9147_s7 + $0x314] sm:$0xf] }
 0x443   : > { %3293 = vst [vmem:[#allocation9 + $0x4] sm:$0x3] %v3292_v34  ;;  %v3296_v39 = vld [vmem:[#allocation9] sm:$0xf]  ;;  %4502 = vmatpush.bf16.msra.mxu0 %v5880_v3  ;;  %v5864_v44 = vor.u32 %v6426_v52, %v5861_v48  ;;  %v5971_v34 = vld [vmem:[%s9147_s7 + $0x3f0] sm:$0xf] }
 0x444   : > { %3295 = vst [vmem:[#allocation10] sm:$0xf] %v3294_v62  ;;  %v3299_v60 = vshrl.u32 %v3296_v39, 16  ;;  %v3302_v27 = vshll.u32 %v3296_v39, 16  ;;  %v3334_v63 = vld [vmem:[#allocation9] sm:$0xc]  ;;  %v5972_v23 = vor.u32 %v6455_v25, %v5971_v34  ;;  %v5956_v25 = vor.u32 %v6451_v53, %v5955_v12 }
 0x445   : > { %4348 = vmatpush.bf16.msrb.mxu2 %v5668_v19  ;;  %4375 = vmatpush.bf16.msra.mxu1 %v5788_v18  ;;  %v3337_v51 = vshrl.u32 %v3334_v63, 16  ;;  %v3340_v49 = vshll.u32 %v3334_v63, 16  ;;  %v3356_v7 = vld [vmem:[#allocation9] sm:$0x8]  ;;  %v5899_v62 = vld [vmem:[%s9147_s7 + $0x360] sm:$0xf]  ;;  %v6012_v63 = vor.u32 %v6465_v58, %v6011_v20 }
 0x446   : > { %v3301_v32 = vrot.slane %v3299_v60, 4  ;;  %v3304_v31 = vrot.slane %v3302_v27, 5  ;;  %4362 = vmatpush.bf16.msra.mxu3 %v5724_v30  ;;  %v5463_v19 = vrot.slane %v3356_v7, 11  ;;  %v6437_v4 = vld [vmem:[%s9147_s7 + $0x364] sm:$0xf0] }
 0x447   : > { %4503 = vmatpush.bf16.msra.mxu0 %v5872_v24  ;;  %v6453_v30 = vld [vmem:[%s9147_s7 + $0x3e4] sm:$0xf0]  ;;  %v5891_v52 = vld [vmem:[%s9147_s7 + $0x350] sm:$0xf]  ;;  %v5915_v53 = vld [vmem:[%s9147_s7 + $0x380] sm:$0xf] }
 0x448   : > { %v3305_v11 = vor.u32 %v3304_v31, %v3301_v32  ;;  %v5892_v34 = vor.u32 %v6435_v54, %v5891_v52  ;;  %v6457_v52 = vld [vmem:[%s9147_s7 + $0x404] sm:$0xf0]  ;;  %v6390_v54 = vld [vmem:[%s9147_s7 + $0x1f4] sm:$0xf] }
 0x449   : > { %4349 = vmatpush.bf16.msrb.mxu2 %v5660_v22  ;;  %v6425_v12 = vld [vmem:[%s9147_s7 + $0x304] sm:$0xf0]  ;;  %v6342_v58 = vld [vmem:[%s9147_s7 + $0x74] sm:$0xf] }
 0x44a   : > { %v3315_v43 = vld [vmem:[#allocation9 + $0x4] sm:$0x1]  ;;  %v3306_v35 = vrot.slane %v3305_v11, 4  ;;  %v6441_v20 = vld [vmem:[%s9147_s7 + $0x384] sm:$0xf0] }
 0x44b   : > { %v3325_v50 = vld [vmem:[#allocation9 + $0x4] sm:$0x3]  ;;  %v3320_v8 = vrot.slane %v3315_v43, 5  ;;  %4504 = vmatpush.bf16.msra.mxu0 %v5864_v44 }
 0x44c   : > { %v3297_v38 = vld [vmem:[#allocation9 + $0x4] sm:$0x1]  ;;  %v3330_v15 = vrot.slane %v3325_v50, 6  ;;  %v6028_v50 = vor.u32 %v6469_v9, %v6027_v55 }
 0x44d   : > { %v3308_v45 = vshll.u32 %v3297_v38, 16  ;;  %v3321_v14 = vsel %vm6787_vm0, %v5461_v5, %v3320_v8  ;;  %v3335_v56 = vld [vmem:[#allocation9 + $0x4] sm:$0x7]  ;;  %v3339_v5 = vrot.slane %v3337_v51, 6  ;;  %v3369_v38 = vld [vmem:[#allocation9 + $0x8] sm:$0x1] }
 0x44e   : > { %v3331_v40 = vsel %vm6840_vm6, %v5462_v26, %v3330_v15  ;;  %3323 = vst [vmem:[#allocation10 + $0x8] sm:$0xf] %v3321_v14  ;;  %v3346_v13 = vshrl.u32 %v3335_v56, 16  ;;  %v3349_v28 = vshll.u32 %v3335_v56, 16  ;;  %v3357_v59 = vld [vmem:[#allocation9 + $0x4] sm:$0x7] }
 0x44f   : > { %v3310_v1 = vrot.slane %v3308_v45, 5  ;;  %3333 = vst [vmem:[#allocation10 + $0xc] sm:$0xf] %v3331_v40  ;;  %4505 = vmatpush.bf16.msra.mxu0 %v5856_v36  ;;  %v3342_v26 = vrot.slane %v3340_v49, 7  ;;  %v3362_v60 = vrot.slane %v3357_v59, 7  ;;  %v3380_v24 = vshll.u32 %v3369_v38, 16 }
 0x450   : > { %v3348_v39 = vrot.slane %v3346_v13, 6  ;;  %v3351_v3 = vrot.slane %v3349_v28, 7  ;;  %v3366_v27 = vld [vmem:[#allocation9 + $0x4] sm:$0xf]  ;;  %v6467_v14 = vld [vmem:[%s9147_s7 + $0x454] sm:$0xf0] }
 0x451   : > { %v3311_v0 = vsel %vm6796_vm1, %v3306_v35, %v3310_v1  ;;  %v3368_v43 = vld [vmem:[#allocation9 + $0x4] sm:$0xf]  ;;  %v3343_v22 = vor.u32 %v3342_v26, %v3339_v5  ;;  %3367 = vst [vmem:[#allocation10 + $0x18] sm:$0xf] %v3366_v27  ;;  %v3363_v11 = vsel %vm6956_vm2, %v5463_v19, %v3362_v60  ;;  %v5900_v35 = vor.u32 %v6437_v4, %v5899_v62  ;;  %v5883_v36 = vld [vmem:[%s9147_s7 + $0x340] sm:$0xf] }
 0x452   : > { %3313 = vst [vmem:[#allocation10 + $0x4] sm:$0xf] %v3311_v0  ;;  %v3371_v8 = vshrl.u32 %v3368_v43, 16  ;;  %v3374_v15 = vshll.u32 %v3368_v43, 16  ;;  %v6019_v45 = vld [vmem:[%s9147_s7 + $0x450] sm:$0xf]  ;;  %v3352_v40 = vor.u32 %v3351_v3, %v3348_v39  ;;  %v5964_v0 = vor.u32 %v6453_v30, %v5963_v47 }
 0x453   : > { %v3344_v16 = vrot.slane %v3343_v22, 4  ;;  %3365 = vst [vmem:[#allocation10 + $0x14] sm:$0xf] %v3363_v11  ;;  %v3382_v6 = vrot.slane %v3380_v24, 5  ;;  %v6020_v46 = vor.u32 %v6467_v14, %v6019_v45  ;;  %v5947_v56 = vld [vmem:[%s9147_s7 + $0x3c0] sm:$0xf] }
 0x454   : > { %v3373_v21 = vrot.slane %v3371_v8, 4  ;;  %v3376_v1 = vrot.slane %v3374_v15, 5  ;;  %v6003_v51 = vld [vmem:[%s9147_s7 + $0x430] sm:$0xf]  ;;  %v3387_v62 = vld [vmem:[#allocation9 + $0x8] sm:$0x1] }
 0x455   : > { %v3353_v48 = vsel %vm7011_vm14, %v3344_v16, %v3352_v40  ;;  %v5875_v49 = vld [vmem:[%s9147_s7 + $0x330] sm:$0xf]  ;;  %v6004_v4 = vor.u32 %v6463_v17, %v6003_v51  ;;  %v3392_v26 = vrot.slane %v3387_v62, 5  ;;  %v5867_v60 = vld [vmem:[%s9147_s7 + $0x320] sm:$0xf] }
 0x456   : > { %v8407_v33 = vld [vmem:[#allocation10 + $0x8] sm:$0xff]  ;;  %v3377_v44 = vor.u32 %v3376_v1, %v3373_v21  ;;  %3355 = vst [vmem:[#allocation10 + $0x10] sm:$0xf] %v3353_v48  ;;  %v5939_v9 = vld [vmem:[%s9147_s7 + $0x3b0] sm:$0xf] }
 0x457   : > { %v3558_v57 = vunpack.c.l.b16 %v8407_v33  ;;  %v3559_v59 = vunpack.c.h.b16 %v8407_v33  ;;  %v6461_v33 = vld [vmem:[%s9147_s7 + $0x424] sm:$0xf0]  ;;  %v5931_v8 = vld [vmem:[%s9147_s7 + $0x3a0] sm:$0xf]  ;;  %v5987_v45 = vld [vmem:[%s9147_s7 + $0x410] sm:$0xf] }
 0x458   : > { %v3378_v42 = vrot.slane %v3377_v44, 4  ;;  %v6429_v27 = vld [vmem:[%s9147_s7 + $0x324] sm:$0xf0]  ;;  %v6459_v14 = vld [vmem:[%s9147_s7 + $0x414] sm:$0xf0] }
 0x459   : > { %v3567_v37 = vpack.c.b16 %v3558_v57, %v3558_v57  ;;  %v3396_v61 = vld [vmem:[#allocation10] sm:$0xff]  ;;  %v6449_v57 = vld [vmem:[%s9147_s7 + $0x3c4] sm:$0xf0]  ;;  %v8516_v22 = vpack.c.b16 %v3559_v59, %v3559_v59  ;;  %v5868_v40 = vor.u32 %v6429_v27, %v5867_v60  ;;  %v5859_v16 = vld [vmem:[%s9147_s7 + $0x310] sm:$0xf] }
 0x45a   : > { %v3556_v18 = vunpack.c.l.b16 %v3396_v61  ;;  %v3557_v2 = vunpack.c.h.b16 %v3396_v61  ;;  %v3383_v55 = vsel %vm6796_vm1, %v3378_v42, %v3382_v6  ;;  %v5948_v7 = vor.u32 %v6449_v57, %v5947_v56  ;;  %v3386_v61 = vld [vmem:[#allocation9 + $0x4] sm:$0xe]  ;;  %v6445_v15 = vld [vmem:[%s9147_s7 + $0x3a4] sm:$0xf0]  ;;  %v6427_v21 = vld [vmem:[%s9147_s7 + $0x314] sm:$0xf0] }
 0x45b   : > { %4337 = vmatmul.bf16.vlgmr.msrb.gmra.mxu1 %v3567_v37  ;;  %4454 = vmatmul.bf16.vlgmr.msrb.gmra.mxu0 %v3567_v37  ;;  %3385 = vst [vmem:[#allocation10 + $0x1c] sm:$0xf] %v3383_v55  ;;  %v6447_v37 = vld [vmem:[%s9147_s7 + $0x3b4] sm:$0xf0]  ;;  %v5464_v5 = vrot.slane %v3386_v61, 9  ;;  %v5932_v11 = vor.u32 %v6445_v15, %v5931_v8  ;;  %v5860_v44 = vor.u32 %v6427_v21, %v5859_v16 }
 0x45c   : > { %4407 = vmatpush.bf16.msrb.mxu1 %v6036_v41  ;;  %v8426_v32 = vpack.c.b16 %v3556_v18, %v3556_v18  ;;  %v8428_v31 = vpack.c.b16 %v3557_v2, %v3557_v2  ;;  %v6433_v41 = vld [vmem:[%s9147_s7 + $0x344] sm:$0xf0]  ;;  %v5995_v18 = vld [vmem:[%s9147_s7 + $0x420] sm:$0xf]  ;;  %v5940_v3 = vor.u32 %v6447_v37, %v5939_v9  ;;  %v5923_v1 = vld [vmem:[%s9147_s7 + $0x390] sm:$0xf]  ;;  %v5916_v56 = vor.u32 %v6441_v20, %v5915_v53 }
 0x45d   : > { %v5884_v13 = vor.u32 %v6433_v41, %v5883_v36  ;;  %v3393_v43 = vsel %vm6787_vm0, %v5464_v5, %v3392_v26  ;;  %v5996_v10 = vor.u32 %v6461_v33, %v5995_v18  ;;  %v6443_v24 = vld [vmem:[%s9147_s7 + $0x394] sm:$0xf0]  ;;  %v5717_v48 = vld [vmem:[%s9147_s7 + $0x1f8] sm:$0xf0]  ;;  %v6358_v36 = vld [vmem:[%s9147_s7 + $0xf4] sm:$0xf] }
 0x45e   : > { %4311 = vmatmul.bf16.vlgmr.msra.gmra.mxu2 %v8426_v32  ;;  %4324 = vmatmul.bf16.vlgmr.msrb.gmra.mxu3 %v8428_v31  ;;  %3395 = vst [vmem:[#allocation10 + $0x20] sm:$0xf] %v3393_v43  ;;  %v5924_v6 = vor.u32 %v6443_v24, %v5923_v1  ;;  %v5589_v41 = vld [vmem:[%s9147_s7 + $0xf8] sm:$0xf0]  ;;  %v5720_v55 = vor.u32 %v6390_v54, %v5717_v48  ;;  %v6388_v51 = vld [vmem:[%s9147_s7 + $0x1e4] sm:$0xf]  ;;  %vm9208_vm0 = vmmov %vm9205_vm7 }
 0x45f   : > { %4381 = vmatpush.bf16.msra.mxu2 %v5908_v29  ;;  %4394 = vmatpush.bf16.msrb.mxu3 %v5972_v23  ;;  %v3398_v29 = vld [vmem:[#allocation10 + $0x10] sm:$0xff]  ;;  %v6431_v23 = vld [vmem:[%s9147_s7 + $0x334] sm:$0xf0]  ;;  %v6356_v9 = vld [vmem:[%s9147_s7 + $0xe4] sm:$0xf] }
 0x460   : > { %4408 = vmatpush.bf16.msrb.mxu1 %v6028_v50  ;;  %v3561_v28 = vunpack.c.h.b16 %v3398_v29  ;;  %v3560_v19 = vunpack.c.l.b16 %v3398_v29  ;;  %v5876_v47 = vor.u32 %v6431_v23, %v5875_v49  ;;  %v5709_v17 = vld [vmem:[%s9147_s7 + $0x1e8] sm:$0xf0]  ;;  %v6386_v37 = vld [vmem:[%s9147_s7 + $0x1d4] sm:$0xf]  ;;  %v5701_v61 = vld [vmem:[%s9147_s7 + $0x1d8] sm:$0xf0] }
 0x461   : > { %v5517_v23 = vld [vmem:[%s9147_s7 + $0x68] sm:$0xf0]  ;;  %v5712_v59 = vor.u32 %v6388_v51, %v5709_v17  ;;  %v6338_v5 = vld [vmem:[%s9147_s7 + $0x54] sm:$0xf]  ;;  %v5509_v18 = vld [vmem:[%s9147_s7 + $0x58] sm:$0xf0] }
 0x462   : > { %v8496_v39 = vpack.c.b16 %v3561_v28, %v3561_v28  ;;  %v8504_v2 = vld [vmem:[#allocation10 + $0x18] sm:$0xff]  ;;  %v8518_v38 = vpack.c.b16 %v3560_v19, %v3560_v19  ;;  %v5581_v28 = vld [vmem:[%s9147_s7 + $0xe8] sm:$0xf0]  ;;  %v5512_v27 = vor.u32 %v6338_v5, %v5509_v18  ;;  %v6352_v15 = vld [vmem:[%s9147_s7 + $0xc4] sm:$0xf] }
 0x463   : > { %4382 = vmatpush.bf16.msra.mxu2 %v5900_v35  ;;  %4395 = vmatpush.bf16.msrb.mxu3 %v5964_v0  ;;  %v3562_v50 = vunpack.c.l.b16 %v8504_v2  ;;  %v5988_v35 = vor.u32 %v6459_v14, %v5987_v45  ;;  %v5979_v0 = vld [vmem:[%s9147_s7 + $0x400] sm:$0xf]  ;;  %v3563_v29 = vunpack.c.h.b16 %v8504_v2  ;;  %v6354_v33 = vld [vmem:[%s9147_s7 + $0xd4] sm:$0xf]  ;;  %v5573_v2 = vld [vmem:[%s9147_s7 + $0xd8] sm:$0xf0] }
 0x464   : > { %4409 = vmatpush.bf16.msrb.mxu1 %v6020_v46  ;;  %v5851_v46 = vld [vmem:[%s9147_s7 + $0x300] sm:$0xf]  ;;  %v5693_v60 = vld [vmem:[%s9147_s7 + $0x1c8] sm:$0xf0]  ;;  %v5576_v43 = vor.u32 %v6354_v33, %v5573_v2  ;;  %v6382_v45 = vld [vmem:[%s9147_s7 + $0x1b4] sm:$0xf] }
 0x465   : > { %v8526_v30 = vpack.c.b16 %v3562_v50, %v3562_v50  ;;  %v3400_v42 = vld [vmem:[#allocation10 + $0x20] sm:$0xf]  ;;  %v8616_v26 = vpack.c.b16 %v3563_v29, %v3563_v29  ;;  %v6336_v50 = vld [vmem:[%s9147_s7 + $0x44] sm:$0xf]  ;;  %v5501_v8 = vld [vmem:[%s9147_s7 + $0x48] sm:$0xf0] }
 0x466   : > { %v3564_v57 = vunpack.c.l.b16 %v3400_v42  ;;  %v5685_v14 = vld [vmem:[%s9147_s7 + $0x1b8] sm:$0xf0]  ;;  %v6334_v16 = vld [vmem:[%s9147_s7 + $0x34] sm:$0xf]  ;;  %v5469_v29 = vld [vmem:[%s9147_s7 + $0x8] sm:$0xf0] }
 0x467   : > { %4383 = vmatpush.bf16.msra.mxu2 %v5892_v34  ;;  %4396 = vmatpush.bf16.msrb.mxu3 %v5956_v25  ;;  %v5980_v34 = vor.u32 %v6457_v52, %v5979_v0  ;;  %v5525_v25 = vld [vmem:[%s9147_s7 + $0x78] sm:$0xf0]  ;;  %v6350_v1 = vld [vmem:[%s9147_s7 + $0xb4] sm:$0xf]  ;;  %v6380_v0 = vld [vmem:[%s9147_s7 + $0x1a4] sm:$0xf] }
 0x468   : > { %4410 = vmatpush.bf16.msrb.mxu1 %v6012_v63  ;;  %v5852_v63 = vor.u32 %v6425_v12, %v5851_v46  ;;  %v5528_v49 = vor.u32 %v6342_v58, %v5525_v25  ;;  %v8604_v19 = vpack.c.b16 %v3564_v57, %v3564_v57  ;;  %v5493_v21 = vld [vmem:[%s9147_s7 + $0x38] sm:$0xf0]  ;;  %v5677_v52 = vld [vmem:[%s9147_s7 + $0x1a8] sm:$0xf0]  ;;  %v6348_v46 = vld [vmem:[%s9147_s7 + $0xa4] sm:$0xf] }
 0x469   : > { %v5557_v24 = vld [vmem:[%s9147_s7 + $0xb8] sm:$0xf0]  ;;  %v5496_v54 = vor.u32 %v6334_v16, %v5493_v21  ;;  %v5549_v12 = vld [vmem:[%s9147_s7 + $0xa8] sm:$0xf0]  ;;  %v5680_v53 = vor.u32 %v6380_v0, %v5677_v52  ;;  %v6378_v20 = vld [vmem:[%s9147_s7 + $0x194] sm:$0xf] }
 0x46a   : > { %v5560_v48 = vor.u32 %v6350_v1, %v5557_v24  ;;  %v5669_v58 = vld [vmem:[%s9147_s7 + $0x198] sm:$0xf0]  ;;  %v6330_v25 = vld [vmem:[%s9147_s7 + $0x14] sm:$0xf]  ;;  %v5661_v57 = vld [vmem:[%s9147_s7 + $0x188] sm:$0xf0] }
 0x46b   : > { %4384 = vmatpush.bf16.msra.mxu2 %v5884_v13  ;;  %4397 = vmatpush.bf16.msrb.mxu3 %v5948_v7  ;;  %v5592_v13 = vor.u32 %v6358_v36, %v5589_v41  ;;  %v6340_v7 = vld [vmem:[%s9147_s7 + $0x64] sm:$0xf]  ;;  %v5477_v36 = vld [vmem:[%s9147_s7 + $0x18] sm:$0xf0]  ;;  %v6346_v41 = vld [vmem:[%s9147_s7 + $0x94] sm:$0xf] }
 0x46c   : > { %4376 = vmatmul.bf16.vlgmr.msra.gmra.mxu1 %v8496_v39  ;;  %4506 = vmatmul.bf16.vlgmr.msra.gmra.mxu0 %v8526_v30  ;;  %v5520_v62 = vor.u32 %v6340_v7, %v5517_v23  ;;  %v5480_v51 = vor.u32 %v6330_v25, %v5477_v36  ;;  %v6328_v7 = vld [vmem:[%s9147_s7 + $0x4] sm:$0xf]  ;;  %v5821_v52 = vld [vmem:[%s9147_s7 + $0x2c8] sm:$0xf0]  ;;  %vm9209_vm1 = vmmov %vm9208_vm0 }
 0x46d   : > { %4411 = vmatpush.bf16.msrb.mxu1 %v6004_v4  ;;  %v5584_v4 = vor.u32 %v6356_v9, %v5581_v28  ;;  %v6344_v23 = vld [vmem:[%s9147_s7 + $0x84] sm:$0xf]  ;;  %v5533_v9 = vld [vmem:[%s9147_s7 + $0x88] sm:$0xf0]  ;;  %v5472_v5 = vor.u32 %v6328_v7, %v5469_v29  ;;  %v6394_v29 = vld [vmem:[%s9147_s7 + $0x214] sm:$0xf] }
 0x46e   : > { %4350 = vmatmul.bf16.vlgmr.msrb.gmra.mxu2 %v8516_v22  ;;  %4363 = vmatmul.bf16.vlgmr.msra.gmra.mxu3 %v8518_v38  ;;  %v5536_v18 = vor.u32 %v6344_v23, %v5533_v9  ;;  %v6452_v2 = vld [vmem:[%s9147_s7 + $0x3e4] sm:$0xf]  ;;  %v5933_v36 = vld [vmem:[%s9147_s7 + $0x3a8] sm:$0xf0]  ;;  %v5733_v23 = vld [vmem:[%s9147_s7 + $0x218] sm:$0xf0] }
 0x46f   : > { %4385 = vmatpush.bf16.msra.mxu2 %v5876_v47  ;;  %4398 = vmatpush.bf16.msrb.mxu3 %v5940_v3  ;;  %v5704_v47 = vor.u32 %v6386_v37, %v5701_v61  ;;  %v6384_v3 = vld [vmem:[%s9147_s7 + $0x1c4] sm:$0xf]  ;;  %v5781_v37 = vld [vmem:[%s9147_s7 + $0x278] sm:$0xf0]  ;;  %v6410_v9 = vld [vmem:[%s9147_s7 + $0x294] sm:$0xf] }
 0x470   : > { %v6448_v1 = vld [vmem:[%s9147_s7 + $0x3c4] sm:$0xf]  ;;  %vm9210_vm6 = vmmov %vm9208_vm0 }
 0x471   : > { %4412 = vmatpush.bf16.msrb.mxu1 %v5996_v10  ;;  %v5565_v10 = vld [vmem:[%s9147_s7 + $0xc8] sm:$0xf0]  ;;  %v6400_v24 = vld [vmem:[%s9147_s7 + $0x244] sm:$0xf]  ;;  %vm9211_vm2 = vmmov %vm9208_vm0 }
 0x472   : > { %v6416_v0 = vld [vmem:[%s9147_s7 + $0x2c4] sm:$0xf] }
 0x473   : > { %4386 = vmatpush.bf16.msra.mxu2 %v5868_v40  ;;  %4399 = vmatpush.bf16.msrb.mxu3 %v5932_v11  ;;  %v5504_v40 = vor.u32 %v6336_v50, %v5501_v8  ;;  %v5568_v11 = vor.u32 %v6352_v15, %v5565_v10  ;;  %v5837_v50 = vld [vmem:[%s9147_s7 + $0x2e8] sm:$0xf0]  ;;  %v6450_v10 = vld [vmem:[%s9147_s7 + $0x3d4] sm:$0xf]  ;;  %v6444_v25 = vld [vmem:[%s9147_s7 + $0x3a4] sm:$0xf] }
 0x475   : > { %4413 = vmatpush.bf16.msrb.mxu1 %v5988_v35  ;;  %v5688_v35 = vor.u32 %v6382_v45, %v5685_v14  ;;  %v6402_v14 = vld [vmem:[%s9147_s7 + $0x254] sm:$0xf] }
 0x477   : > { %4387 = vmatpush.bf16.msra.mxu2 %v5860_v44  ;;  %4400 = vmatpush.bf16.msrb.mxu3 %v5924_v6  ;;  %v6332_v44 = vld [vmem:[%s9147_s7 + $0x24] sm:$0xf]  ;;  %v5485_v6 = vld [vmem:[%s9147_s7 + $0x28] sm:$0xf0] }
 0x478   : > { %v5488_v42 = vor.u32 %v6332_v44, %v5485_v6  ;;  %v6446_v44 = vld [vmem:[%s9147_s7 + $0x3b4] sm:$0xf]  ;;  %v5941_v6 = vld [vmem:[%s9147_s7 + $0x3b8] sm:$0xf0] }
 0x479   : > { %4414 = vmatpush.bf16.msrb.mxu1 %v5980_v34  ;;  %v5552_v34 = vor.u32 %v6348_v46, %v5549_v12  ;;  %v5824_v46 = vor.u32 %v6416_v0, %v5821_v52  ;;  %v6398_v12 = vld [vmem:[%s9147_s7 + $0x234] sm:$0xf]  ;;  %v5981_v0 = vld [vmem:[%s9147_s7 + $0x408] sm:$0xf0] }
 0x47b   : > { %4388 = vmatpush.bf16.msra.mxu2 %v5852_v63  ;;  %4401 = vmatpush.bf16.msrb.mxu3 %v5916_v56  ;;  %v5672_v63 = vor.u32 %v6378_v20, %v5669_v58  ;;  %v6376_v56 = vld [vmem:[%s9147_s7 + $0x184] sm:$0xf]  ;;  %v6414_v20 = vld [vmem:[%s9147_s7 + $0x2b4] sm:$0xf]  ;;  %v5813_v58 = vld [vmem:[%s9147_s7 + $0x2b8] sm:$0xf0] }
 0x47c   : > { %4415 = vmatmul.bf16.vlgmr.msrb.gmra.mxu1 %v8604_v19  ;;  %v5664_v28 = vor.u32 %v6376_v56, %v5661_v57  ;;  %v6412_v56 = vld [vmem:[%s9147_s7 + $0x2a4] sm:$0xf]  ;;  %v5805_v57 = vld [vmem:[%s9147_s7 + $0x2a8] sm:$0xf0] }
 0x47d   : > { %4459 = vmatpush.bf16.msra.mxu1 %v5720_v55  ;;  %v5541_v55 = vld [vmem:[%s9147_s7 + $0x98] sm:$0xf0]  ;;  %v5808_v7 = vor.u32 %v6412_v56, %v5805_v57 }
 0x47e   : > { %4389 = vmatmul.bf16.vlgmr.msra.gmra.mxu2 %v8526_v30  ;;  %4402 = vmatmul.bf16.vlgmr.msrb.gmra.mxu3 %v8616_v26  ;;  %v5696_v30 = vor.u32 %v6384_v3, %v5693_v60  ;;  %v5544_v17 = vor.u32 %v6346_v41, %v5541_v55  ;;  %v6404_v60 = vld [vmem:[%s9147_s7 + $0x264] sm:$0xf]  ;;  %v5816_v41 = vor.u32 %v6414_v20, %v5813_v58 }
 0x47f   : > { %4420 = vmatpush.bf16.msrb.mxu2 %v5528_v49  ;;  %4433 = vmatpush.bf16.msra.mxu3 %v5592_v13  ;;  %v6454_v49 = vld [vmem:[%s9147_s7 + $0x3f4] sm:$0xf]  ;;  %v5973_v13 = vld [vmem:[%s9147_s7 + $0x3f8] sm:$0xf0]  ;;  %v6396_v55 = vld [vmem:[%s9147_s7 + $0x224] sm:$0xf] }
 0x480   : > { %v5976_v61 = vor.u32 %v6454_v49, %v5973_v13  ;;  %v6442_v49 = vld [vmem:[%s9147_s7 + $0x394] sm:$0xf]  ;;  %v5925_v13 = vld [vmem:[%s9147_s7 + $0x398] sm:$0xf0] }
 0x481   : > { %4460 = vmatpush.bf16.msra.mxu1 %v5712_v59  ;;  %v6406_v59 = vld [vmem:[%s9147_s7 + $0x274] sm:$0xf] }
 0x482   : > { %v5784_v33 = vor.u32 %v6406_v59, %v5781_v37  ;;  %v5928_v59 = vor.u32 %v6442_v49, %v5925_v13  ;;  %v5736_v37 = vor.u32 %v6394_v29, %v5733_v23 }
 0x483   : > { %4421 = vmatpush.bf16.msrb.mxu2 %v5520_v62  ;;  %4434 = vmatpush.bf16.msra.mxu3 %v5584_v4  ;;  %v6422_v62 = vld [vmem:[%s9147_s7 + $0x2f4] sm:$0xf]  ;;  %v5845_v4 = vld [vmem:[%s9147_s7 + $0x2f8] sm:$0xf0] }
 0x484   : > { %v5848_v3 = vor.u32 %v6422_v62, %v5845_v4  ;;  %v5917_v62 = vld [vmem:[%s9147_s7 + $0x388] sm:$0xf0] }
 0x485   : > { %4461 = vmatpush.bf16.msra.mxu1 %v5704_v47  ;;  %v5965_v47 = vld [vmem:[%s9147_s7 + $0x3e8] sm:$0xf0] }
 0x486   : > { %v5968_v8 = vor.u32 %v6452_v2, %v5965_v47  ;;  %v5789_v2 = vld [vmem:[%s9147_s7 + $0x288] sm:$0xf0]  ;;  %v6470_v47 = vld [vmem:[%s9147_s7 + $0x474] sm:$0xf] }
 0x487   : > { %4422 = vmatpush.bf16.msrb.mxu2 %v5512_v27  ;;  %4435 = vmatpush.bf16.msra.mxu3 %v5576_v43  ;;  %v5773_v27 = vld [vmem:[%s9147_s7 + $0x268] sm:$0xf0]  ;;  %v6420_v43 = vld [vmem:[%s9147_s7 + $0x2e4] sm:$0xf] }
 0x488   : > { %v5776_v15 = vor.u32 %v6404_v60, %v5773_v27  ;;  %v5840_v45 = vor.u32 %v6420_v43, %v5837_v50 }
 0x489   : > { %4462 = vmatpush.bf16.msra.mxu1 %v5696_v30  ;;  %v5957_v30 = vld [vmem:[%s9147_s7 + $0x3d8] sm:$0xf0] }
 0x48a   : > { %v5960_v16 = vor.u32 %v6450_v10, %v5957_v30  ;;  %v6466_v30 = vld [vmem:[%s9147_s7 + $0x454] sm:$0xf] }
 0x48b   : > { %4423 = vmatpush.bf16.msrb.mxu2 %v5504_v40  ;;  %4436 = vmatpush.bf16.msra.mxu3 %v5568_v11  ;;  %v6418_v40 = vld [vmem:[%s9147_s7 + $0x2d4] sm:$0xf]  ;;  %v5829_v11 = vld [vmem:[%s9147_s7 + $0x2d8] sm:$0xf0] }
 0x48d   : > { %4463 = vmatpush.bf16.msra.mxu1 %v5688_v35  ;;  %v5757_v35 = vld [vmem:[%s9147_s7 + $0x248] sm:$0xf0] }
 0x48f   : > { %4424 = vmatpush.bf16.msrb.mxu2 %v5496_v54  ;;  %4437 = vmatpush.bf16.msra.mxu3 %v5560_v48  ;;  %v5760_v48 = vor.u32 %v6400_v24, %v5757_v35  ;;  %v6456_v35 = vld [vmem:[%s9147_s7 + $0x404] sm:$0xf] }
 0x490   : > { %v5984_v52 = vor.u32 %v6456_v35, %v5981_v0  ;;  %v6477_v35 = vld [vmem:[%s9149_s9 + $0x24] sm:$0xf0] }
 0x491   : > { %4464 = vmatpush.bf16.msra.mxu1 %v5680_v53  ;;  %v5749_v53 = vld [vmem:[%s9147_s7 + $0x238] sm:$0xf0] }
 0x493   : > { %4425 = vmatpush.bf16.msrb.mxu2 %v5488_v42  ;;  %4438 = vmatpush.bf16.msra.mxu3 %v5552_v34  ;;  %v5944_v42 = vor.u32 %v6446_v44, %v5941_v6  ;;  %v5752_v34 = vor.u32 %v6398_v12, %v5749_v53  ;;  %v6099_v44 = vld [vmem:[%s9149_s9 + $0x70] sm:$0xf]  ;;  %v6487_v6 = vld [vmem:[%s9149_s9 + $0x74] sm:$0xf0] }
 0x494   : > { %v6100_v12 = vor.u32 %v6487_v6, %v6099_v44 }
 0x495   : > { %4465 = vmatpush.bf16.msra.mxu1 %v5672_v63  ;;  %v5741_v63 = vld [vmem:[%s9147_s7 + $0x228] sm:$0xf0] }
 0x497   : > { %4426 = vmatpush.bf16.msrb.mxu2 %v5480_v51  ;;  %4439 = vmatpush.bf16.msra.mxu3 %v5544_v17  ;;  %v5936_v51 = vor.u32 %v6444_v25, %v5933_v36  ;;  %v5744_v17 = vor.u32 %v6396_v55, %v5741_v63  ;;  %v8935_v25 = vld [vmem:[%s9148_s8] sm:$0x3] }
 0x498   : > { %v3547_v55 = vperm.slane %v8935_v25, 0 }
 0x499   : > { %4466 = vmatpush.bf16.msra.mxu1 %v5664_v28  ;;  %v5797_v28 = vld [vmem:[%s9147_s7 + $0x298] sm:$0xf0] }
 0x49a   : > { %v5800_v4 = vor.u32 %v6410_v9, %v5797_v28 }
 0x49b   : > { %4427 = vmatpush.bf16.msrb.mxu2 %v5472_v5  ;;  %4440 = vmatpush.bf16.msra.mxu3 %v5536_v18  ;;  %v6392_v5 = vld [vmem:[%s9147_s7 + $0x204] sm:$0xf]  ;;  %v5725_v18 = vld [vmem:[%s9147_s7 + $0x208] sm:$0xf0] }
 0x49c   : > { %4467 = vmatmul.bf16.vlgmr.msra.gmra.mxu1 %v8516_v22  ;;  %v5765_v22 = vld [vmem:[%s9147_s7 + $0x258] sm:$0xf0]  ;;  %v5728_v27 = vor.u32 %v6392_v5, %v5725_v18  ;;  %v6093_v5 = vld [vmem:[%s9149_s9 + $0x68] sm:$0xf0]  ;;  %v6083_v18 = vld [vmem:[%s9149_s9 + $0x50] sm:$0xf] }
 0x49d   : > { %4511 = vmatpush.bf16.msrb.mxu1 %v5976_v61  ;;  %v5768_v21 = vor.u32 %v6402_v14, %v5765_v22  ;;  %v6440_v61 = vld [vmem:[%s9147_s7 + $0x384] sm:$0xf] }
 0x49e   : > { %4428 = vmatmul.bf16.vlgmr.msrb.gmra.mxu2 %v8426_v32  ;;  %4441 = vmatmul.bf16.vlgmr.msra.gmra.mxu3 %v8428_v31  ;;  %v5949_v32 = vld [vmem:[%s9147_s7 + $0x3c8] sm:$0xf0]  ;;  %v5832_v31 = vor.u32 %v6418_v40, %v5829_v11  ;;  %v5920_v60 = vor.u32 %v6440_v61, %v5917_v62  ;;  %v6464_v22 = vld [vmem:[%s9147_s7 + $0x444] sm:$0xf]  ;;  %v6462_v11 = vld [vmem:[%s9147_s7 + $0x434] sm:$0xf] }
 0x49f   : > { %4472 = vmatpush.bf16.msra.mxu2 %v5784_v33  ;;  %4485 = vmatpush.bf16.msrb.mxu3 %v5848_v3  ;;  %v5952_v54 = vor.u32 %v6448_v1, %v5949_v32  ;;  %v6408_v33 = vld [vmem:[%s9147_s7 + $0x284] sm:$0xf]  ;;  %v6037_v3 = vld [vmem:[%s9147_s7 + $0x478] sm:$0xf0]  ;;  %v6458_v32 = vld [vmem:[%s9147_s7 + $0x414] sm:$0xf] }
 0x4a0   : > { %v5792_v43 = vor.u32 %v6408_v33, %v5789_v2  ;;  %v6040_v50 = vor.u32 %v6470_v47, %v6037_v3  ;;  %v6484_v61 = vld [vmem:[%s9149_s9 + $0x64] sm:$0xf]  ;;  %v6483_v33 = vld [vmem:[%s9149_s9 + $0x54] sm:$0xf0]  ;;  %v6482_v47 = vld [vmem:[%s9149_s9 + $0x54] sm:$0xf] }
 0x4a1   : > { %4512 = vmatpush.bf16.msrb.mxu1 %v5968_v8  ;;  %v6468_v8 = vld [vmem:[%s9147_s7 + $0x464] sm:$0xf]  ;;  %v6096_v2 = vor.u32 %v6484_v61, %v6093_v5  ;;  %v6085_v3 = vld [vmem:[%s9149_s9 + $0x58] sm:$0xf0] }
 0x4a3   : > { %4473 = vmatpush.bf16.msra.mxu2 %v5776_v15  ;;  %4486 = vmatpush.bf16.msrb.mxu3 %v5840_v45  ;;  %v6029_v15 = vld [vmem:[%s9147_s7 + $0x468] sm:$0xf0]  ;;  %v6021_v45 = vld [vmem:[%s9147_s7 + $0x458] sm:$0xf0] }
 0x4a4   : > { %v6032_v10 = vor.u32 %v6468_v8, %v6029_v15  ;;  %v6024_v14 = vor.u32 %v6466_v30, %v6021_v45  ;;  %v6481_v8 = vld [vmem:[%s9149_s9 + $0x44] sm:$0xf0]  ;;  %v6480_v15 = vld [vmem:[%s9149_s9 + $0x44] sm:$0xf] }
 0x4a5   : > { %4513 = vmatpush.bf16.msrb.mxu1 %v5960_v16  ;;  %v6460_v16 = vld [vmem:[%s9147_s7 + $0x424] sm:$0xf] }
 0x4a7   : > { %4474 = vmatpush.bf16.msra.mxu2 %v5768_v21  ;;  %4487 = vmatpush.bf16.msrb.mxu3 %v5832_v31  ;;  %v5997_v21 = vld [vmem:[%s9147_s7 + $0x428] sm:$0xf0]  ;;  %v5989_v31 = vld [vmem:[%s9147_s7 + $0x418] sm:$0xf0] }
 0x4a8   : > { %v6000_v1 = vor.u32 %v6460_v16, %v5997_v21  ;;  %v5992_v24 = vor.u32 %v6458_v32, %v5989_v31  ;;  %v6478_v16 = vld [vmem:[%s9149_s9 + $0x34] sm:$0xf]  ;;  %v6069_v21 = vld [vmem:[%s9149_s9 + $0x38] sm:$0xf0] }
 0x4a9   : > { %4514 = vmatpush.bf16.msrb.mxu1 %v5952_v54  ;;  %v6072_v31 = vor.u32 %v6478_v16, %v6069_v21 }
 0x4ab   : > { %4475 = vmatpush.bf16.msra.mxu2 %v5760_v48  ;;  %4488 = vmatpush.bf16.msrb.mxu3 %v5824_v46  ;;  %v6486_v46 = vld [vmem:[%s9149_s9 + $0x74] sm:$0xf] }
 0x4ad   : > { %4515 = vmatpush.bf16.msrb.mxu1 %v5944_v42 }
 0x4af   : > { %4476 = vmatpush.bf16.msra.mxu2 %v5752_v34  ;;  %4489 = vmatpush.bf16.msrb.mxu3 %v5816_v41 }
 0x4b1   : > { %4516 = vmatpush.bf16.msrb.mxu1 %v5936_v51 }
 0x4b3   : > { %4477 = vmatpush.bf16.msra.mxu2 %v5744_v17  ;;  %4490 = vmatpush.bf16.msrb.mxu3 %v5808_v7 }
 0x4b5   : > { %4517 = vmatpush.bf16.msrb.mxu1 %v5928_v59  ;;  %v6091_v59 = vld [vmem:[%s9149_s9 + $0x60] sm:$0xf] }
 0x4b7   : > { %4478 = vmatpush.bf16.msra.mxu2 %v5736_v37  ;;  %4491 = vmatpush.bf16.msrb.mxu3 %v5800_v4  ;;  %v6485_v37 = vld [vmem:[%s9149_s9 + $0x64] sm:$0xf0] }
 0x4b8   : > { %v6092_v4 = vor.u32 %v6485_v37, %v6091_v59 }
 0x4b9   : > { %4518 = vmatpush.bf16.msrb.mxu1 %v5920_v60 }
 0x4bb   : > { %4479 = vmatpush.bf16.msra.mxu2 %v5728_v27  ;;  %4492 = vmatpush.bf16.msrb.mxu3 %v5792_v43  ;;  %v6084_v27 = vor.u32 %v6483_v33, %v6083_v18  ;;  %v6088_v43 = vor.u32 %v6482_v47, %v6085_v3 }
 0x4bc   : > { %4519 = vmatmul.bf16.vlgmr.msrb.gmra.mxu1 %v8616_v26  ;;  %v6013_v26 = vld [vmem:[%s9147_s7 + $0x448] sm:$0xf0] }
 0x4bd   : > { %v6016_v40 = vor.u32 %v6464_v22, %v6013_v26  ;;  %v6067_v26 = vld [vmem:[%s9149_s9 + $0x30] sm:$0xf] }
 0x4be   : > { %4480 = vmatmul.bf16.vlgmr.msra.gmra.mxu2 %v8518_v38  ;;  %4493 = vmatmul.bf16.vlgmr.msrb.gmra.mxu3 %v8496_v39  ;;  %v6005_v39 = vld [vmem:[%s9147_s7 + $0x438] sm:$0xf0] }
 0x4bf   : > { %4524 = vmatpush.bf16.msrb.mxu2 %v6040_v50  ;;  %v6008_v38 = vor.u32 %v6462_v11, %v6005_v39  ;;  %4780 = vmatpush.bf16.msra.mxu3 %v6100_v12  ;;  %v6075_v50 = vld [vmem:[%s9149_s9 + $0x40] sm:$0xf] }
 0x4c0   : > { %v6076_v45 = vor.u32 %v6481_v8, %v6075_v50  ;;  %v6163_v8 = vld [vmem:[%s9149_s9 + $0xf0] sm:$0xf] }
 0x4c3   : > { %4525 = vmatpush.bf16.msrb.mxu2 %v6032_v10  ;;  %4781 = vmatpush.bf16.msra.mxu3 %v6092_v4  ;;  %v6077_v10 = vld [vmem:[%s9149_s9 + $0x48] sm:$0xf0] }
 0x4c4   : > { %v6080_v22 = vor.u32 %v6480_v15, %v6077_v10  ;;  %v6503_v15 = vld [vmem:[%s9149_s9 + $0xf4] sm:$0xf0]  ;;  %v6502_v10 = vld [vmem:[%s9149_s9 + $0xf4] sm:$0xf] }
 0x4c7   : > { %4526 = vmatpush.bf16.msrb.mxu2 %v6024_v14  ;;  %4782 = vmatpush.bf16.msra.mxu3 %v6084_v27 }
 0x4cb   : > { %4527 = vmatpush.bf16.msrb.mxu2 %v6016_v40  ;;  %v6479_v40 = vld [vmem:[%s9149_s9 + $0x34] sm:$0xf0]  ;;  %4783 = vmatpush.bf16.msra.mxu3 %v6076_v45  ;;  %v6165_v45 = vld [vmem:[%s9149_s9 + $0xf8] sm:$0xf0] }
 0x4cc   : > { %v6068_v32 = vor.u32 %v6479_v40, %v6067_v26 }
 0x4cf   : > { %4528 = vmatpush.bf16.msrb.mxu2 %v6008_v38  ;;  %4784 = vmatpush.bf16.msra.mxu3 %v6068_v32  ;;  %v3548_v32 = vperm.slane %v8935_v25, 1  ;;  %v6499_v25 = vld [vmem:[%s9149_s9 + $0xd4] sm:$0xf0] }
 0x4d3   : > { %4529 = vmatpush.bf16.msrb.mxu2 %v6000_v1 }
 0x4d7   : > { %4530 = vmatpush.bf16.msrb.mxu2 %v5992_v24  ;;  %v6059_v24 = vld [vmem:[%s9149_s9 + $0x20] sm:$0xf] }
 0x4d8   : > { %v4338_v54 = vpop.f32.mrf.mxu1  ;;  %v8918_v48 = vpop.f32.mrf.mxu0  ;;  %v6060_v6 = vor.u32 %v6477_v35, %v6059_v24 }
 0x4da   : > { %4785 = vmatpush.bf16.msra.mxu3 %v6060_v6 }
 0x4db   : > { %4531 = vmatpush.bf16.msrb.mxu2 %v5984_v52  ;;  %v6476_v52 = vld [vmem:[%s9149_s9 + $0x24] sm:$0xf] }
 0x4de   : > { %4532 = vmatmul.bf16.vlgmr.msrb.gmra.mxu2 %v8604_v19  ;;  %v6101_v19 = vld [vmem:[%s9149_s9 + $0x78] sm:$0xf0] }
 0x4df   : > { %v6104_v53 = vor.u32 %v6486_v46, %v6101_v19  ;;  %v6051_v19 = vld [vmem:[%s9149_s9 + $0x10] sm:$0xf] }
 0x4e0   : > { %v4340_v20 = vpop.f32.mrf.mxu1  ;;  %v4457_v58 = vpop.f32.mrf.mxu0 }
 0x4e1   : > { %4806 = vmatpush.bf16.msra.mxu1 %v6104_v53  ;;  %v4312_v42 = vpop.f32.mrf.mxu2  ;;  %v4325_v34 = vpop.f32.mrf.mxu3  ;;  %v6475_v53 = vld [vmem:[%s9149_s9 + $0x14] sm:$0xf0] }
 0x4e2   : > { %v4313_v57 = vadd.f32 %v4312_v42, %v3547_v55 }
 0x4e4   : > { %v4326_v49 = vadd.f32 %v4325_v34, %v4313_v57  ;;  %v6474_v34 = vld [vmem:[%s9149_s9 + $0x14] sm:$0xf] }
 0x4e5   : > { %4807 = vmatpush.bf16.msra.mxu1 %v6096_v2 }
 0x4e6   : > { %v4339_v29 = vadd.f32 %v4338_v54, %v4326_v49  ;;  %v6061_v54 = vld [vmem:[%s9149_s9 + $0x28] sm:$0xf0]  ;;  %v6043_v49 = vld [vmem:[%s9149_s9] sm:$0xf] }
 0x4e7   : > { %v6064_v12 = vor.u32 %v6476_v52, %v6061_v54 }
 0x4e9   : > { %v4314_v36 = vpop.f32.mrf.mxu2  ;;  %v4327_v41 = vpop.f32.mrf.mxu3  ;;  %4808 = vmatpush.bf16.msra.mxu1 %v6088_v43 }
 0x4ea   : > { %v4377_v63 = vpop.f32.mrf.mxu1  ;;  %v8938_v56 = vpop.f32.mrf.mxu0  ;;  %v6053_v36 = vld [vmem:[%s9149_s9 + $0x18] sm:$0xf0] }
 0x4ed   : > { %4809 = vmatpush.bf16.msra.mxu1 %v6080_v22  ;;  %v6501_v22 = vld [vmem:[%s9149_s9 + $0xe4] sm:$0xf0] }
 0x4f1   : > { %v4351_v51 = vpop.f32.mrf.mxu2  ;;  %v4364_v17 = vpop.f32.mrf.mxu3  ;;  %4810 = vmatpush.bf16.msra.mxu1 %v6072_v31 }
 0x4f2   : > { %v4379_v13 = vpop.f32.mrf.mxu1  ;;  %v4509_v7 = vpop.f32.mrf.mxu0  ;;  %v4352_v23 = vadd.f32 %v4351_v51, %v4339_v29  ;;  %v6045_v29 = vld [vmem:[%s9149_s9 + $0x8] sm:$0xf0] }
 0x4f3   : > { %v6473_v13 = vld [vmem:[%s9149_s9 + $0x4] sm:$0xf0]  ;;  %v6472_v7 = vld [vmem:[%s9149_s9 + $0x4] sm:$0xf] }
 0x4f4   : > { %v4365_v60 = vadd.f32 %v4364_v17, %v4352_v23  ;;  %v6056_v17 = vor.u32 %v6474_v34, %v6053_v36  ;;  %v6048_v61 = vor.u32 %v6472_v7, %v6045_v29  ;;  %v6497_v34 = vld [vmem:[%s9149_s9 + $0xc4] sm:$0xf0] }
 0x4f5   : > { %4811 = vmatpush.bf16.msra.mxu1 %v6064_v12 }
 0x4f6   : > { %v4378_v30 = vadd.f32 %v4377_v63, %v4365_v60  ;;  %v6052_v63 = vor.u32 %v6475_v53, %v6051_v19  ;;  %v6147_v53 = vld [vmem:[%s9149_s9 + $0xd0] sm:$0xf] }
 0x4f8   : > { %4786 = vmatpush.bf16.msra.mxu3 %v6052_v63 }
 0x4f9   : > { %v4353_v9 = vpop.f32.mrf.mxu2  ;;  %v4366_v28 = vpop.f32.mrf.mxu3  ;;  %4812 = vmatpush.bf16.msra.mxu1 %v6056_v17  ;;  %v6131_v17 = vld [vmem:[%s9149_s9 + $0xb0] sm:$0xf] }
 0x4fa   : > { %v4416_v62 = vpop.f32.mrf.mxu1  ;;  %v6044_v28 = vor.u32 %v6473_v13, %v6043_v49  ;;  %v6495_v49 = vld [vmem:[%s9149_s9 + $0xb4] sm:$0xf0]  ;;  %v6494_v13 = vld [vmem:[%s9149_s9 + $0xb4] sm:$0xf] }
 0x4fb   : > { %v6132_v29 = vor.u32 %v6495_v49, %v6131_v17  ;;  %v6504_v17 = vld [vmem:[#allocation11] sm:$0xff]  ;;  %v6513_v49 = vld [vmem:[#allocation11 + $0x48] sm:$0xff] }
 0x4fc   : > { %4787 = vmatpush.bf16.msra.mxu3 %v6044_v28  ;;  %v6123_v28 = vld [vmem:[%s9149_s9 + $0xa0] sm:$0xf] }
 0x4fd   : > { %4813 = vmatpush.bf16.msra.mxu1 %v6048_v61  ;;  %v6492_v61 = vld [vmem:[%s9149_s9 + $0xa4] sm:$0xf] }
 0x501   : > { %v4390_v14 = vpop.f32.mrf.mxu2  ;;  %v4403_v39 = vpop.f32.mrf.mxu3 }
 0x502   : > { %v4391_v11 = vadd.f32 %v4390_v14, %v4378_v30  ;;  %v4418_v38 = vpop.f32.mrf.mxu1  ;;  %v6164_v30 = vor.u32 %v6503_v15, %v6163_v8  ;;  %v6155_v14 = vld [vmem:[%s9149_s9 + $0xe0] sm:$0xf] }
 0x503   : > { %v6157_v38 = vld [vmem:[%s9149_s9 + $0xe8] sm:$0xf0]  ;;  %v6156_v16 = vor.u32 %v6501_v22, %v6155_v14  ;;  %v6107_v14 = vld [vmem:[%s9149_s9 + $0x80] sm:$0xf]  ;;  %v6489_v22 = vld [vmem:[%s9149_s9 + $0x84] sm:$0xf0] }
 0x504   : > { %v4404_v1 = vadd.f32 %v4403_v39, %v4391_v11  ;;  %v6168_v11 = vor.u32 %v6502_v10, %v6165_v45  ;;  %v6500_v39 = vld [vmem:[%s9149_s9 + $0xe4] sm:$0xf]  ;;  %4793 = vmatpush.bf16.msrb.mxu0 %v6164_v30 }
 0x505   : > { %v6160_v21 = vor.u32 %v6500_v39, %v6157_v38  ;;  %v6108_v38 = vor.u32 %v6489_v22, %v6107_v14 }
 0x506   : > { %v4417_v0 = vadd.f32 %v4416_v62, %v4404_v1  ;;  %4819 = vmatpush.bf16.msra.mxu2 %v6168_v11 }
 0x508   : > { %v4537_v44 = vmax.f32 %v4417_v0, 0.0  ;;  %4794 = vmatpush.bf16.msrb.mxu0 %v6156_v16 }
 0x509   : > { %v4392_v46 = vpop.f32.mrf.mxu2  ;;  %v4405_v42 = vpop.f32.mrf.mxu3 }
 0x50a   : > { %v4540_v20 = vsel %vm9208_vm0, %v4537_v44, 0.0  ;;  %v4558_v58 = vrot.slane %v4537_v44, 4  ;;  %4820 = vmatpush.bf16.msra.mxu2 %v6160_v21  ;;  %v6139_v42 = vld [vmem:[%s9149_s9 + $0xc0] sm:$0xf] }
 0x50b   : > { %v4541_v41 = vrot.slane %v4540_v20, 4 }
 0x50c   : > { %v4562_v55 = vsel %vm9209_vm1, %v4558_v58, 0.0  ;;  %v6148_v58 = vor.u32 %v6499_v25, %v6147_v53  ;;  %v6509_v53 = vld [vmem:[#allocation11 + $0x28] sm:$0xff] }
 0x50d   : > { %v4542_v57 = vadd.f32 %v4541_v41, %v4540_v20  ;;  %v4563_v51 = vrot.slane %v4562_v55, 4  ;;  %v6498_v20 = vld [vmem:[%s9149_s9 + $0xd4] sm:$0xf]  ;;  %v6496_v41 = vld [vmem:[%s9149_s9 + $0xc4] sm:$0xf] }
 0x50e   : > { %4795 = vmatpush.bf16.msrb.mxu0 %v6148_v58  ;;  %v6517_v25 = vld [vmem:[#allocation11 + $0x68] sm:$0xff]  ;;  %v6516_v58 = vld [vmem:[#allocation11 + $0x60] sm:$0xff] }
 0x50f   : > { %v4543_v23 = vrot.slane %v4542_v57, 2  ;;  %v4564_v9 = vadd.f32 %v4563_v51, %v4562_v55  ;;  %v6141_v55 = vld [vmem:[%s9149_s9 + $0xc8] sm:$0xf0] }
 0x510   : > { %v6144_v51 = vor.u32 %v6496_v41, %v6141_v55 }
 0x511   : > { %v4544_v59 = vadd.f32 %v4543_v23, %v4542_v57  ;;  %v4565_v37 = vrot.slane %v4564_v9, 2  ;;  %v6140_v57 = vor.u32 %v6497_v34, %v6139_v42  ;;  %v6515_v42 = vld [vmem:[#allocation11 + $0x58] sm:$0xff] }
 0x513   : > { %v4545_v62 = vrot.slane %v4544_v59, 1  ;;  %v4566_v4 = vadd.f32 %v4565_v37, %v4564_v9  ;;  %4796 = vmatpush.bf16.msrb.mxu0 %v6140_v57  ;;  %v6505_v57 = vld [vmem:[#allocation11 + $0x8] sm:$0xff] }
 0x515   : > { %v4567_v5 = vrot.slane %v4566_v4, 1  ;;  %v4546_v33 = vadd.f32 %v4545_v62, %v4544_v59  ;;  %v6493_v59 = vld [vmem:[%s9149_s9 + $0xa4] sm:$0xf0]  ;;  %v6125_v62 = vld [vmem:[%s9149_s9 + $0xa8] sm:$0xf0] }
 0x517   : > { %v4568_v2 = vadd.f32 %v4567_v5, %v4566_v4  ;;  %4797 = vmatpush.bf16.msrb.mxu0 %v6132_v29  ;;  %v6124_v5 = vor.u32 %v6493_v59, %v6123_v28 }
 0x519   : > { %v4468_v18 = vpop.f32.mrf.mxu1  ;;  %v4576_v47 = vadd.f32 %v4568_v2, %v4546_v33  ;;  %v6115_v33 = vld [vmem:[%s9149_s9 + $0x90] sm:$0xf]  ;;  %v6491_v2 = vld [vmem:[%s9149_s9 + $0x94] sm:$0xf0] }
 0x51a   : > { %v6116_v8 = vor.u32 %v6491_v2, %v6115_v33 }
 0x51b   : > { %v4578_v3 = vmul.f32 0.25, %v4576_v47  ;;  %4798 = vmatpush.bf16.msrb.mxu0 %v6124_v5 }
 0x51d   : > { %v4580_v60 = vpack.c.bf16 %v4578_v3, %v4578_v3 }
 0x51f   : > { %4788 = vmatmul.bf16.vlgmr.msra.gmra.mxu3 %v4580_v60  ;;  %4814 = vmatmul.bf16.vlgmr.msra.gmra.mxu1 %v4580_v60  ;;  %v6490_v60 = vld [vmem:[%s9149_s9 + $0x94] sm:$0xf] }
 0x520   : > { %4799 = vmatpush.bf16.msrb.mxu0 %v6116_v8 }
 0x521   : > { %v4429_v27 = vpop.f32.mrf.mxu2  ;;  %v4442_v43 = vpop.f32.mrf.mxu3 }
 0x522   : > { %v4470_v50 = vpop.f32.mrf.mxu1  ;;  %v4430_v0 = vadd.f32 %v4429_v27, %v3548_v32  ;;  %v6117_v27 = vld [vmem:[%s9149_s9 + $0x98] sm:$0xf0] }
 0x523   : > { %v6120_v45 = vor.u32 %v6490_v60, %v6117_v27 }
 0x524   : > { %v4443_v52 = vadd.f32 %v4442_v43, %v4430_v0  ;;  %4800 = vmatpush.bf16.msrb.mxu0 %v6108_v38 }
 0x526   : > { %v4456_v6 = vadd.f32 %v8918_v48, %v4443_v52  ;;  %v6149_v48 = vld [vmem:[%s9149_s9 + $0xd8] sm:$0xf0] }
 0x527   : > { %v6152_v36 = vor.u32 %v6498_v20, %v6149_v48  ;;  %v6508_v20 = vld [vmem:[#allocation11 + $0x20] sm:$0xff]  ;;  %v6507_v48 = vld [vmem:[#allocation11 + $0x18] sm:$0xff] }
 0x528   : > { %v4469_v46 = vadd.f32 %v4468_v18, %v4456_v6  ;;  %v6128_v18 = vor.u32 %v6492_v61, %v6125_v62  ;;  %v6511_v6 = vld [vmem:[#allocation11 + $0x38] sm:$0xff] }
 0x529   : > { %v4431_v26 = vpop.f32.mrf.mxu2  ;;  %v4444_v40 = vpop.f32.mrf.mxu3  ;;  %4821 = vmatpush.bf16.msra.mxu2 %v6152_v36  ;;  %4965 = vmatpush.bf16.msrb.mxu3 %v6511_v6  ;;  %v6506_v36 = vld [vmem:[#allocation11 + $0x10] sm:$0xff] }
 0x52a   : > { %v6488_v26 = vld [vmem:[%s9149_s9 + $0x84] sm:$0xf]  ;;  %v6109_v40 = vld [vmem:[%s9149_s9 + $0x88] sm:$0xf0] }
 0x52d   : > { %4822 = vmatpush.bf16.msra.mxu2 %v6144_v51  ;;  %v6514_v51 = vld [vmem:[#allocation11 + $0x50] sm:$0xff] }
 0x539   : > { %v4520_v1 = vpop.f32.mrf.mxu1 }
 0x541   : > { %v4481_v31 = vpop.f32.mrf.mxu2  ;;  %v4494_v24 = vpop.f32.mrf.mxu3 }
 0x542   : > { %v4522_v35 = vpop.f32.mrf.mxu1  ;;  %v4482_v12 = vadd.f32 %v4481_v31, %v4469_v46  ;;  %v6519_v46 = vld [vmem:[#allocation11 + $0x78] sm:$0xff] }
 0x543   : > { %4978 = vmatpush.bf16.msra.mxu0 %v6519_v46 }
 0x544   : > { %v4495_v19 = vadd.f32 %v4494_v24, %v4482_v12  ;;  %v6510_v12 = vld [vmem:[#allocation11 + $0x30] sm:$0xff] }
 0x545   : > { %4966 = vmatpush.bf16.msrb.mxu3 %v6510_v12 }
 0x546   : > { %v4508_v63 = vadd.f32 %v8938_v56, %v4495_v19  ;;  %v6133_v56 = vld [vmem:[%s9149_s9 + $0xb8] sm:$0xf0]  ;;  %v6518_v19 = vld [vmem:[#allocation11 + $0x70] sm:$0xff] }
 0x547   : > { %v6136_v9 = vor.u32 %v6494_v13, %v6133_v56  ;;  %4979 = vmatpush.bf16.msra.mxu0 %v6518_v19  ;;  %v6512_v13 = vld [vmem:[#allocation11 + $0x40] sm:$0xff] }
 0x548   : > { %v4521_v7 = vadd.f32 %v4520_v1, %v4508_v63  ;;  %v6112_v1 = vor.u32 %v6488_v26, %v6109_v40  ;;  %v4614_v56 = vld [vmem:[%s9150_s10] sm:$0x3] }
 0x549   : > { %v4483_v54 = vpop.f32.mrf.mxu2  ;;  %v4496_v44 = vpop.f32.mrf.mxu3  ;;  %4823 = vmatpush.bf16.msra.mxu2 %v6136_v9  ;;  %4967 = vmatpush.bf16.msrb.mxu3 %v6509_v53  ;;  %v4777_v9 = vperm.slane %v4614_v56, 1 }
 0x54b   : > { %4980 = vmatpush.bf16.msra.mxu0 %v6517_v25 }
 0x54d   : > { %4824 = vmatpush.bf16.msra.mxu2 %v6128_v18  ;;  %4968 = vmatpush.bf16.msrb.mxu3 %v6508_v20 }
 0x54f   : > { %4981 = vmatpush.bf16.msra.mxu0 %v6516_v58 }
 0x551   : > { %4825 = vmatpush.bf16.msra.mxu2 %v6120_v45  ;;  %4969 = vmatpush.bf16.msrb.mxu3 %v6507_v48 }
 0x553   : > { %4982 = vmatpush.bf16.msra.mxu0 %v6515_v42 }
 0x555   : > { %4826 = vmatpush.bf16.msra.mxu2 %v6112_v1  ;;  %4970 = vmatpush.bf16.msrb.mxu3 %v6506_v36 }
 0x557   : > { %4983 = vmatpush.bf16.msra.mxu0 %v6514_v51 }
 0x559   : > { %4971 = vmatpush.bf16.msrb.mxu3 %v6505_v57 }
 0x55b   : > { %4984 = vmatpush.bf16.msra.mxu0 %v6513_v49 }
 0x55d   : > { %4972 = vmatpush.bf16.msrb.mxu3 %v6504_v17 }
 0x55f   : > { %4985 = vmatpush.bf16.msra.mxu0 %v6512_v13 }
 0x561   : > { %v4533_v23 = vpop.f32.mrf.mxu2 }
 0x562   : > { %v4534_v37 = vadd.f32 %v4533_v23, %v4521_v7  ;;  %v4776_v7 = vperm.slane %v4614_v56, 0 }
 0x564   : > { %v4538_v4 = vmax.f32 %v4534_v37, 0.0 }
 0x566   : > { %v4547_v47 = vsel %vm9210_vm6, %v4538_v4, 0.0  ;;  %v4559_v3 = vrot.slane %v4538_v4, 4 }
 0x567   : > { %v4548_v43 = vrot.slane %v4547_v47, 4 }
 0x568   : > { %v4569_v50 = vsel %vm9211_vm2, %v4559_v3, 0.0 }
 0x569   : > { %v4549_v15 = vadd.f32 %v4548_v43, %v4547_v47  ;;  %v4570_v10 = vrot.slane %v4569_v50, 4  ;;  %v4535_v30 = vpop.f32.mrf.mxu2  ;;  %v4868_v47 = vld [vmem:[%s9152_s12] sm:$0x1] }
 0x56b   : > { %v4550_v11 = vrot.slane %v4549_v15, 2  ;;  %v4571_v39 = vadd.f32 %v4570_v10, %v4569_v50 }
 0x56d   : > { %v4551_v16 = vadd.f32 %v4550_v11, %v4549_v15  ;;  %v4572_v21 = vrot.slane %v4571_v39, 2 }
 0x56f   : > { %v4552_v32 = vrot.slane %v4551_v16, 1  ;;  %v4573_v31 = vadd.f32 %v4572_v21, %v4571_v39 }
 0x571   : > { %v4574_v24 = vrot.slane %v4573_v31, 1  ;;  %v4553_v35 = vadd.f32 %v4552_v32, %v4551_v16 }
 0x573   : > { %v4575_v0 = vadd.f32 %v4574_v24, %v4573_v31 }
 0x575   : > { %v4577_v52 = vadd.f32 %v4575_v0, %v4553_v35 }
 0x577   : > { %v4579_v54 = vmul.f32 0.25, %v4577_v52 }
 0x579   : > { %v4581_v44 = vpack.c.bf16 %v4579_v54, %v4579_v54 }
 0x57b   : > { %4801 = vmatmul.bf16.vlgmr.msrb.gmra.mxu0 %v4581_v44  ;;  %4827 = vmatmul.bf16.vlgmr.msra.gmra.mxu2 %v4581_v44 }
 0x59c   : > { %v4815_v34 = vpop.f32.mrf.mxu1 }
 0x59d   : > { %v4816_v37 = vadd.f32 %v4815_v34, %v4777_v9 }
 0x5a2   : > { %v4789_v41 = vpop.f32.mrf.mxu3 }
 0x5a3   : > { %v4790_v29 = vadd.f32 %v4789_v41, %v4776_v7 }
 0x5a4   : > { %v4817_v55 = vpop.f32.mrf.mxu1 }
 0x5aa   : > { %v4791_v63 = vpop.f32.mrf.mxu3 }
 0x5f8   : > { %v4802_v23 = vpop.f32.mrf.mxu0 }
 0x5f9   : > { %v4803_v28 = vadd.f32 %v4802_v23, %v4790_v29 }
 0x5fb   : > { %v4832_v59 = vmax.f32 %v4803_v28, 0.0 }
 0x5fd   : > { %v4834_v61 = vpack.c.bf16 %v4832_v59, %v4832_v59 }
 0x5fe   : > { %v4828_v62 = vpop.f32.mrf.mxu2 }
 0x5ff   : > { %v4829_v4 = vadd.f32 %v4828_v62, %v4816_v37  ;;  %4973 = vmatmul.bf16.vlgmr.msrb.gmra.mxu3 %v4834_v61 }
 0x600   : > { %v4804_v5 = vpop.f32.mrf.mxu0 }
 0x601   : > { %v4833_v18 = vmax.f32 %v4829_v4, 0.0 }
 0x603   : > { %v4835_v33 = vpack.c.bf16 %v4833_v18, %v4833_v18 }
 0x605   : > { %4986 = vmatmul.bf16.vlgmr.msra.gmra.mxu0 %v4835_v33 }
 0x606   : > { %v4830_v2 = vpop.f32.mrf.mxu2 }
 0x682   : > { %v4974_v3 = vpop.f32.mrf.mxu3  ;;  %v4987_v60 = vpop.f32.mrf.mxu0 }
 0x683   : > { %v4975_v27 = vadd.f32 %v4974_v3, %v4868_v47 }
 0x685   : > { %v4988_v43 = vadd.f32 %v4987_v60, %v4975_v27 }
 0x687   : > { %4991 = vst [vmem:[%s453_s26] sm:$0x1] %v4988_v43 }
 0x68a   : > { %v4976_v50 = vpop.f32.mrf.mxu3  ;;  %v4989_v8 = vpop.f32.mrf.mxu0 }
 0x68b PF: > { %s24_s25 = sadd.s32 1, %s6590_s25  }
 0x68c   : > { %p21_p7 = scmp.ge.s32.totalorder %s24_s25, 4  }
 0x68e   :  { %23 = sbr.rel (!%p21_p7) target bundleno = 1 (0x1), region = 150 }
 0x693   :  { %5009 = vsyncpa [#allocation12], 1 }
 0x694   :  { %5011 = vsyncpa [#allocation12 + $0x1], 1 }

</bundles_post_ra>
